<compile_context>
chip_gen: v7x
topology: tpu7x:2x2x1
jax: 0.10.0
libtpu: 0.0.40
codegen_flags: <defaults>
</compile_context>

<pallas_src>
import functools
import math

import jax
import jax.numpy as jnp
from jax import lax
from jax.experimental import pallas as pl
from jax.experimental.pallas import tpu as pltpu


# ----------------------------- Pallas kernel -------------------------------

def _fused_aux_kernel(pooled_ref, cw_ref, cb_ref, w1_ref, b1_ref, w2_ref,
                      b2_ref, o_ref, flat_ref, acc_ref, *, n_rows, positions,
                      cout):
    """Fused  1x1-conv+ReLU -> fc1+ReLU -> fc2  for one fc1-column block.

    Grid = (n1 // tn1,), "arbitrary": step j computes fc1 output columns
    [j*tn1, (j+1)*tn1) and accumulates their fc2 contribution into acc_ref.
    The tiny 1x1 conv runs once at step 0; its ReLU'd bf16 output is laid out
    in flat_ref with columns ordered (position, channel) — the
    torch.flatten(NCHW) permutation is folded into the fc1 weight rows.
    """
    j = pl.program_id(0)

    @pl.when(j == 0)
    def _init():
        acc_ref[...] = jnp.zeros_like(acc_ref)
        # 1x1 conv == channel matmul (no im2col).  One (n_rows, Cin) row block
        # per spatial position; each position's `cout` output channels land in
        # their own 128-lane band of the flattened activation scratch.
        for p in range(positions):
            c = jnp.dot(pooled_ref[pl.ds(p * n_rows, n_rows), :], cw_ref[...],
                        preferred_element_type=jnp.float32)
            c = jnp.maximum(c + cb_ref[...], 0.0)          # bias + ReLU in f32
            flat_ref[:, pl.ds(p * cout, cout)] = c.astype(flat_ref.dtype)

    # fc1 column block j (bias + ReLU in f32), then its fc2 partial product.
    h = jnp.dot(flat_ref[...], w1_ref[...], preferred_element_type=jnp.float32)
    h = jnp.maximum(h + b1_ref[...], 0.0).astype(jnp.bfloat16)
    acc_ref[...] += jnp.dot(h, w2_ref[...], preferred_element_type=jnp.float32)

    @pl.when(j == pl.num_programs(0) - 1)
    def _finalize():
        o_ref[...] = (acc_ref[...] + b2_ref[...]).astype(o_ref.dtype)


def _fused_aux_mlp(pooled_rows, baked, *, n_rows, positions):
    """All three InceptionAux matmuls in one pallas_call.

    pooled_rows : (positions*n_rows, cin_pad) bf16, rows ordered (position, n)
    returns     : (n_rows, n_classes_pad) f32 logits (padded rows/cols junk/0)
    """
    cin_pad = pooled_rows.shape[1]
    cout = baked["conv_w"].shape[1]            # 128
    k1, n1 = baked["fc1_w"].shape              # (2048, 1024)
    n_cls_pad = baked["fc2_w"].shape[1]        # num_classes padded to >=128
    assert k1 == positions * cout, "fc1 in_features != positions * conv_out"

    # fc1-column / fc2-reduction tile.  512 keeps the streamed fc1 weight
    # block at 2 MiB bf16 (4 MiB double-buffered) — well under v5e's 16 MiB
    # default scoped VMEM — while the j=1 weight DMA overlaps the j=0 compute.
    tn1 = 512 if n1 % 512 == 0 else n1
    grid = (n1 // tn1,)

    kernel = functools.partial(_fused_aux_kernel, n_rows=n_rows,
                               positions=positions, cout=cout)

    return pl.pallas_call(
        kernel,
        out_shape=jax.ShapeDtypeStruct((n_rows, n_cls_pad), jnp.float32),
        grid_spec=pltpu.PrefetchScalarGridSpec(
            num_scalar_prefetch=0,
            grid=grid,
            in_specs=[
                pl.BlockSpec((positions * n_rows, cin_pad), lambda j: (0, 0)),
                pl.BlockSpec((cin_pad, cout), lambda j: (0, 0)),   # conv w
                pl.BlockSpec((1, cout), lambda j: (0, 0)),         # conv b
                pl.BlockSpec((k1, tn1), lambda j: (0, j)),         # fc1 w
                pl.BlockSpec((1, tn1), lambda j: (0, j)),          # fc1 b
                pl.BlockSpec((tn1, n_cls_pad), lambda j: (j, 0)),  # fc2 w
                pl.BlockSpec((1, n_cls_pad), lambda j: (0, 0)),    # fc2 b
            ],
            out_specs=pl.BlockSpec((n_rows, n_cls_pad), lambda j: (0, 0)),
            scratch_shapes=[
                pltpu.VMEM((n_rows, k1), jnp.bfloat16),    # flattened conv out
                pltpu.VMEM((n_rows, n_cls_pad), jnp.float32),  # fc2 accumulator
            ],
        ),
        # One "arbitrary" reduction axis: the whole layer is a single launch.
        # TODO(synk): on v7x this forgoes dual-TC sharding of the fc1 weight
        # stream; at these shapes the saved launches + round-trips outweigh it.
        compiler_params=pltpu.CompilerParams(
            dimension_semantics=("arbitrary",)),
    )(pooled_rows, baked["conv_w"], baked["conv_b"],
      baked["fc1_w"], baked["fc1_b"], baked["fc2_w"], baked["fc2_b"])


# ------------------------------ JAX glue ------------------------------------

def _avg_pool_nchw(x, ksize, stride):
    """AvgPool2d(ksize, stride), no padding, NCHW layout, f32."""
    # TODO(synk): the overlapping 5x5/stride-3 pool stays as XLA glue — it is
    # <0.1% of this layer's bytes/FLOPs and has no clean rectangular BlockSpec.
    n, c, h, w = x.shape
    ho = (h - ksize) // stride + 1
    wo = (w - ksize) // stride + 1
    acc = jnp.zeros((n, c, ho, wo), dtype=jnp.float32)
    for di in range(ksize):
        for dj in range(ksize):
            acc = acc + x[:, :,
                          di:di + stride * (ho - 1) + 1:stride,
                          dj:dj + stride * (wo - 1) + 1:stride]
    return acc / float(ksize * ksize)


@functools.partial(jax.jit, static_argnums=(2,))
def _inception_aux_forward(x_nchw, baked, num_classes):
    """AvgPool(5,3) -> [1x1 conv+ReLU -> fc1+ReLU -> fc2] fused Pallas kernel."""
    n, cin = x_nchw.shape[0], x_nchw.shape[1]
    cout = baked["conv_w"].shape[1]
    cin_pad = baked["conv_w"].shape[0]

    pooled = _avg_pool_nchw(x_nchw.astype(jnp.float32), 5, 3)   # (N,Cin,Ho,Wo)
    _, _, ho, wo = pooled.shape
    positions = ho * wo
    assert positions * cout == baked["fc1_w"].shape[0], \
        "input spatial size incompatible with fc1 in_features"

    # Rows ordered (position, sample): each spatial position is a contiguous
    # sublane block inside the kernel.  Batch padded to a full f32 sublane (8)
    # and channels padded to a lane multiple; padded rows are sliced off below.
    n_rows = max(8, ((n + 7) // 8) * 8)
    pooled = jnp.transpose(pooled, (2, 3, 0, 1)).reshape(positions, n, cin)
    pooled = jnp.pad(pooled, ((0, 0), (0, n_rows - n), (0, cin_pad - cin)))
    pooled = pooled.reshape(positions * n_rows, cin_pad).astype(jnp.bfloat16)

    # F.dropout(p=0.5, training=False) is the identity at inference.
    out = _fused_aux_mlp(pooled, baked, n_rows=n_rows, positions=positions)
    return out[:n, :num_classes]


def _bake_params(params, num_classes):
    """Kernel-ready weights, built once at init: bf16, the torch.flatten(NCHW)
    permutation folded into fc1 rows, lane padding baked into fc2/conv."""
    cout, cin = params["conv_w"].shape[:2]
    n1, k1 = params["fc1_w"].shape                 # (out=1024, in=2048)
    positions = k1 // cout                         # 16 spatial positions
    cin_pad = max(128, ((cin + 127) // 128) * 128)
    n_cls_pad = max(128, ((num_classes + 127) // 128) * 128)

    conv_w = params["conv_w"].reshape(cout, cin).T                # (Cin, Cout)
    conv_w = jnp.pad(conv_w, ((0, cin_pad - cin), (0, 0)))

    # flatten index (torch, NCHW) = c*positions + p ; kernel layout = p*cout + c
    w1 = params["fc1_w"].T                                        # (2048, 1024)
    w1 = w1.reshape(cout, positions, n1).transpose(1, 0, 2).reshape(k1, n1)

    w2 = params["fc2_w"].T                                        # (1024, cls)
    w2 = jnp.pad(w2, ((0, 0), (0, n_cls_pad - num_classes)))
    b2 = jnp.pad(params["fc2_b"], (0, n_cls_pad - num_classes))

    return {
        "conv_w": conv_w.astype(jnp.bfloat16),
        "conv_b": params["conv_b"].reshape(1, cout).astype(jnp.float32),
        "fc1_w": w1.astype(jnp.bfloat16),
        "fc1_b": params["fc1_b"].reshape(1, n1).astype(jnp.float32),
        "fc2_w": w2.astype(jnp.bfloat16),
        "fc2_b": b2.reshape(1, n_cls_pad).astype(jnp.float32),
    }


class InceptionAux:
    """JAX/Pallas port of the PyTorch InceptionAux module (inference mode)."""

    def __init__(self, in_channels, num_classes, key=None):
        if key is None:
            key = jax.random.PRNGKey(0)
        ks = jax.random.split(key, 6)

        def uniform(k, shape, fan_in):
            bound = 1.0 / math.sqrt(fan_in)
            return jax.random.uniform(k, shape, minval=-bound, maxval=bound,
                                      dtype=jnp.float32)

        self.params = {
            # nn.Conv2d(in_channels, 128, kernel_size=1): (Cout, Cin, 1, 1)
            "conv_w": uniform(ks[0], (128, in_channels, 1, 1), in_channels),
            "conv_b": uniform(ks[1], (128,), in_channels),
            # nn.Linear(2048, 1024): (out, in)
            "fc1_w": uniform(ks[2], (1024, 2048), 2048),
            "fc1_b": uniform(ks[3], (1024,), 2048),
            # nn.Linear(1024, num_classes)
            "fc2_w": uniform(ks[4], (num_classes, 1024), 1024),
            "fc2_b": uniform(ks[5], (num_classes,), 1024),
        }
        # Pre-baked once so the hot path never pads/casts weights.
        self.baked = _bake_params(self.params, num_classes)
        self.in_channels = in_channels
        self.num_classes = num_classes

    def __call__(self, x_nchw):
        return _inception_aux_forward(x_nchw, self.baked, self.num_classes)


# --------------------------- pure-JAX reference ------------------------------

def _reference_forward(x, params):
    """Independent XLA reference (same bf16-in / f32-accumulate math)."""
    n = x.shape[0]
    pooled = lax.reduce_window(x.astype(jnp.float32), 0.0, lax.add,
                               (1, 1, 5, 5), (1, 1, 3, 3), "VALID") / 25.0
    y = lax.conv_general_dilated(
        pooled.astype(jnp.bfloat16), params["conv_w"].astype(jnp.bfloat16),
        window_strides=(1, 1), padding="VALID",
        dimension_numbers=("NCHW", "OIHW", "NCHW"),
        preferred_element_type=jnp.float32)
    y = jnp.maximum(y + params["conv_b"].reshape(1, -1, 1, 1), 0.0)
    f = y.reshape(n, -1)                                  # torch.flatten(x, 1)
    h = jnp.dot(f.astype(jnp.bfloat16),
                params["fc1_w"].T.astype(jnp.bfloat16),
                preferred_element_type=jnp.float32) + params["fc1_b"]
    h = jnp.maximum(h, 0.0)
    out = jnp.dot(h.astype(jnp.bfloat16),
                  params["fc2_w"].T.astype(jnp.bfloat16),
                  preferred_element_type=jnp.float32) + params["fc2_b"]
    return out


# ------------------------------- main ---------------------------------------

if __name__ == "__main__":
    key = jax.random.PRNGKey(0)
    k_x, k_p = jax.random.split(key)

    # 14x14 input -> AvgPool(5, stride=3) -> 4x4; 128 * 4 * 4 = 2048 = fc1 in.
    N, Cin, H, W = 2, 16, 14, 14
    num_classes = 10

    x = jax.random.normal(k_x, (N, Cin, H, W), dtype=jnp.float32)
    mod = InceptionAux(Cin, num_classes, key=k_p)

    y = mod(x)
    y = jax.block_until_ready(y)

    ref = _reference_forward(x, mod.params)
    assert y.shape == (N, num_classes), y.shape
    err = float(jnp.max(jnp.abs(y - ref)))
    assert err < 5e-3, f"max abs diff vs reference: {err}"

    print("KERNEL_OK")
</pallas_src>

<mosaic_0001>
module attributes {stable_mosaic.version = 11 : i64} {
  func.func @_fused_aux_kernel(%arg0: i32, %arg1: memref<128x128xbf16, #tpu.memory_space<vmem>>, %arg2: memref<128x128xbf16, #tpu.memory_space<vmem>>, %arg3: memref<1x128xf32, #tpu.memory_space<vmem>>, %arg4: memref<2048x512xbf16, #tpu.memory_space<vmem>>, %arg5: memref<1x512xf32, #tpu.memory_space<vmem>>, %arg6: memref<512x128xbf16, #tpu.memory_space<vmem>>, %arg7: memref<1x128xf32, #tpu.memory_space<vmem>>, %arg8: memref<8x128xf32, #tpu.memory_space<vmem>>, %arg9: memref<8x2048xbf16, #tpu.memory_space<vmem>>, %arg10: memref<8x128xf32, #tpu.memory_space<vmem>>) attributes {dimension_semantics = [#tpu.dimension_semantics<arbitrary>], iteration_bounds = array<i64: 2>, scalar_prefetch = 0 : i64, scratch_operands = 2 : i64, tpu.core_type = #tpu.core_type<tc>, window_params = [{pipeline_mode = #tpu.pipeline_mode<synchronous>, transform_indices = @transform_0, window_bounds = array<i64: 128, 128>}, {pipeline_mode = #tpu.pipeline_mode<synchronous>, transform_indices = @transform_1, window_bounds = array<i64: 128, 128>}, {pipeline_mode = #tpu.pipeline_mode<synchronous>, transform_indices = @transform_2, window_bounds = array<i64: 1, 128>}, {transform_indices = @transform_3, window_bounds = array<i64: 2048, 512>}, {transform_indices = @transform_4, window_bounds = array<i64: 1, 512>}, {transform_indices = @transform_5, window_bounds = array<i64: 512, 128>}, {pipeline_mode = #tpu.pipeline_mode<synchronous>, transform_indices = @transform_6, window_bounds = array<i64: 1, 128>}, {pipeline_mode = #tpu.pipeline_mode<synchronous>, transform_indices = @transform_7, window_bounds = array<i64: 8, 128>}]} {
    %c0_i32 = arith.constant 0 : i32
    %0 = arith.cmpi eq, %arg0, %c0_i32 : i32
    %1 = arith.extui %0 : i1 to i32
    %c0_i32_0 = arith.constant 0 : i32
    %2 = arith.cmpi ne, %1, %c0_i32_0 : i32
    scf.if %2 {
      %cst_15 = arith.constant 0.000000e+00 : f32
      %20 = vector.broadcast %cst_15 : f32 to vector<8x128xf32>
      %c0_16 = arith.constant 0 : index
      %c0_17 = arith.constant 0 : index
      %21 = vector.load %arg10[%c0_16, %c0_17] : memref<8x128xf32, #tpu.memory_space<vmem>>, vector<8x128xf32>
      tpu.vector_store %arg10[%c0_16, %c0_17], %20 {strides = array<i32>} : memref<8x128xf32, #tpu.memory_space<vmem>>, vector<8x128xf32>,
      %c0_18 = arith.constant 0 : index
      %c0_19 = arith.constant 0 : index
      %22 = vector.load %arg1[%c0_18, %c0_19] : memref<128x128xbf16, #tpu.memory_space<vmem>>, vector<8x128xbf16>
      %c0_20 = arith.constant 0 : index
      %c0_21 = arith.constant 0 : index
      %23 = vector.load %arg2[%c0_20, %c0_21] : memref<128x128xbf16, #tpu.memory_space<vmem>>, vector<128x128xbf16>
      %cst_22 = arith.constant dense<0.000000e+00> : vector<8x128xf32>
      %24 = tpu.matmul %22, %23, %cst_22 {dimension_numbers = #tpu.dot_dimension_numbers<[1], [0], [0], [1], [0, 0, 1, 1], [], []>} : vector<8x128xbf16>, vector<128x128xbf16>, vector<8x128xf32> -> vector<8x128xf32>
      %c0_23 = arith.constant 0 : index
      %c0_24 = arith.constant 0 : index
      %25 = vector.load %arg3[%c0_23, %c0_24] : memref<1x128xf32, #tpu.memory_space<vmem>>, vector<1x128xf32>
      %26 = vector.broadcast %25 : vector<1x128xf32> to vector<8x128xf32>
      %27 = arith.addf %24, %26 : vector<8x128xf32>
      %cst_25 = arith.constant 0.000000e+00 : f32
      %28 = vector.broadcast %cst_25 : f32 to vector<8x128xf32>
      %29 = arith.maximumf %27, %28 : vector<8x128xf32>
      %30 = arith.truncf %29 : vector<8x128xf32> to vector<8x128xbf16>
      %c0_26 = arith.constant 0 : index
      %c0_27 = arith.constant 0 : index
      %31 = vector.load %arg9[%c0_26, %c0_27] : memref<8x2048xbf16, #tpu.memory_space<vmem>>, vector<8x128xbf16>
      tpu.vector_store %arg9[%c0_26, %c0_27], %30 {strides = array<i32>} : memref<8x2048xbf16, #tpu.memory_space<vmem>>, vector<8x128xbf16>,
      %c8 = arith.constant 8 : index
      %c0_28 = arith.constant 0 : index
      %32 = vector.load %arg1[%c8, %c0_28] : memref<128x128xbf16, #tpu.memory_space<vmem>>, vector<8x128xbf16>
      %c0_29 = arith.constant 0 : index
      %c0_30 = arith.constant 0 : index
      %33 = vector.load %arg2[%c0_29, %c0_30] : memref<128x128xbf16, #tpu.memory_space<vmem>>, vector<128x128xbf16>
      %cst_31 = arith.constant dense<0.000000e+00> : vector<8x128xf32>
      %34 = tpu.matmul %32, %33, %cst_31 {dimension_numbers = #tpu.dot_dimension_numbers<[1], [0], [0], [1], [0, 0, 1, 1], [], []>} : vector<8x128xbf16>, vector<128x128xbf16>, vector<8x128xf32> -> vector<8x128xf32>
      %c0_32 = arith.constant 0 : index
      %c0_33 = arith.constant 0 : index
      %35 = vector.load %arg3[%c0_32, %c0_33] : memref<1x128xf32, #tpu.memory_space<vmem>>, vector<1x128xf32>
      %36 = vector.broadcast %35 : vector<1x128xf32> to vector<8x128xf32>
      %37 = arith.addf %34, %36 : vector<8x128xf32>
      %cst_34 = arith.constant 0.000000e+00 : f32
      %38 = vector.broadcast %cst_34 : f32 to vector<8x128xf32>
      %39 = arith.maximumf %37, %38 : vector<8x128xf32>
      %40 = arith.truncf %39 : vector<8x128xf32> to vector<8x128xbf16>
      %c0_35 = arith.constant 0 : index
      %c128 = arith.constant 128 : index
      %41 = vector.load %arg9[%c0_35, %c128] : memref<8x2048xbf16, #tpu.memory_space<vmem>>, vector<8x128xbf16>
      tpu.vector_store %arg9[%c0_35, %c128], %40 {strides = array<i32>} : memref<8x2048xbf16, #tpu.memory_space<vmem>>, vector<8x128xbf16>,
      %c16 = arith.constant 16 : index
      %c0_36 = arith.constant 0 : index
      %42 = vector.load %arg1[%c16, %c0_36] : memref<128x128xbf16, #tpu.memory_space<vmem>>, vector<8x128xbf16>
      %c0_37 = arith.constant 0 : index
      %c0_38 = arith.constant 0 : index
      %43 = vector.load %arg2[%c0_37, %c0_38] : memref<128x128xbf16, #tpu.memory_space<vmem>>, vector<128x128xbf16>
      %cst_39 = arith.constant dense<0.000000e+00> : vector<8x128xf32>
      %44 = tpu.matmul %42, %43, %cst_39 {dimension_numbers = #tpu.dot_dimension_numbers<[1], [0], [0], [1], [0, 0, 1, 1], [], []>} : vector<8x128xbf16>, vector<128x128xbf16>, vector<8x128xf32> -> vector<8x128xf32>
      %c0_40 = arith.constant 0 : index
      %c0_41 = arith.constant 0 : index
      %45 = vector.load %arg3[%c0_40, %c0_41] : memref<1x128xf32, #tpu.memory_space<vmem>>, vector<1x128xf32>
      %46 = vector.broadcast %45 : vector<1x128xf32> to vector<8x128xf32>
      %47 = arith.addf %44, %46 : vector<8x128xf32>
      %cst_42 = arith.constant 0.000000e+00 : f32
      %48 = vector.broadcast %cst_42 : f32 to vector<8x128xf32>
      %49 = arith.maximumf %47, %48 : vector<8x128xf32>
      %50 = arith.truncf %49 : vector<8x128xf32> to vector<8x128xbf16>
      %c0_43 = arith.constant 0 : index
      %c256 = arith.constant 256 : index
      %51 = vector.load %arg9[%c0_43, %c256] : memref<8x2048xbf16, #tpu.memory_space<vmem>>, vector<8x128xbf16>
      tpu.vector_store %arg9[%c0_43, %c256], %50 {strides = array<i32>} : memref<8x2048xbf16, #tpu.memory_space<vmem>>, vector<8x128xbf16>,
      %c24 = arith.constant 24 : index
      %c0_44 = arith.constant 0 : index
      %52 = vector.load %arg1[%c24, %c0_44] : memref<128x128xbf16, #tpu.memory_space<vmem>>, vector<8x128xbf16>
      %c0_45 = arith.constant 0 : index
      %c0_46 = arith.constant 0 : index
      %53 = vector.load %arg2[%c0_45, %c0_46] : memref<128x128xbf16, #tpu.memory_space<vmem>>, vector<128x128xbf16>
      %cst_47 = arith.constant dense<0.000000e+00> : vector<8x128xf32>
      %54 = tpu.matmul %52, %53, %cst_47 {dimension_numbers = #tpu.dot_dimension_numbers<[1], [0], [0], [1], [0, 0, 1, 1], [], []>} : vector<8x128xbf16>, vector<128x128xbf16>, vector<8x128xf32> -> vector<8x128xf32>
      %c0_48 = arith.constant 0 : index
      %c0_49 = arith.constant 0 : index
      %55 = vector.load %arg3[%c0_48, %c0_49] : memref<1x128xf32, #tpu.memory_space<vmem>>, vector<1x128xf32>
      %56 = vector.broadcast %55 : vector<1x128xf32> to vector<8x128xf32>
      %57 = arith.addf %54, %56 : vector<8x128xf32>
      %cst_50 = arith.constant 0.000000e+00 : f32
      %58 = vector.broadcast %cst_50 : f32 to vector<8x128xf32>
      %59 = arith.maximumf %57, %58 : vector<8x128xf32>
      %60 = arith.truncf %59 : vector<8x128xf32> to vector<8x128xbf16>
      %c0_51 = arith.constant 0 : index
      %c384 = arith.constant 384 : index
      %61 = vector.load %arg9[%c0_51, %c384] : memref<8x2048xbf16, #tpu.memory_space<vmem>>, vector<8x128xbf16>
      tpu.vector_store %arg9[%c0_51, %c384], %60 {strides = array<i32>} : memref<8x2048xbf16, #tpu.memory_space<vmem>>, vector<8x128xbf16>,
      %c32 = arith.constant 32 : index
      %c0_52 = arith.constant 0 : index
      %62 = vector.load %arg1[%c32, %c0_52] : memref<128x128xbf16, #tpu.memory_space<vmem>>, vector<8x128xbf16>
      %c0_53 = arith.constant 0 : index
      %c0_54 = arith.constant 0 : index
      %63 = vector.load %arg2[%c0_53, %c0_54] : memref<128x128xbf16, #tpu.memory_space<vmem>>, vector<128x128xbf16>
      %cst_55 = arith.constant dense<0.000000e+00> : vector<8x128xf32>
      %64 = tpu.matmul %62, %63, %cst_55 {dimension_numbers = #tpu.dot_dimension_numbers<[1], [0], [0], [1], [0, 0, 1, 1], [], []>} : vector<8x128xbf16>, vector<128x128xbf16>, vector<8x128xf32> -> vector<8x128xf32>
      %c0_56 = arith.constant 0 : index
      %c0_57 = arith.constant 0 : index
      %65 = vector.load %arg3[%c0_56, %c0_57] : memref<1x128xf32, #tpu.memory_space<vmem>>, vector<1x128xf32>
      %66 = vector.broadcast %65 : vector<1x128xf32> to vector<8x128xf32>
      %67 = arith.addf %64, %66 : vector<8x128xf32>
      %cst_58 = arith.constant 0.000000e+00 : f32
      %68 = vector.broadcast %cst_58 : f32 to vector<8x128xf32>
      %69 = arith.maximumf %67, %68 : vector<8x128xf32>
      %70 = arith.truncf %69 : vector<8x128xf32> to vector<8x128xbf16>
      %c0_59 = arith.constant 0 : index
      %c512 = arith.constant 512 : index
      %71 = vector.load %arg9[%c0_59, %c512] : memref<8x2048xbf16, #tpu.memory_space<vmem>>, vector<8x128xbf16>
      tpu.vector_store %arg9[%c0_59, %c512], %70 {strides = array<i32>} : memref<8x2048xbf16, #tpu.memory_space<vmem>>, vector<8x128xbf16>,
      %c40 = arith.constant 40 : index
      %c0_60 = arith.constant 0 : index
      %72 = vector.load %arg1[%c40, %c0_60] : memref<128x128xbf16, #tpu.memory_space<vmem>>, vector<8x128xbf16>
      %c0_61 = arith.constant 0 : index
      %c0_62 = arith.constant 0 : index
      %73 = vector.load %arg2[%c0_61, %c0_62] : memref<128x128xbf16, #tpu.memory_space<vmem>>, vector<128x128xbf16>
      %cst_63 = arith.constant dense<0.000000e+00> : vector<8x128xf32>
      %74 = tpu.matmul %72, %73, %cst_63 {dimension_numbers = #tpu.dot_dimension_numbers<[1], [0], [0], [1], [0, 0, 1, 1], [], []>} : vector<8x128xbf16>, vector<128x128xbf16>, vector<8x128xf32> -> vector<8x128xf32>
      %c0_64 = arith.constant 0 : index
      %c0_65 = arith.constant 0 : index
      %75 = vector.load %arg3[%c0_64, %c0_65] : memref<1x128xf32, #tpu.memory_space<vmem>>, vector<1x128xf32>
      %76 = vector.broadcast %75 : vector<1x128xf32> to vector<8x128xf32>
      %77 = arith.addf %74, %76 : vector<8x128xf32>
      %cst_66 = arith.constant 0.000000e+00 : f32
      %78 = vector.broadcast %cst_66 : f32 to vector<8x128xf32>
      %79 = arith.maximumf %77, %78 : vector<8x128xf32>
      %80 = arith.truncf %79 : vector<8x128xf32> to vector<8x128xbf16>
      %c0_67 = arith.constant 0 : index
      %c640 = arith.constant 640 : index
      %81 = vector.load %arg9[%c0_67, %c640] : memref<8x2048xbf16, #tpu.memory_space<vmem>>, vector<8x128xbf16>
      tpu.vector_store %arg9[%c0_67, %c640], %80 {strides = array<i32>} : memref<8x2048xbf16, #tpu.memory_space<vmem>>, vector<8x128xbf16>,
      %c48 = arith.constant 48 : index
      %c0_68 = arith.constant 0 : index
      %82 = vector.load %arg1[%c48, %c0_68] : memref<128x128xbf16, #tpu.memory_space<vmem>>, vector<8x128xbf16>
      %c0_69 = arith.constant 0 : index
      %c0_70 = arith.constant 0 : index
      %83 = vector.load %arg2[%c0_69, %c0_70] : memref<128x128xbf16, #tpu.memory_space<vmem>>, vector<128x128xbf16>
      %cst_71 = arith.constant dense<0.000000e+00> : vector<8x128xf32>
      %84 = tpu.matmul %82, %83, %cst_71 {dimension_numbers = #tpu.dot_dimension_numbers<[1], [0], [0], [1], [0, 0, 1, 1], [], []>} : vector<8x128xbf16>, vector<128x128xbf16>, vector<8x128xf32> -> vector<8x128xf32>
      %c0_72 = arith.constant 0 : index
      %c0_73 = arith.constant 0 : index
      %85 = vector.load %arg3[%c0_72, %c0_73] : memref<1x128xf32, #tpu.memory_space<vmem>>, vector<1x128xf32>
      %86 = vector.broadcast %85 : vector<1x128xf32> to vector<8x128xf32>
      %87 = arith.addf %84, %86 : vector<8x128xf32>
      %cst_74 = arith.constant 0.000000e+00 : f32
      %88 = vector.broadcast %cst_74 : f32 to vector<8x128xf32>
      %89 = arith.maximumf %87, %88 : vector<8x128xf32>
      %90 = arith.truncf %89 : vector<8x128xf32> to vector<8x128xbf16>
      %c0_75 = arith.constant 0 : index
      %c768 = arith.constant 768 : index
      %91 = vector.load %arg9[%c0_75, %c768] : memref<8x2048xbf16, #tpu.memory_space<vmem>>, vector<8x128xbf16>
      tpu.vector_store %arg9[%c0_75, %c768], %90 {strides = array<i32>} : memref<8x2048xbf16, #tpu.memory_space<vmem>>, vector<8x128xbf16>,
      %c56 = arith.constant 56 : index
      %c0_76 = arith.constant 0 : index
      %92 = vector.load %arg1[%c56, %c0_76] : memref<128x128xbf16, #tpu.memory_space<vmem>>, vector<8x128xbf16>
      %c0_77 = arith.constant 0 : index
      %c0_78 = arith.constant 0 : index
      %93 = vector.load %arg2[%c0_77, %c0_78] : memref<128x128xbf16, #tpu.memory_space<vmem>>, vector<128x128xbf16>
      %cst_79 = arith.constant dense<0.000000e+00> : vector<8x128xf32>
      %94 = tpu.matmul %92, %93, %cst_79 {dimension_numbers = #tpu.dot_dimension_numbers<[1], [0], [0], [1], [0, 0, 1, 1], [], []>} : vector<8x128xbf16>, vector<128x128xbf16>, vector<8x128xf32> -> vector<8x128xf32>
      %c0_80 = arith.constant 0 : index
      %c0_81 = arith.constant 0 : index
      %95 = vector.load %arg3[%c0_80, %c0_81] : memref<1x128xf32, #tpu.memory_space<vmem>>, vector<1x128xf32>
      %96 = vector.broadcast %95 : vector<1x128xf32> to vector<8x128xf32>
      %97 = arith.addf %94, %96 : vector<8x128xf32>
      %cst_82 = arith.constant 0.000000e+00 : f32
      %98 = vector.broadcast %cst_82 : f32 to vector<8x128xf32>
      %99 = arith.maximumf %97, %98 : vector<8x128xf32>
      %100 = arith.truncf %99 : vector<8x128xf32> to vector<8x128xbf16>
      %c0_83 = arith.constant 0 : index
      %c896 = arith.constant 896 : index
      %101 = vector.load %arg9[%c0_83, %c896] : memref<8x2048xbf16, #tpu.memory_space<vmem>>, vector<8x128xbf16>
      tpu.vector_store %arg9[%c0_83, %c896], %100 {strides = array<i32>} : memref<8x2048xbf16, #tpu.memory_space<vmem>>, vector<8x128xbf16>,
      %c64 = arith.constant 64 : index
      %c0_84 = arith.constant 0 : index
      %102 = vector.load %arg1[%c64, %c0_84] : memref<128x128xbf16, #tpu.memory_space<vmem>>, vector<8x128xbf16>
      %c0_85 = arith.constant 0 : index
      %c0_86 = arith.constant 0 : index
      %103 = vector.load %arg2[%c0_85, %c0_86] : memref<128x128xbf16, #tpu.memory_space<vmem>>, vector<128x128xbf16>
      %cst_87 = arith.constant dense<0.000000e+00> : vector<8x128xf32>
      %104 = tpu.matmul %102, %103, %cst_87 {dimension_numbers = #tpu.dot_dimension_numbers<[1], [0], [0], [1], [0, 0, 1, 1], [], []>} : vector<8x128xbf16>, vector<128x128xbf16>, vector<8x128xf32> -> vector<8x128xf32>
      %c0_88 = arith.constant 0 : index
      %c0_89 = arith.constant 0 : index
      %105 = vector.load %arg3[%c0_88, %c0_89] : memref<1x128xf32, #tpu.memory_space<vmem>>, vector<1x128xf32>
      %106 = vector.broadcast %105 : vector<1x128xf32> to vector<8x128xf32>
      %107 = arith.addf %104, %106 : vector<8x128xf32>
      %cst_90 = arith.constant 0.000000e+00 : f32
      %108 = vector.broadcast %cst_90 : f32 to vector<8x128xf32>
      %109 = arith.maximumf %107, %108 : vector<8x128xf32>
      %110 = arith.truncf %109 : vector<8x128xf32> to vector<8x128xbf16>
      %c0_91 = arith.constant 0 : index
      %c1024 = arith.constant 1024 : index
      %111 = vector.load %arg9[%c0_91, %c1024] : memref<8x2048xbf16, #tpu.memory_space<vmem>>, vector<8x128xbf16>
      tpu.vector_store %arg9[%c0_91, %c1024], %110 {strides = array<i32>} : memref<8x2048xbf16, #tpu.memory_space<vmem>>, vector<8x128xbf16>,
      %c72 = arith.constant 72 : index
      %c0_92 = arith.constant 0 : index
      %112 = vector.load %arg1[%c72, %c0_92] : memref<128x128xbf16, #tpu.memory_space<vmem>>, vector<8x128xbf16>
      %c0_93 = arith.constant 0 : index
      %c0_94 = arith.constant 0 : index
      %113 = vector.load %arg2[%c0_93, %c0_94] : memref<128x128xbf16, #tpu.memory_space<vmem>>, vector<128x128xbf16>
      %cst_95 = arith.constant dense<0.000000e+00> : vector<8x128xf32>
      %114 = tpu.matmul %112, %113, %cst_95 {dimension_numbers = #tpu.dot_dimension_numbers<[1], [0], [0], [1], [0, 0, 1, 1], [], []>} : vector<8x128xbf16>, vector<128x128xbf16>, vector<8x128xf32> -> vector<8x128xf32>
      %c0_96 = arith.constant 0 : index
      %c0_97 = arith.constant 0 : index
      %115 = vector.load %arg3[%c0_96, %c0_97] : memref<1x128xf32, #tpu.memory_space<vmem>>, vector<1x128xf32>
      %116 = vector.broadcast %115 : vector<1x128xf32> to vector<8x128xf32>
      %117 = arith.addf %114, %116 : vector<8x128xf32>
      %cst_98 = arith.constant 0.000000e+00 : f32
      %118 = vector.broadcast %cst_98 : f32 to vector<8x128xf32>
      %119 = arith.maximumf %117, %118 : vector<8x128xf32>
      %120 = arith.truncf %119 : vector<8x128xf32> to vector<8x128xbf16>
      %c0_99 = arith.constant 0 : index
      %c1152 = arith.constant 1152 : index
      %121 = vector.load %arg9[%c0_99, %c1152] : memref<8x2048xbf16, #tpu.memory_space<vmem>>, vector<8x128xbf16>
      tpu.vector_store %arg9[%c0_99, %c1152], %120 {strides = array<i32>} : memref<8x2048xbf16, #tpu.memory_space<vmem>>, vector<8x128xbf16>,
      %c80 = arith.constant 80 : index
      %c0_100 = arith.constant 0 : index
      %122 = vector.load %arg1[%c80, %c0_100] : memref<128x128xbf16, #tpu.memory_space<vmem>>, vector<8x128xbf16>
      %c0_101 = arith.constant 0 : index
      %c0_102 = arith.constant 0 : index
      %123 = vector.load %arg2[%c0_101, %c0_102] : memref<128x128xbf16, #tpu.memory_space<vmem>>, vector<128x128xbf16>
      %cst_103 = arith.constant dense<0.000000e+00> : vector<8x128xf32>
      %124 = tpu.matmul %122, %123, %cst_103 {dimension_numbers = #tpu.dot_dimension_numbers<[1], [0], [0], [1], [0, 0, 1, 1], [], []>} : vector<8x128xbf16>, vector<128x128xbf16>, vector<8x128xf32> -> vector<8x128xf32>
      %c0_104 = arith.constant 0 : index
      %c0_105 = arith.constant 0 : index
      %125 = vector.load %arg3[%c0_104, %c0_105] : memref<1x128xf32, #tpu.memory_space<vmem>>, vector<1x128xf32>
      %126 = vector.broadcast %125 : vector<1x128xf32> to vector<8x128xf32>
      %127 = arith.addf %124, %126 : vector<8x128xf32>
      %cst_106 = arith.constant 0.000000e+00 : f32
      %128 = vector.broadcast %cst_106 : f32 to vector<8x128xf32>
      %129 = arith.maximumf %127, %128 : vector<8x128xf32>
      %130 = arith.truncf %129 : vector<8x128xf32> to vector<8x128xbf16>
      %c0_107 = arith.constant 0 : index
      %c1280 = arith.constant 1280 : index
      %131 = vector.load %arg9[%c0_107, %c1280] : memref<8x2048xbf16, #tpu.memory_space<vmem>>, vector<8x128xbf16>
      tpu.vector_store %arg9[%c0_107, %c1280], %130 {strides = array<i32>} : memref<8x2048xbf16, #tpu.memory_space<vmem>>, vector<8x128xbf16>,
      %c88 = arith.constant 88 : index
      %c0_108 = arith.constant 0 : index
      %132 = vector.load %arg1[%c88, %c0_108] : memref<128x128xbf16, #tpu.memory_space<vmem>>, vector<8x128xbf16>
      %c0_109 = arith.constant 0 : index
      %c0_110 = arith.constant 0 : index
      %133 = vector.load %arg2[%c0_109, %c0_110] : memref<128x128xbf16, #tpu.memory_space<vmem>>, vector<128x128xbf16>
      %cst_111 = arith.constant dense<0.000000e+00> : vector<8x128xf32>
      %134 = tpu.matmul %132, %133, %cst_111 {dimension_numbers = #tpu.dot_dimension_numbers<[1], [0], [0], [1], [0, 0, 1, 1], [], []>} : vector<8x128xbf16>, vector<128x128xbf16>, vector<8x128xf32> -> vector<8x128xf32>
      %c0_112 = arith.constant 0 : index
      %c0_113 = arith.constant 0 : index
      %135 = vector.load %arg3[%c0_112, %c0_113] : memref<1x128xf32, #tpu.memory_space<vmem>>, vector<1x128xf32>
      %136 = vector.broadcast %135 : vector<1x128xf32> to vector<8x128xf32>
      %137 = arith.addf %134, %136 : vector<8x128xf32>
      %cst_114 = arith.constant 0.000000e+00 : f32
      %138 = vector.broadcast %cst_114 : f32 to vector<8x128xf32>
      %139 = arith.maximumf %137, %138 : vector<8x128xf32>
      %140 = arith.truncf %139 : vector<8x128xf32> to vector<8x128xbf16>
      %c0_115 = arith.constant 0 : index
      %c1408 = arith.constant 1408 : index
      %141 = vector.load %arg9[%c0_115, %c1408] : memref<8x2048xbf16, #tpu.memory_space<vmem>>, vector<8x128xbf16>
      tpu.vector_store %arg9[%c0_115, %c1408], %140 {strides = array<i32>} : memref<8x2048xbf16, #tpu.memory_space<vmem>>, vector<8x128xbf16>,
      %c96 = arith.constant 96 : index
      %c0_116 = arith.constant 0 : index
      %142 = vector.load %arg1[%c96, %c0_116] : memref<128x128xbf16, #tpu.memory_space<vmem>>, vector<8x128xbf16>
      %c0_117 = arith.constant 0 : index
      %c0_118 = arith.constant 0 : index
      %143 = vector.load %arg2[%c0_117, %c0_118] : memref<128x128xbf16, #tpu.memory_space<vmem>>, vector<128x128xbf16>
      %cst_119 = arith.constant dense<0.000000e+00> : vector<8x128xf32>
      %144 = tpu.matmul %142, %143, %cst_119 {dimension_numbers = #tpu.dot_dimension_numbers<[1], [0], [0], [1], [0, 0, 1, 1], [], []>} : vector<8x128xbf16>, vector<128x128xbf16>, vector<8x128xf32> -> vector<8x128xf32>
      %c0_120 = arith.constant 0 : index
      %c0_121 = arith.constant 0 : index
      %145 = vector.load %arg3[%c0_120, %c0_121] : memref<1x128xf32, #tpu.memory_space<vmem>>, vector<1x128xf32>
      %146 = vector.broadcast %145 : vector<1x128xf32> to vector<8x128xf32>
      %147 = arith.addf %144, %146 : vector<8x128xf32>
      %cst_122 = arith.constant 0.000000e+00 : f32
      %148 = vector.broadcast %cst_122 : f32 to vector<8x128xf32>
      %149 = arith.maximumf %147, %148 : vector<8x128xf32>
      %150 = arith.truncf %149 : vector<8x128xf32> to vector<8x128xbf16>
      %c0_123 = arith.constant 0 : index
      %c1536 = arith.constant 1536 : index
      %151 = vector.load %arg9[%c0_123, %c1536] : memref<8x2048xbf16, #tpu.memory_space<vmem>>, vector<8x128xbf16>
      tpu.vector_store %arg9[%c0_123, %c1536], %150 {strides = array<i32>} : memref<8x2048xbf16, #tpu.memory_space<vmem>>, vector<8x128xbf16>,
      %c104 = arith.constant 104 : index
      %c0_124 = arith.constant 0 : index
      %152 = vector.load %arg1[%c104, %c0_124] : memref<128x128xbf16, #tpu.memory_space<vmem>>, vector<8x128xbf16>
      %c0_125 = arith.constant 0 : index
      %c0_126 = arith.constant 0 : index
      %153 = vector.load %arg2[%c0_125, %c0_126] : memref<128x128xbf16, #tpu.memory_space<vmem>>, vector<128x128xbf16>
      %cst_127 = arith.constant dense<0.000000e+00> : vector<8x128xf32>
      %154 = tpu.matmul %152, %153, %cst_127 {dimension_numbers = #tpu.dot_dimension_numbers<[1], [0], [0], [1], [0, 0, 1, 1], [], []>} : vector<8x128xbf16>, vector<128x128xbf16>, vector<8x128xf32> -> vector<8x128xf32>
      %c0_128 = arith.constant 0 : index
      %c0_129 = arith.constant 0 : index
      %155 = vector.load %arg3[%c0_128, %c0_129] : memref<1x128xf32, #tpu.memory_space<vmem>>, vector<1x128xf32>
      %156 = vector.broadcast %155 : vector<1x128xf32> to vector<8x128xf32>
      %157 = arith.addf %154, %156 : vector<8x128xf32>
      %cst_130 = arith.constant 0.000000e+00 : f32
      %158 = vector.broadcast %cst_130 : f32 to vector<8x128xf32>
      %159 = arith.maximumf %157, %158 : vector<8x128xf32>
      %160 = arith.truncf %159 : vector<8x128xf32> to vector<8x128xbf16>
      %c0_131 = arith.constant 0 : index
      %c1664 = arith.constant 1664 : index
      %161 = vector.load %arg9[%c0_131, %c1664] : memref<8x2048xbf16, #tpu.memory_space<vmem>>, vector<8x128xbf16>
      tpu.vector_store %arg9[%c0_131, %c1664], %160 {strides = array<i32>} : memref<8x2048xbf16, #tpu.memory_space<vmem>>, vector<8x128xbf16>,
      %c112 = arith.constant 112 : index
      %c0_132 = arith.constant 0 : index
      %162 = vector.load %arg1[%c112, %c0_132] : memref<128x128xbf16, #tpu.memory_space<vmem>>, vector<8x128xbf16>
      %c0_133 = arith.constant 0 : index
      %c0_134 = arith.constant 0 : index
      %163 = vector.load %arg2[%c0_133, %c0_134] : memref<128x128xbf16, #tpu.memory_space<vmem>>, vector<128x128xbf16>
      %cst_135 = arith.constant dense<0.000000e+00> : vector<8x128xf32>
      %164 = tpu.matmul %162, %163, %cst_135 {dimension_numbers = #tpu.dot_dimension_numbers<[1], [0], [0], [1], [0, 0, 1, 1], [], []>} : vector<8x128xbf16>, vector<128x128xbf16>, vector<8x128xf32> -> vector<8x128xf32>
      %c0_136 = arith.constant 0 : index
      %c0_137 = arith.constant 0 : index
      %165 = vector.load %arg3[%c0_136, %c0_137] : memref<1x128xf32, #tpu.memory_space<vmem>>, vector<1x128xf32>
      %166 = vector.broadcast %165 : vector<1x128xf32> to vector<8x128xf32>
      %167 = arith.addf %164, %166 : vector<8x128xf32>
      %cst_138 = arith.constant 0.000000e+00 : f32
      %168 = vector.broadcast %cst_138 : f32 to vector<8x128xf32>
      %169 = arith.maximumf %167, %168 : vector<8x128xf32>
      %170 = arith.truncf %169 : vector<8x128xf32> to vector<8x128xbf16>
      %c0_139 = arith.constant 0 : index
      %c1792 = arith.constant 1792 : index
      %171 = vector.load %arg9[%c0_139, %c1792] : memref<8x2048xbf16, #tpu.memory_space<vmem>>, vector<8x128xbf16>
      tpu.vector_store %arg9[%c0_139, %c1792], %170 {strides = array<i32>} : memref<8x2048xbf16, #tpu.memory_space<vmem>>, vector<8x128xbf16>,
      %c120 = arith.constant 120 : index
      %c0_140 = arith.constant 0 : index
      %172 = vector.load %arg1[%c120, %c0_140] : memref<128x128xbf16, #tpu.memory_space<vmem>>, vector<8x128xbf16>
      %c0_141 = arith.constant 0 : index
      %c0_142 = arith.constant 0 : index
      %173 = vector.load %arg2[%c0_141, %c0_142] : memref<128x128xbf16, #tpu.memory_space<vmem>>, vector<128x128xbf16>
      %cst_143 = arith.constant dense<0.000000e+00> : vector<8x128xf32>
      %174 = tpu.matmul %172, %173, %cst_143 {dimension_numbers = #tpu.dot_dimension_numbers<[1], [0], [0], [1], [0, 0, 1, 1], [], []>} : vector<8x128xbf16>, vector<128x128xbf16>, vector<8x128xf32> -> vector<8x128xf32>
      %c0_144 = arith.constant 0 : index
      %c0_145 = arith.constant 0 : index
      %175 = vector.load %arg3[%c0_144, %c0_145] : memref<1x128xf32, #tpu.memory_space<vmem>>, vector<1x128xf32>
      %176 = vector.broadcast %175 : vector<1x128xf32> to vector<8x128xf32>
      %177 = arith.addf %174, %176 : vector<8x128xf32>
      %cst_146 = arith.constant 0.000000e+00 : f32
      %178 = vector.broadcast %cst_146 : f32 to vector<8x128xf32>
      %179 = arith.maximumf %177, %178 : vector<8x128xf32>
      %180 = arith.truncf %179 : vector<8x128xf32> to vector<8x128xbf16>
      %c0_147 = arith.constant 0 : index
      %c1920 = arith.constant 1920 : index
      %181 = vector.load %arg9[%c0_147, %c1920] : memref<8x2048xbf16, #tpu.memory_space<vmem>>, vector<8x128xbf16>
      tpu.vector_store %arg9[%c0_147, %c1920], %180 {strides = array<i32>} : memref<8x2048xbf16, #tpu.memory_space<vmem>>, vector<8x128xbf16>,
    } else {
    }
    %c0 = arith.constant 0 : index
    %c0_1 = arith.constant 0 : index
    %3 = vector.load %arg9[%c0, %c0_1] : memref<8x2048xbf16, #tpu.memory_space<vmem>>, vector<8x2048xbf16>
    %c0_2 = arith.constant 0 : index
    %c0_3 = arith.constant 0 : index
    %4 = vector.load %arg4[%c0_2, %c0_3] : memref<2048x512xbf16, #tpu.memory_space<vmem>>, vector<2048x512xbf16>
    %cst = arith.constant dense<0.000000e+00> : vector<8x512xf32>
    %5 = tpu.matmul %3, %4, %cst {dimension_numbers = #tpu.dot_dimension_numbers<[1], [0], [0], [1], [0, 0, 1, 1], [], []>} : vector<8x2048xbf16>, vector<2048x512xbf16>, vector<8x512xf32> -> vector<8x512xf32>
    %c0_4 = arith.constant 0 : index
    %c0_5 = arith.constant 0 : index
    %6 = vector.load %arg5[%c0_4, %c0_5] : memref<1x512xf32, #tpu.memory_space<vmem>>, vector<1x512xf32>
    %7 = vector.broadcast %6 : vector<1x512xf32> to vector<8x512xf32>
    %8 = arith.addf %5, %7 : vector<8x512xf32>
    %cst_6 = arith.constant 0.000000e+00 : f32
    %9 = vector.broadcast %cst_6 : f32 to vector<8x512xf32>
    %10 = arith.maximumf %8, %9 : vector<8x512xf32>
    %11 = arith.truncf %10 : vector<8x512xf32> to vector<8x512xbf16>
    %c0_7 = arith.constant 0 : index
    %c0_8 = arith.constant 0 : index
    %12 = vector.load %arg10[%c0_7, %c0_8] : memref<8x128xf32, #tpu.memory_space<vmem>>, vector<8x128xf32>
    %c0_9 = arith.constant 0 : index
    %c0_10 = arith.constant 0 : index
    %13 = vector.load %arg6[%c0_9, %c0_10] : memref<512x128xbf16, #tpu.memory_space<vmem>>, vector<512x128xbf16>
    %cst_11 = arith.constant dense<0.000000e+00> : vector<8x128xf32>
    %14 = tpu.matmul %11, %13, %cst_11 {dimension_numbers = #tpu.dot_dimension_numbers<[1], [0], [0], [1], [0, 0, 1, 1], [], []>} : vector<8x512xbf16>, vector<512x128xbf16>, vector<8x128xf32> -> vector<8x128xf32>
    %15 = arith.addf %12, %14 : vector<8x128xf32>
    %c0_12 = arith.constant 0 : index
    %c0_13 = arith.constant 0 : index
    %16 = vector.load %arg10[%c0_12, %c0_13] : memref<8x128xf32, #tpu.memory_space<vmem>>, vector<8x128xf32>
    tpu.vector_store %arg10[%c0_12, %c0_13], %15 {strides = array<i32>} : memref<8x128xf32, #tpu.memory_space<vmem>>, vector<8x128xf32>,
    %c1_i32 = arith.constant 1 : i32
    %17 = arith.cmpi eq, %arg0, %c1_i32 : i32
    %18 = arith.extui %17 : i1 to i32
    %c0_i32_14 = arith.constant 0 : i32
    %19 = arith.cmpi ne, %18, %c0_i32_14 : i32
    scf.if %19 {
      %c0_15 = arith.constant 0 : index
      %c0_16 = arith.constant 0 : index
      %20 = vector.load %arg10[%c0_15, %c0_16] : memref<8x128xf32, #tpu.memory_space<vmem>>, vector<8x128xf32>
      %c0_17 = arith.constant 0 : index
      %c0_18 = arith.constant 0 : index
      %21 = vector.load %arg7[%c0_17, %c0_18] : memref<1x128xf32, #tpu.memory_space<vmem>>, vector<1x128xf32>
      %22 = vector.broadcast %21 : vector<1x128xf32> to vector<8x128xf32>
      %23 = arith.addf %20, %22 : vector<8x128xf32>
      %c0_19 = arith.constant 0 : index
      %c0_20 = arith.constant 0 : index
      %24 = vector.load %arg8[%c0_19, %c0_20] : memref<8x128xf32, #tpu.memory_space<vmem>>, vector<8x128xf32>
      tpu.vector_store %arg8[%c0_19, %c0_20], %23 {strides = array<i32>} : memref<8x128xf32, #tpu.memory_space<vmem>>, vector<8x128xf32>,
    } else {
    }
    return
  }
  func.func @transform_0(%arg0: i32) -> (i32, i32) {
    %c0_i32 = arith.constant 0 : i32
    %c0_i32_0 = arith.constant 0 : i32
    %c0_i32_1 = arith.constant 0 : i32
    return %c0_i32, %c0_i32_0 : i32, i32
  }
  func.func @transform_1(%arg0: i32) -> (i32, i32) {
    %c0_i32 = arith.constant 0 : i32
    %c0_i32_0 = arith.constant 0 : i32
    %c0_i32_1 = arith.constant 0 : i32
    return %c0_i32, %c0_i32_0 : i32, i32
  }
  func.func @transform_2(%arg0: i32) -> (i32, i32) {
    %c0_i32 = arith.constant 0 : i32
    %c0_i32_0 = arith.constant 0 : i32
    %c0_i32_1 = arith.constant 0 : i32
    return %c0_i32, %c0_i32_0 : i32, i32
  }
  func.func @transform_3(%arg0: i32) -> (i32, i32) {
    %c0_i32 = arith.constant 0 : i32
    %c0_i32_0 = arith.constant 0 : i32
    return %c0_i32, %arg0 : i32, i32
  }
  func.func @transform_4(%arg0: i32) -> (i32, i32) {
    %c0_i32 = arith.constant 0 : i32
    %c0_i32_0 = arith.constant 0 : i32
    return %c0_i32, %arg0 : i32, i32
  }
  func.func @transform_5(%arg0: i32) -> (i32, i32) {
    %c0_i32 = arith.constant 0 : i32
    %c0_i32_0 = arith.constant 0 : i32
    return %arg0, %c0_i32 : i32, i32
  }
  func.func @transform_6(%arg0: i32) -> (i32, i32) {
    %c0_i32 = arith.constant 0 : i32
    %c0_i32_0 = arith.constant 0 : i32
    %c0_i32_1 = arith.constant 0 : i32
    return %c0_i32, %c0_i32_0 : i32, i32
  }
  func.func @transform_7(%arg0: i32) -> (i32, i32) {
    %c0_i32 = arith.constant 0 : i32
    %c0_i32_0 = arith.constant 0 : i32
    %c0_i32_1 = arith.constant 0 : i32
    return %c0_i32, %c0_i32_0 : i32, i32
  }
}

</mosaic_0001>

<bundles_post_ra>
// kernel: _inception_aux_forward.1
= control target key start
LH: loop header
LB: loop body
LE: loop exit
PB: predicated region body
PF: predicated region fallthrough
CT: control target
= control target key end

     0   :  { %s10219_s0 = inlined_call_operand.vmem [shape: bf16[128,128], index: 0, kind: input, shape index: {}]   ;;  %s10220_s1 = inlined_call_operand.hbm [shape: bf16[128,128], index: 1, kind: input, shape index: {}]   ;;  %s10221_s2 = inlined_call_operand.hbm [shape: f32[1,128], index: 2, kind: input, shape index: {}]   ;;  %s10222_s3 = inlined_call_operand.hbm [shape: bf16[2048,1024], index: 3, kind: input, shape index: {}]   ;;  %s10223_s4 = inlined_call_operand.hbm [shape: f32[1,1024], index: 4, kind: input, shape index: {}]   ;;  %s10224_s5 = inlined_call_operand.hbm [shape: bf16[1024,128], index: 5, kind: input, shape index: {}]   ;;  %s10225_s6 = inlined_call_operand.hbm [shape: f32[1,128], index: 6, kind: input, shape index: {}]   ;;  %s10226_s7 = inlined_call_operand.vmem [shape: f32[8,128], index: 7, kind: output, shape index: {}]  }
   0x1   :  { %10242 = sst [smem:[#allocation19_spill]] %s10220_s1 }
   0x2   :  { %10243 = sst [smem:[#allocation20_spill]] %s10222_s3 }
   0x3   :  { %10244 = sst [smem:[#allocation21_spill]] %s10226_s7 }
   0x4   :  { %12 = vsyncpa [#allocation5], 0 }
   0x5   :  { %13 = vsyncpa [#allocation7], 0  ;;  %s9133_s24 = smov 0   ;;  %s9135_s25 = smov 0  }
   0x6   :  { %s9137_s26 = smov 0   ;;  %s9139_s27 = smov 0  }
   0x7 LB: > { %10245 = sst [smem:[#allocation16_spill]] %s9074_s26  ;;  %s9152_s28 = sadd.s32 4294967295, %s9078_s27   ;;  %s9078_s27 = sphi %s9139_s27, %s10276_s27   ;;  %s9074_s26 = sphi %s9137_s26, %s10278_s26   ;;  %s9070_s25 = sphi %s9135_s25, %s10280_s25   ;;  %s9066_s24 = sphi %s9133_s24, %s10279_s24  }
   0x8   : > { %s9155_s29 = sadd.s32 1, %s9078_s27   ;;  %s89_s8 = sadd.s32 1, %s9074_s26 }
   0x9   : > { %10246 = sst [smem:[#allocation17_spill]] %s9155_s29  ;;  %s86_s30 = ssub.s32 %s9078_s27, %s9155_s29 }
   0xa   : > { %p87_p0 = scmp.eq.s32.totalorder %s86_s30, 0  ;;  %p96_p1 = scmp.ne.s32.totalorder %s9074_s26, %s9070_s25 }
   0xb   : > { %p97_p2 = scmp.eq.s32.totalorder %s9078_s27, 0  ;;  %p102_p3 = scmp.ne.s32.totalorder %s9070_s25, %s9066_s24 }
   0xc   : > { %s9165_s9 = scalar_select %p87_p0, %s9074_s26, %s89_s8  }
   0xd   : > { %p9167_p4 = por %p97_p2, %p96_p1  ;;  %p10227_p5 = scmp.eq.s32.totalorder %s9152_s28, 0 }
   0xe   : > { %10247 = sst [smem:[#allocation18_spill]] %s9165_s9  ;;  %p6525_p6 = scmp.ge.s32.totalorder %s9078_s27, 1 }
   0xf   : > { %p207_p7 = scmp.lt.s32.totalorder %s9078_s27, 3  ;;  %p9176_p8 = por %p10227_p5, %p102_p3 }
  0x10   : > { %s9080_s13 = smov [#allocation4]   ;;  %p7867_p13 = scmp.lt.s32.totalorder %s9078_s27, 2 }
  0x11   : > { %s10249_s11 = scalar_select %p9176_p8, 1, 0 }
  0x12   : > { %p9181_p10 = pnand %p6525_p6, %p207_p7  ;;  %s222_s14 = sshll.u32 %s9080_s13, 4  ;;  %s223_s14 = int_to_ptr.vmem [resolvable:$true] %s222_s14 }
  0x13   : > { %s258_s16 = sand.u32 1, %s9078_s27   ;;  %s9196_s17 = sand.u32 1, %s9074_s26  }
  0x14   : > { %s10250_s12 = scalar_select %p9181_p10, 1, 0 }
  0x15   : > { %p7844_p11 = pneg %p9181_p10  ;;  %p9200_p0 = pnand %p7867_p13, %p9167_p4 }
  0x16   : > { %s10253_s1 = sld [smem:[#allocation19_spill]] }
  0x17   : > { %p9189_p12 = pnand %p7844_p11, %p10227_p5 }
  0x18   : > { %s10252_s18 = scalar_select %p9200_p0, 1, 0 }
  0x19   : > { %s10251_s15 = scalar_select %p9189_p12, 1, 0 }
  0x1a   : > { %p9212_p2 = pneg %p9189_p12 }
  0x1c   : > { %s8858_s21 = scalar_lea.hbm %s10253_s1, 1024 }
  0x1d   : > { %p8859_p1 = scmp.ne.s32.totalorder %s10253_s1, %s8858_s21  ;;  %p8865_p6 = scmp.lt.u32.totalorder %s8858_s21, %s10253_s1 }
  0x1e   : > { %s10254_s24 = scalar_select %p9212_p2, 1, 0 }
  0x1f   : > { %p8861_p3 = pnand %p9212_p2, %p8859_p1 }
  0x21   : > { %p8862_p4 = pneg %p8861_p3 }
  0x23   : > { %p8867_p7 = pnand %p8865_p6, %p8862_p4 }
  0x25   : > { %8870 = shalt.err (!%p8867_p7)
}
  0x26   : > { %s8871_s10 = scalar_lea.vmem %s223_s14, 1024  ;;  %p8879_p5 = scmp.lt.s32.totalorder %s223_s14, %s223_s14 }
  0x27   : > { %p8872_p11 = scmp.ne.s32.totalorder %s223_s14, %s8871_s10  ;;  %p8880_p8 = scmp.lt.s32.totalorder %s8871_s10, %s8871_s10 }
  0x29   : > { %p8874_p13 = pnand %p8872_p11, %p9212_p2  ;;  %p8881_p10 = por %p8880_p8, %p8879_p5 }
  0x2b   : > { %p8875_p9 = pneg %p8874_p13 }
  0x2d   : > { %p8882_p0 = pnand %p8881_p10, %p8875_p9 }
  0x2f   : > { %8885 = shalt.err (!%p8882_p0)
}
  0x30   : > { %s10238_s13 = smov 64   ;;  %s10239_s19 = smov 4  }
  0x31   : > { %7847 = dma.hbm_to_vmem [thread:$0]  (!%p9189_p12), %s10253_s1, 1024, %s223_s14, [#allocation5], %s10238_s13, %s10238_s13, %s10239_s19  }
  0x32   : > { %s6530_s22 = sshll.u32 %s9196_s17, 12  ;;  %s7255_s23 = sshll.u32 %s9078_s27, 8 }
  0x33   : > { %s10255_s3 = sld [smem:[#allocation20_spill]]  ;;  %s262_s9 = scalar_lea.vmem [#allocation8], %s6530_s22 }
  0x34   : > { %s269_s26 = sshll.u32 %s262_s9, 4  ;;  %s9240_s29 = scalar_lea.sflag [#allocation5], %s258_s16  ;;  %s9238_s26 = int_to_ptr.vmem [resolvable:$true] %s269_s26 }
  0x35   : > { %p10256_p8 = scmp.ne.s32.totalorder %s10252_s18, 0 }
  0x37   : > { %p9246_p9 = pneg %p10256_p8 }
  0x39   : > { %s9236_s10 = scalar_lea.hbm %s10255_s3, %s7255_s23  ;;  %s8891_s22 = scalar_lea.hbm %s10255_s3, 131072 }
  0x3a   : > { %s8886_s7 = scalar_lea.hbm %s9236_s10, 65536  ;;  %p8892_p1 = scmp.lt.u32.totalorder %s9236_s10, %s10255_s3 }
  0x3b   : > { %p8887_p5 = scmp.ne.s32.totalorder %s9236_s10, %s8886_s7  ;;  %p8893_p3 = scmp.lt.u32.totalorder %s8891_s22, %s8886_s7 }
  0x3c   : > { %p8895_p6 = scmp.lt.u32.totalorder %s8886_s7, %s9236_s10 }
  0x3d   : > { %p8889_p10 = pnand %p9246_p9, %p8887_p5  ;;  %p8894_p4 = por %p8893_p3, %p8892_p1 }
  0x3f   : > { %p8890_p0 = pneg %p8889_p10  ;;  %p8896_p7 = por %p8895_p6, %p8894_p4 }
  0x41   : > { %p8897_p11 = pnand %p8896_p7, %p8890_p0 }
  0x43   : > { %8900 = shalt.err (!%p8897_p11)
}
  0x44   : > { %s8901_s16 = scalar_lea.vmem %s9238_s26, 65536  ;;  %s9083_s30 = smov [#allocation8]  }
  0x45   : > { %p8902_p13 = scmp.ne.s32.totalorder %s9238_s26, %s8901_s16  ;;  %s8906_s8 = sshll.u32 %s9083_s30, 4  ;;  %s8907_s8 = int_to_ptr.vmem [resolvable:$false] %s8906_s8 }
  0x46   : > { %s8908_s20 = scalar_lea.vmem %s8907_s8, 131072  ;;  %p8909_p12 = scmp.lt.s32.totalorder %s9238_s26, %s8907_s8 }
  0x47   : > { %p8904_p5 = pnand %p8902_p13, %p9246_p9  ;;  %p8910_p2 = scmp.lt.s32.totalorder %s8908_s20, %s8901_s16 }
  0x49   : > { %p8905_p10 = pneg %p8904_p5  ;;  %p8911_p1 = por %p8910_p2, %p8909_p12 }
  0x4b   : > { %p8912_p3 = pnand %p8911_p1, %p8905_p10 }
  0x4d   : > { %8915 = shalt.err (!%p8912_p3)
}
  0x4e   : > { %s9084_s7 = smov 512   ;;  %s9085_s21 = smov 256  }
  0x4f   : > { %s9086_s22 = smov 16   ;;  %s9087_s9 = smov [#allocation6]  }
  0x50   : > { %7857 = dma.hbm_to_vmem [thread:$0]  (!%p10256_p8), %s9236_s10, 65536, %s9238_s26, %s9240_s29, %s9084_s7, %s9085_s21, %s9086_s22  }
  0x51   : > { %s236_s23 = sshll.u32 %s9087_s9, 4  ;;  %s6533_s30 = sshll.u32 %s9196_s17, 2  ;;  %s237_s23 = int_to_ptr.vmem [resolvable:$true] %s236_s23 }
  0x52   : > { %s8916_s20 = scalar_lea.hbm %s10221_s2, 16  ;;  %p10258_p2 = scmp.ne.s32.totalorder %s10254_s24, 0 }
  0x53   : > { %p8917_p12 = scmp.ne.s32.totalorder %s10221_s2, %s8916_s20  ;;  %p8923_p6 = scmp.lt.u32.totalorder %s8916_s20, %s10221_s2 }
  0x55   : > { %p8919_p0 = pnand %p8917_p12, %p10258_p2 }
  0x57   : > { %p8920_p4 = pneg %p8919_p0 }
  0x59   : > { %p8925_p7 = pnand %p8923_p6, %p8920_p4 }
  0x5b   : > { %8928 = shalt.err (!%p8925_p7)
}
  0x5c   : > { %s8929_s26 = scalar_lea.vmem %s237_s23, 16  ;;  %s8936_s10 = scalar_lea.vmem %s237_s23, 32 }
  0x5d   : > { %p8930_p11 = scmp.ne.s32.totalorder %s237_s23, %s8929_s26  ;;  %p8937_p10 = scmp.lt.s32.totalorder %s237_s23, %s237_s23 }
  0x5e   : > { %p8938_p1 = scmp.lt.s32.totalorder %s8936_s10, %s8929_s26 }
  0x5f   : > { %p8932_p13 = pnand %p8930_p11, %p10258_p2 }
  0x60   : > { %p8939_p3 = por %p8938_p1, %p8937_p10 }
  0x61   : > { %p8933_p5 = pneg %p8932_p13 }
  0x63   : > { %p8940_p8 = pnand %p8939_p3, %p8933_p5 }
  0x65   : > { %8943 = shalt.err (!%p8940_p8)
}
  0x66   : > { %p10259_p12 = scmp.ne.s32.totalorder %s10251_s15, 0  ;;  %s7256_s1 = sshll.u32 %s9078_s27, 6 }
  0x67   : > { %s283_s3 = scalar_lea.vmem [#allocation9], %s6533_s30  ;;  %s289_s9 = scalar_lea.hbm %s10223_s4, %s7256_s1 }
  0x68   : > { %7850 = dma.hbm_to_vmem [thread:$0]  (!%p10259_p12), %s10221_s2, 16, %s237_s23, [#allocation7]  }
  0x69   : > { %s291_s7 = sshll.u32 %s283_s3, 4  ;;  %s8944_s8 = scalar_lea.hbm %s289_s9, 64  ;;  %s292_s7 = int_to_ptr.vmem [resolvable:$true] %s291_s7 }
  0x6a   : > { %p8945_p0 = scmp.ne.s32.totalorder %s289_s9, %s8944_s8  ;;  %s8949_s26 = scalar_lea.hbm %s10223_s4, 128 }
  0x6b   : > { %p8950_p6 = scmp.lt.u32.totalorder %s289_s9, %s10223_s4  ;;  %p8951_p7 = scmp.lt.u32.totalorder %s8949_s26, %s8944_s8 }
  0x6c   : > { %p8947_p8 = pnand %p8945_p0, %p9246_p9  ;;  %p8953_p13 = scmp.lt.u32.totalorder %s8944_s8, %s289_s9 }
  0x6d   : > { %p8952_p11 = por %p8951_p7, %p8950_p6 }
  0x6e   : > { %p8948_p4 = pneg %p8947_p8 }
  0x6f   : > { %p8954_p5 = por %p8953_p13, %p8952_p11 }
  0x71   : > { %p8955_p10 = pnand %p8954_p5, %p8948_p4 }
  0x73   : > { %8958 = shalt.err (!%p8955_p10)
}
  0x74   : > { %s8959_s23 = scalar_lea.vmem %s292_s7, 64  ;;  %s9088_s30 = smov [#allocation9]  }
  0x75   : > { %p8960_p1 = scmp.ne.s32.totalorder %s292_s7, %s8959_s23  ;;  %s8964_s19 = sshll.u32 %s9088_s30, 4  ;;  %s8965_s19 = int_to_ptr.vmem [resolvable:$false] %s8964_s19 }
  0x76   : > { %s8966_s1 = scalar_lea.vmem %s8965_s19, 128  ;;  %p8967_p8 = scmp.lt.s32.totalorder %s292_s7, %s8965_s19 }
  0x77   : > { %p8962_p3 = pnand %p8960_p1, %p9246_p9  ;;  %p8968_p12 = scmp.lt.s32.totalorder %s8966_s1, %s8959_s23 }
  0x79   : > { %p8963_p0 = pneg %p8962_p3  ;;  %p8969_p2 = por %p8968_p12, %p8967_p8 }
  0x7b   : > { %p8970_p6 = pnand %p8969_p2, %p8963_p0 }
  0x7d   : > { %8973 = shalt.err (!%p8970_p6)
}
  0x7e   : > { %p10260_p7 = scmp.ne.s32.totalorder %s10252_s18, 0  ;;  %s6536_s3 = sshll.u32 %s9196_s17, 8 }
  0x7f   : > { %s9089_s21 = smov [#allocation11]   ;;  %s7257_s8 = sshll.u32 %s9078_s27, 12 }
  0x80   : > { %7860 = dma.hbm_to_vmem [thread:$0]  (!%p10260_p7), %s289_s9, 64, %s292_s7, %s9240_s29  }
  0x81   : > { %s247_s22 = sshll.u32 %s9089_s21, 4  ;;  %s8974_s26 = scalar_lea.hbm %s10225_s6, 16  ;;  %s248_s22 = int_to_ptr.vmem [resolvable:$true] %s247_s22 }
  0x82   : > { %p8975_p2 = scmp.ne.s32.totalorder %s10225_s6, %s8974_s26  ;;  %p10261_p12 = scmp.ne.s32.totalorder %s10254_s24, 0 }
  0x83   : > { %p8981_p13 = scmp.lt.u32.totalorder %s8974_s26, %s10225_s6 }
  0x84   : > { %p8977_p4 = pnand %p8975_p2, %p10261_p12 }
  0x86   : > { %p8978_p11 = pneg %p8977_p4 }
  0x88   : > { %p8983_p5 = pnand %p8981_p13, %p8978_p11 }
  0x8a   : > { %8986 = shalt.err (!%p8983_p5)
}
  0x8b   : > { %s8987_s17 = scalar_lea.vmem %s248_s22, 16  ;;  %s8994_s27 = scalar_lea.vmem %s248_s22, 32 }
  0x8c   : > { %p8988_p10 = scmp.ne.s32.totalorder %s248_s22, %s8987_s17  ;;  %p8995_p0 = scmp.lt.s32.totalorder %s248_s22, %s248_s22 }
  0x8d   : > { %p8996_p8 = scmp.lt.s32.totalorder %s8994_s27, %s8987_s17 }
  0x8e   : > { %p8990_p1 = pnand %p8988_p10, %p10261_p12 }
  0x8f   : > { %p8997_p6 = por %p8996_p8, %p8995_p0 }
  0x90   : > { %p8991_p3 = pneg %p8990_p1 }
  0x92   : > { %p8998_p7 = pnand %p8997_p6, %p8991_p3 }
  0x94   : > { %9001 = shalt.err (!%p8998_p7)
}
  0x95   : > { %p10262_p2 = scmp.ne.s32.totalorder %s10251_s15, 0  ;;  %s9329_s21 = scalar_lea.hbm %s10224_s5, %s7257_s8 }
  0x96   : > { %s302_s24 = scalar_lea.vmem [#allocation10], %s6536_s3  ;;  %s9002_s20 = scalar_lea.hbm %s9329_s21, 4096 }
  0x97   : > { %7853 = dma.hbm_to_vmem [thread:$0]  (!%p10262_p2), %s10225_s6, 16, %s248_s22, [#allocation7]  }
  0x98   : > { %s309_s16 = sshll.u32 %s302_s24, 4  ;;  %p9003_p7 = scmp.ne.s32.totalorder %s9329_s21, %s9002_s20  ;;  %s9331_s16 = int_to_ptr.vmem [resolvable:$true] %s309_s16 }
  0x99   : > { %s9007_s26 = scalar_lea.hbm %s10224_s5, 8192  ;;  %p9008_p11 = scmp.lt.u32.totalorder %s9329_s21, %s10224_s5 }
  0x9a   : > { %p9005_p12 = pnand %p9003_p7, %p9246_p9  ;;  %p9009_p13 = scmp.lt.u32.totalorder %s9007_s26, %s9002_s20 }
  0x9b   : > { %p9011_p10 = scmp.lt.u32.totalorder %s9002_s20, %s9329_s21 }
  0x9c   : > { %p9006_p4 = pneg %p9005_p12  ;;  %p9010_p5 = por %p9009_p13, %p9008_p11 }
  0x9e   : > { %p9012_p1 = por %p9011_p10, %p9010_p5 }
  0xa0   : > { %p9013_p3 = pnand %p9012_p1, %p9006_p4 }
  0xa2   : > { %9016 = shalt.err (!%p9013_p3)
}
  0xa3   : > { %s9017_s3 = scalar_lea.vmem %s9331_s16, 4096  ;;  %s9090_s13 = smov [#allocation10]  }
  0xa4   : > { %p9018_p0 = scmp.ne.s32.totalorder %s9331_s16, %s9017_s3  ;;  %s9022_s23 = sshll.u32 %s9090_s13, 4  ;;  %s9023_s23 = int_to_ptr.vmem [resolvable:$false] %s9022_s23 }
  0xa5   : > { %s9024_s30 = scalar_lea.vmem %s9023_s23, 8192  ;;  %p9025_p2 = scmp.lt.s32.totalorder %s9331_s16, %s9023_s23 }
  0xa6   : > { %p9020_p8 = pnand %p9018_p0, %p9246_p9  ;;  %p9026_p7 = scmp.lt.s32.totalorder %s9024_s30, %s9017_s3 }
  0xa8   : > { %p9021_p6 = pneg %p9020_p8  ;;  %p9027_p12 = por %p9026_p7, %p9025_p2 }
  0xaa   : > { %p9028_p11 = pnand %p9027_p12, %p9021_p6 }
  0xac   : > { %9031 = shalt.err (!%p9028_p11)
}
  0xad   : > { %p10263_p4 = scmp.ne.s32.totalorder %s10252_s18, 0  ;;  %s10264_s17 = smov 4  }
  0xae   : > { %s10265_s27 = smov 64   ;;  %p10266_p9 = scmp.ne.s32.totalorder %s10250_s12, 0 }
  0xaf   : > { %7863 = dma.hbm_to_vmem [thread:$0]  (!%p10263_p4), %s9329_s21, 4096, %s9331_s16, %s9240_s29, %s10265_s27, %s10265_s27, %s10264_s17  }
  0xb0   : > { %321 = sbr.rel (%p10266_p9) target bundleno = 1639 (0x667), region = 48  ;;  %p10267_p13 = scmp.eq.s32.totalorder (!%p10266_p9), %s9152_s28, 0 }
  0xb7   : > { %9049 = dma.done.wait (%p10267_p13), [#allocation5], 1024   ;;  %p10268_p5 = pmov %p10267_p13 }
  0xb9   : > { %9051 = vsyncadd (%p10268_p5), [#allocation5], 4294966272  ;;  %p10269_p10 = pmov %p10268_p5 }
  0xba   : > { %p10270_p1 = pmov %p10268_p5 }
  0xbb   : > { %9053 = dma.done.wait (%p10269_p10), [#allocation7], 16  }
  0xbc   : > { %9055 = vsyncadd (%p10270_p1), [#allocation7], 4294967280  ;;  %s331_s18 = sand.u32 1, %s9152_s28   ;;  %s333_s29 = sand.u32 1, %s9070_s25  }
  0xbd   : > { %s6542_s14 = sshll.u32 %s333_s29, 12  ;;  %s332_s12 = scalar_lea.sflag [#allocation5], %s331_s18 }
  0xbe   : > { %s9370_s7 = scalar_lea.vmem [#allocation8], %s6542_s14  ;;  %p10271_p3 = scmp.ne.s32.totalorder %s10249_s11, 0 }
  0xc0   : > { %9057 = dma.done.wait (%p10271_p3), %s332_s12, 69696  }
  0xc1   : > { %9059 = vsyncadd (%p10271_p3), %s332_s12, 4294897600  ;;  %s6543_s9 = sshll.u32 %s333_s29, 2  ;;  %s6544_s19 = sshll.u32 %s333_s29, 8 }
  0xc2   : > { %s9376_s1 = scalar_lea.vmem [#allocation9], %s6543_s9  ;;  %s9378_s21 = scalar_lea.vmem [#allocation10], %s6544_s19 }
  0xc3   : > { %p10272_p0 = pmov %p10270_p1 }
  0xc5   : > { %9061 = dma.done.wait (%p10272_p0), [#allocation7], 16   ;;  %p10273_p8 = pmov %p10272_p0 }
  0xc6   : > { %p10274_p6 = scmp.ne.s32.totalorder %s9152_s28, 0 }
  0xc7   : > { %9063 = vsyncadd (%p10273_p8), [#allocation7], 4294967280  ;;  %v7913_v0 = vld [vmem:[#allocation4] sm:$0xff] (!%p10274_p6)   ;;  %v9091_v1 = vmov (!%p10274_p6), 0.0   ;;  %v7915_v3 = vld [vmem:[#allocation4 + $0x8] sm:$0xff] (!%p10274_p6)   ;;  %vm9092_vm0 = vmmov (!%p10274_p6), 0  }
  0xc8   : > { %400 = sbr.rel (%p10274_p6) target bundleno = 676 (0x2a4), region = 76  ;;  %401 = vst [vmem:[#allocation3] sm:$0xff] (!%p10274_p6), %v9091_v1  ;;  %7446 = vmatprep.subr.bf16.mxu0 (!%p10274_p6), %v9091_v1  ;;  %7466 = vmatprep.subr.bf16.mxu1 (!%p10274_p6), %v9091_v1  ;;  %v7914_v2 = vld [vmem:[#allocation4] sm:$0xff] (!%p10274_p6)   ;;  %v7916_v4 = vld [vmem:[#allocation4 + $0x8] sm:$0xff] (!%p10274_p6)   ;;  %v7917_v5 = vld [vmem:[#allocation4 + $0x10] sm:$0xff] (!%p10274_p6)  }
  0xc9   : > { %7447 = vmatpush3.bf16.msra.mxu0 (!%p10274_p6), %v7913_v0  ;;  %7462 = vmatprep.mubr.msk.bf16.mxu0 (!%p10274_p6), %vm9092_vm0, %v9091_v1  ;;  %v7918_v6 = vld [vmem:[#allocation4 + $0x10] sm:$0xff] (!%p10274_p6)   ;;  %v7919_v7 = vld [vmem:[#allocation4 + $0x18] sm:$0xff] (!%p10274_p6)   ;;  %v7921_v9 = vld [vmem:[#allocation4 + $0x20] sm:$0xff] (!%p10274_p6)  }
  0xca   : > { %7467 = vmatpush3.bf16.msra.mxu1 (!%p10274_p6), %v7914_v2  ;;  %7448 = vmatprep.subr.bf16.mxu0 (!%p10274_p6), %v9091_v1  ;;  %v7920_v8 = vld [vmem:[#allocation4 + $0x18] sm:$0xff] (!%p10274_p6)   ;;  %v7922_v10 = vld [vmem:[#allocation4 + $0x20] sm:$0xff] (!%p10274_p6)   ;;  %v7923_v11 = vld [vmem:[#allocation4 + $0x28] sm:$0xff] (!%p10274_p6)  }
  0xcb   : > { %7468 = vmatprep.subr.bf16.mxu1 (!%p10274_p6), %v9091_v1  ;;  %7482 = vmatprep.mubr.msk.bf16.mxu1 (!%p10274_p6), %vm9092_vm0, %v9091_v1  ;;  %v7924_v12 = vld [vmem:[#allocation4 + $0x28] sm:$0xff] (!%p10274_p6)   ;;  %v7925_v13 = vld [vmem:[#allocation4 + $0x30] sm:$0xff] (!%p10274_p6)   ;;  %v7927_v15 = vld [vmem:[#allocation4 + $0x38] sm:$0xff] (!%p10274_p6)  }
  0xcc   : > { %v7926_v14 = vld [vmem:[#allocation4 + $0x30] sm:$0xff] (!%p10274_p6)   ;;  %v7928_v16 = vld [vmem:[#allocation4 + $0x38] sm:$0xff] (!%p10274_p6)   ;;  %v7929_v19 = vld [vmem:[#allocation4] sm:$0xff] (!%p10274_p6)  }
  0xcd   : > { %7449 = vmatpush3.bf16.msra.mxu0 (!%p10274_p6), %v7915_v3  ;;  %v402_v17 = vld [vmem:[%s10219_s0] sm:$0xf] (!%p10274_p6)  ;;  %v517_v18 = vld [vmem:[%s10219_s0 + $0x4] sm:$0xf] (!%p10274_p6)  ;;  %v7930_v20 = vld [vmem:[#allocation4] sm:$0xff] (!%p10274_p6)  }
  0xce   : > { %7469 = vmatpush3.bf16.msra.mxu1 (!%p10274_p6), %v7916_v4  ;;  %7450 = vmatprep.subr.bf16.mxu0 (!%p10274_p6), %v9091_v1  ;;  %v7931_v21 = vld [vmem:[#allocation4 + $0x8] sm:$0xff] (!%p10274_p6)   ;;  %v7933_v23 = vld [vmem:[#allocation4 + $0x10] sm:$0xff] (!%p10274_p6)   ;;  %v7935_v25 = vld [vmem:[#allocation4 + $0x18] sm:$0xff] (!%p10274_p6)  }
  0xcf   : > { %7470 = vmatprep.subr.bf16.mxu1 %v9091_v1  ;;  %v7932_v22 = vld [vmem:[#allocation4 + $0x8] sm:$0xff]   ;;  %v7934_v24 = vld [vmem:[#allocation4 + $0x10] sm:$0xff]   ;;  %v7936_v26 = vld [vmem:[#allocation4 + $0x18] sm:$0xff]  }
  0xd0   : > { %v7937_v27 = vld [vmem:[#allocation4 + $0x20] sm:$0xff]   ;;  %v7939_v29 = vld [vmem:[#allocation4 + $0x28] sm:$0xff]   ;;  %v7941_v31 = vld [vmem:[#allocation4 + $0x30] sm:$0xff]  }
  0xd1   : > { %7451 = vmatpush3.bf16.msra.mxu0 %v7917_v5  ;;  %v7938_v28 = vld [vmem:[#allocation4 + $0x20] sm:$0xff]   ;;  %v7940_v30 = vld [vmem:[#allocation4 + $0x28] sm:$0xff]   ;;  %v7942_v32 = vld [vmem:[#allocation4 + $0x30] sm:$0xff]  }
  0xd2   : > { %7471 = vmatpush3.bf16.msra.mxu1 %v7918_v6  ;;  %7452 = vmatprep.subr.bf16.mxu0 %v9091_v1  ;;  %v7943_v33 = vld [vmem:[#allocation4 + $0x38] sm:$0xff]   ;;  %v632_v35 = vld [vmem:[%s10219_s0 + $0x8] sm:$0xf]  ;;  %v747_v36 = vld [vmem:[%s10219_s0 + $0xc] sm:$0xf] }
  0xd3   : > { %7472 = vmatprep.subr.bf16.mxu1 %v9091_v1  ;;  %v7944_v34 = vld [vmem:[#allocation4 + $0x38] sm:$0xff]   ;;  %v7945_v37 = vld [vmem:[#allocation4] sm:$0xff]   ;;  %v7947_v39 = vld [vmem:[#allocation4 + $0x8] sm:$0xff]  }
  0xd4   : > { %v7946_v38 = vld [vmem:[#allocation4] sm:$0xff]   ;;  %v7948_v40 = vld [vmem:[#allocation4 + $0x8] sm:$0xff]   ;;  %v7949_v41 = vld [vmem:[#allocation4 + $0x10] sm:$0xff]  }
  0xd5   : > { %7453 = vmatpush3.bf16.msra.mxu0 %v7919_v7  ;;  %v7950_v42 = vld [vmem:[#allocation4 + $0x10] sm:$0xff]   ;;  %v7951_v43 = vld [vmem:[#allocation4 + $0x18] sm:$0xff]   ;;  %v7953_v45 = vld [vmem:[#allocation4 + $0x20] sm:$0xff]  }
  0xd6   : > { %7473 = vmatpush3.bf16.msra.mxu1 %v7920_v8  ;;  %7454 = vmatprep.subr.bf16.mxu0 %v9091_v1  ;;  %v7952_v44 = vld [vmem:[#allocation4 + $0x18] sm:$0xff]   ;;  %v7954_v46 = vld [vmem:[#allocation4 + $0x20] sm:$0xff]   ;;  %v7955_v47 = vld [vmem:[#allocation4 + $0x28] sm:$0xff]  }
  0xd7   : > { %7474 = vmatprep.subr.bf16.mxu1 %v9091_v1  ;;  %v7956_v48 = vld [vmem:[#allocation4 + $0x28] sm:$0xff]   ;;  %v7957_v49 = vld [vmem:[#allocation4 + $0x30] sm:$0xff]   ;;  %v7959_v51 = vld [vmem:[#allocation4 + $0x38] sm:$0xff]  }
  0xd8   : > { %v7958_v50 = vld [vmem:[#allocation4 + $0x30] sm:$0xff]   ;;  %v7960_v52 = vld [vmem:[#allocation4 + $0x38] sm:$0xff]   ;;  %v862_v53 = vld [vmem:[%s10219_s0 + $0x10] sm:$0xf] }
  0xd9   : > { %7455 = vmatpush3.bf16.msra.mxu0 %v7921_v9  ;;  %v977_v54 = vld [vmem:[%s10219_s0 + $0x14] sm:$0xf]  ;;  %v7961_v55 = vld [vmem:[#allocation4] sm:$0xff]   ;;  %v7965_v59 = vld [vmem:[#allocation4 + $0x10] sm:$0xff]  }
  0xda   : > { %7475 = vmatpush3.bf16.msra.mxu1 %v7922_v10  ;;  %7456 = vmatprep.subr.bf16.mxu0 %v9091_v1  ;;  %v7962_v56 = vld [vmem:[#allocation4] sm:$0xff]   ;;  %v7963_v57 = vld [vmem:[#allocation4 + $0x8] sm:$0xff]   ;;  %v7966_v60 = vld [vmem:[#allocation4 + $0x10] sm:$0xff]  }
  0xdb   : > { %7476 = vmatprep.subr.bf16.mxu1 %v9091_v1  ;;  %v7964_v58 = vld [vmem:[#allocation4 + $0x8] sm:$0xff]   ;;  %v7967_v61 = vld [vmem:[#allocation4 + $0x18] sm:$0xff]   ;;  %v7969_v63 = vld [vmem:[#allocation4 + $0x20] sm:$0xff]  }
  0xdc   : > { %v7968_v62 = vld [vmem:[#allocation4 + $0x18] sm:$0xff]   ;;  %v7970_v0 = vld [vmem:[#allocation4 + $0x20] sm:$0xff]   ;;  %v7971_v2 = vld [vmem:[#allocation4 + $0x28] sm:$0xff]  }
  0xdd   : > { %7457 = vmatpush3.bf16.msra.mxu0 %v7923_v11  ;;  %v7972_v3 = vld [vmem:[#allocation4 + $0x28] sm:$0xff]   ;;  %v7973_v4 = vld [vmem:[#allocation4 + $0x30] sm:$0xff]   ;;  %v7975_v6 = vld [vmem:[#allocation4 + $0x38] sm:$0xff]  }
  0xde   : > { %7477 = vmatpush3.bf16.msra.mxu1 %v7924_v12  ;;  %7458 = vmatprep.subr.bf16.mxu0 %v9091_v1  ;;  %v7974_v5 = vld [vmem:[#allocation4 + $0x30] sm:$0xff]   ;;  %v7976_v7 = vld [vmem:[#allocation4 + $0x38] sm:$0xff]   ;;  %v7977_v10 = vld [vmem:[#allocation4] sm:$0xff]  }
  0xdf   : > { %7478 = vmatprep.subr.bf16.mxu1 %v9091_v1  ;;  %v1092_v8 = vld [vmem:[%s10219_s0 + $0x18] sm:$0xf]  ;;  %v1207_v9 = vld [vmem:[%s10219_s0 + $0x1c] sm:$0xf]  ;;  %v7978_v11 = vld [vmem:[#allocation4] sm:$0xff]  }
  0xe0   : > { %v7979_v12 = vld [vmem:[#allocation4 + $0x8] sm:$0xff]  }
  0xe1   : > { %7459 = vmatpush3.bf16.msra.mxu0 %v7925_v13  ;;  %v7980_v13 = vld [vmem:[#allocation4 + $0x8] sm:$0xff]  }
  0xe2   : > { %7479 = vmatpush3.bf16.msra.mxu1 %v7926_v14  ;;  %7460 = vmatprep.subr.bf16.mxu0 %v9091_v1  ;;  %v7981_v14 = vld [vmem:[#allocation4 + $0x10] sm:$0xff]  }
  0xe3   : > { %7480 = vmatprep.subr.bf16.mxu1 %v9091_v1 }
  0xe5   : > { %7461 = vmatpush3.bf16.msra.mxu0 %v7927_v15  ;;  %v7982_v15 = vld [vmem:[#allocation4 + $0x10] sm:$0xff]  }
  0xe6   : > { %7481 = vmatpush3.bf16.msra.mxu1 %v7928_v16  ;;  %7486 = vmatprep.subr.bf16.mxu0 %v9091_v1  ;;  %v7983_v16 = vld [vmem:[#allocation4 + $0x18] sm:$0xff]  }
  0xe7   : > { %7506 = vmatprep.subr.bf16.mxu1 %v9091_v1 }
  0xe8   : > { %7463 = vmatmul.mubr.bf16.vlgmr.msra.gmra.mrb[0].mxu0 %v402_v17  ;;  %v7984_v17 = vld [vmem:[#allocation4 + $0x18] sm:$0xff]  }
  0xe9   : > { %7483 = vmatmul.mubr.bf16.vlgmr.msra.gmra.mrb[0].mxu1 %v517_v18  ;;  %7487 = vmatpush3.bf16.msra.mxu0 %v7929_v19  ;;  %v7985_v18 = vld [vmem:[#allocation4 + $0x20] sm:$0xff]  }
  0xea   : > { %7507 = vmatpush3.bf16.msra.mxu1 %v7930_v20  ;;  %7488 = vmatprep.subr.bf16.mxu0 %v9091_v1  ;;  %v7986_v19 = vld [vmem:[#allocation4 + $0x20] sm:$0xff]   ;;  %v7987_v20 = vld [vmem:[#allocation4 + $0x28] sm:$0xff]  }
  0xeb   : > { %7508 = vmatprep.subr.bf16.mxu1 %v9091_v1  ;;  %7502 = vmatprep.mubr.msk.bf16.mxu0 %vm9092_vm0, %v9091_v1 }
  0xec   : > { %7522 = vmatprep.mubr.msk.bf16.mxu1 %vm9092_vm0, %v9091_v1 }
  0xed   : > { %7489 = vmatpush3.bf16.msra.mxu0 %v7931_v21  ;;  %v7988_v21 = vld [vmem:[#allocation4 + $0x28] sm:$0xff]  }
  0xee   : > { %7509 = vmatpush3.bf16.msra.mxu1 %v7932_v22  ;;  %7490 = vmatprep.subr.bf16.mxu0 %v9091_v1  ;;  %v7989_v22 = vld [vmem:[#allocation4 + $0x30] sm:$0xff]  }
  0xef   : > { %7510 = vmatprep.subr.bf16.mxu1 %v9091_v1 }
  0xf1   : > { %7491 = vmatpush3.bf16.msra.mxu0 %v7933_v23  ;;  %v7990_v23 = vld [vmem:[#allocation4 + $0x30] sm:$0xff]  }
  0xf2   : > { %7511 = vmatpush3.bf16.msra.mxu1 %v7934_v24  ;;  %7492 = vmatprep.subr.bf16.mxu0 %v9091_v1  ;;  %v9508_v24 = vld [vmem:[#allocation3] sm:$0xff] }
  0xf3   : > { %7512 = vmatprep.subr.bf16.mxu1 %v9091_v1 }
  0xf5   : > { %7493 = vmatpush3.bf16.msra.mxu0 %v7935_v25  ;;  %v7991_v25 = vld [vmem:[#allocation4 + $0x38] sm:$0xff]  }
  0xf6   : > { %7513 = vmatpush3.bf16.msra.mxu1 %v7936_v26  ;;  %7494 = vmatprep.subr.bf16.mxu0 %v9091_v1  ;;  %v7992_v26 = vld [vmem:[#allocation4 + $0x38] sm:$0xff]  }
  0xf7   : > { %7514 = vmatprep.subr.bf16.mxu1 %v9091_v1 }
  0xf9   : > { %7495 = vmatpush3.bf16.msra.mxu0 %v7937_v27  ;;  %v1322_v27 = vld [vmem:[%s10219_s0 + $0x20] sm:$0xf] }
  0xfa   : > { %7515 = vmatpush3.bf16.msra.mxu1 %v7938_v28  ;;  %7496 = vmatprep.subr.bf16.mxu0 %v9091_v1  ;;  %v7993_v28 = vld [vmem:[#allocation4] sm:$0xff]  }
  0xfb   : > { %7516 = vmatprep.subr.bf16.mxu1 %v9091_v1 }
  0xfd   : > { %7497 = vmatpush3.bf16.msra.mxu0 %v7939_v29  ;;  %v7994_v29 = vld [vmem:[#allocation4] sm:$0xff]  }
  0xfe   : > { %7517 = vmatpush3.bf16.msra.mxu1 %v7940_v30  ;;  %7498 = vmatprep.subr.bf16.mxu0 %v9091_v1  ;;  %v7995_v30 = vld [vmem:[#allocation4 + $0x8] sm:$0xff]  }
  0xff   : > { %7518 = vmatprep.subr.bf16.mxu1 %v9091_v1 }
 0x101   : > { %7499 = vmatpush3.bf16.msra.mxu0 %v7941_v31  ;;  %v7996_v31 = vld [vmem:[#allocation4 + $0x8] sm:$0xff]  }
 0x102   : > { %7519 = vmatpush3.bf16.msra.mxu1 %v7942_v32  ;;  %7500 = vmatprep.subr.bf16.mxu0 %v9091_v1  ;;  %v7997_v32 = vld [vmem:[#allocation4 + $0x10] sm:$0xff]  }
 0x103   : > { %7520 = vmatprep.subr.bf16.mxu1 %v9091_v1 }
 0x105   : > { %7501 = vmatpush3.bf16.msra.mxu0 %v7943_v33  ;;  %v7998_v33 = vld [vmem:[#allocation4 + $0x10] sm:$0xff]  }
 0x106   : > { %7521 = vmatpush3.bf16.msra.mxu1 %v7944_v34  ;;  %7526 = vmatprep.subr.bf16.mxu0 %v9091_v1  ;;  %v7999_v34 = vld [vmem:[#allocation4 + $0x18] sm:$0xff]  }
 0x107   : > { %7546 = vmatprep.subr.bf16.mxu1 %v9091_v1 }
 0x108   : > { %7503 = vmatmul.mubr.bf16.vlgmr.msra.gmra.mrb[4].mxu0 %v632_v35  ;;  %v8000_v35 = vld [vmem:[#allocation4 + $0x18] sm:$0xff]  }
 0x109   : > { %7523 = vmatmul.mubr.bf16.vlgmr.msra.gmra.mrb[4].mxu1 %v747_v36  ;;  %7527 = vmatpush3.bf16.msra.mxu0 %v7945_v37  ;;  %v8001_v36 = vld [vmem:[#allocation4 + $0x20] sm:$0xff]  }
 0x10a   : > { %7547 = vmatpush3.bf16.msra.mxu1 %v7946_v38  ;;  %7528 = vmatprep.subr.bf16.mxu0 %v9091_v1  ;;  %v8002_v37 = vld [vmem:[#allocation4 + $0x20] sm:$0xff]   ;;  %v8003_v38 = vld [vmem:[#allocation4 + $0x28] sm:$0xff]  }
 0x10b   : > { %7548 = vmatprep.subr.bf16.mxu1 %v9091_v1  ;;  %7542 = vmatprep.mubr.msk.bf16.mxu0 %vm9092_vm0, %v9091_v1 }
 0x10c   : > { %7562 = vmatprep.mubr.msk.bf16.mxu1 %vm9092_vm0, %v9091_v1 }
 0x10d   : > { %7529 = vmatpush3.bf16.msra.mxu0 %v7947_v39  ;;  %v8004_v39 = vld [vmem:[#allocation4 + $0x28] sm:$0xff]  }
 0x10e   : > { %7549 = vmatpush3.bf16.msra.mxu1 %v7948_v40  ;;  %7530 = vmatprep.subr.bf16.mxu0 %v9091_v1  ;;  %v8005_v40 = vld [vmem:[#allocation4 + $0x30] sm:$0xff]  }
 0x10f   : > { %7550 = vmatprep.subr.bf16.mxu1 %v9091_v1 }
 0x111   : > { %7531 = vmatpush3.bf16.msra.mxu0 %v7949_v41  ;;  %v8006_v41 = vld [vmem:[#allocation4 + $0x30] sm:$0xff]  }
 0x112   : > { %7551 = vmatpush3.bf16.msra.mxu1 %v7950_v42  ;;  %7532 = vmatprep.subr.bf16.mxu0 %v9091_v1  ;;  %v8007_v42 = vld [vmem:[#allocation4 + $0x38] sm:$0xff]  }
 0x113   : > { %7552 = vmatprep.subr.bf16.mxu1 %v9091_v1 }
 0x115   : > { %7533 = vmatpush3.bf16.msra.mxu0 %v7951_v43  ;;  %v8008_v43 = vld [vmem:[#allocation4 + $0x38] sm:$0xff]  }
 0x116   : > { %7553 = vmatpush3.bf16.msra.mxu1 %v7952_v44  ;;  %7534 = vmatprep.subr.bf16.mxu0 %v9091_v1  ;;  %v1552_v44 = vld [vmem:[%s10219_s0 + $0x28] sm:$0xf] }
 0x117   : > { %7554 = vmatprep.subr.bf16.mxu1 %v9091_v1 }
 0x119   : > { %7535 = vmatpush3.bf16.msra.mxu0 %v7953_v45  ;;  %v8009_v45 = vld [vmem:[#allocation4] sm:$0xff]  }
 0x11a   : > { %7555 = vmatpush3.bf16.msra.mxu1 %v7954_v46  ;;  %7536 = vmatprep.subr.bf16.mxu0 %v9091_v1  ;;  %v1667_v46 = vld [vmem:[%s10219_s0 + $0x2c] sm:$0xf] }
 0x11b   : > { %7556 = vmatprep.subr.bf16.mxu1 %v9091_v1 }
 0x11d   : > { %7537 = vmatpush3.bf16.msra.mxu0 %v7955_v47  ;;  %v8010_v47 = vld [vmem:[#allocation4] sm:$0xff]  }
 0x11e   : > { %7557 = vmatpush3.bf16.msra.mxu1 %v7956_v48  ;;  %7538 = vmatprep.subr.bf16.mxu0 %v9091_v1  ;;  %v8011_v48 = vld [vmem:[#allocation4 + $0x8] sm:$0xff]  }
 0x11f   : > { %7558 = vmatprep.subr.bf16.mxu1 %v9091_v1 }
 0x121   : > { %7539 = vmatpush3.bf16.msra.mxu0 %v7957_v49  ;;  %v8012_v49 = vld [vmem:[#allocation4 + $0x8] sm:$0xff]  }
 0x122   : > { %7559 = vmatpush3.bf16.msra.mxu1 %v7958_v50  ;;  %7540 = vmatprep.subr.bf16.mxu0 %v9091_v1  ;;  %v8013_v50 = vld [vmem:[#allocation4 + $0x10] sm:$0xff]  }
 0x123   : > { %7560 = vmatprep.subr.bf16.mxu1 %v9091_v1 }
 0x125   : > { %7541 = vmatpush3.bf16.msra.mxu0 %v7959_v51  ;;  %v8014_v51 = vld [vmem:[#allocation4 + $0x10] sm:$0xff]  }
 0x126   : > { %7561 = vmatpush3.bf16.msra.mxu1 %v7960_v52  ;;  %7566 = vmatprep.subr.bf16.mxu0 %v9091_v1  ;;  %v8015_v52 = vld [vmem:[#allocation4 + $0x18] sm:$0xff]  }
 0x127   : > { %7586 = vmatprep.subr.bf16.mxu1 %v9091_v1 }
 0x128   : > { %7543 = vmatmul.mubr.bf16.vlgmr.msra.gmra.mrb[8].mxu0 %v862_v53  ;;  %v8016_v53 = vld [vmem:[#allocation4 + $0x18] sm:$0xff]  }
 0x129   : > { %7563 = vmatmul.mubr.bf16.vlgmr.msra.gmra.mrb[8].mxu1 %v977_v54  ;;  %7567 = vmatpush3.bf16.msra.mxu0 %v7961_v55  ;;  %v8017_v54 = vld [vmem:[#allocation4 + $0x20] sm:$0xff]  }
 0x12a   : > { %7587 = vmatpush3.bf16.msra.mxu1 %v7962_v56  ;;  %7568 = vmatprep.subr.bf16.mxu0 %v9091_v1  ;;  %v8018_v55 = vld [vmem:[#allocation4 + $0x20] sm:$0xff]   ;;  %v8019_v56 = vld [vmem:[#allocation4 + $0x28] sm:$0xff]  }
 0x12b   : > { %7588 = vmatprep.subr.bf16.mxu1 %v9091_v1  ;;  %7582 = vmatprep.mubr.msk.bf16.mxu0 %vm9092_vm0, %v9091_v1 }
 0x12c   : > { %7602 = vmatprep.mubr.msk.bf16.mxu1 %vm9092_vm0, %v9091_v1 }
 0x12d   : > { %7569 = vmatpush3.bf16.msra.mxu0 %v7963_v57  ;;  %v8020_v57 = vld [vmem:[#allocation4 + $0x28] sm:$0xff]  }
 0x12e   : > { %7589 = vmatpush3.bf16.msra.mxu1 %v7964_v58  ;;  %7570 = vmatprep.subr.bf16.mxu0 %v9091_v1  ;;  %v8021_v58 = vld [vmem:[#allocation4 + $0x30] sm:$0xff]  }
 0x12f   : > { %7590 = vmatprep.subr.bf16.mxu1 %v9091_v1 }
 0x131   : > { %7571 = vmatpush3.bf16.msra.mxu0 %v7965_v59  ;;  %v8022_v59 = vld [vmem:[#allocation4 + $0x30] sm:$0xff]  }
 0x132   : > { %7591 = vmatpush3.bf16.msra.mxu1 %v7966_v60  ;;  %7572 = vmatprep.subr.bf16.mxu0 %v9091_v1  ;;  %v8023_v60 = vld [vmem:[#allocation4 + $0x38] sm:$0xff]  }
 0x133   : > { %7592 = vmatprep.subr.bf16.mxu1 %v9091_v1 }
 0x135   : > { %7573 = vmatpush3.bf16.msra.mxu0 %v7967_v61  ;;  %v8024_v61 = vld [vmem:[#allocation4 + $0x38] sm:$0xff]  }
 0x136   : > { %7593 = vmatpush3.bf16.msra.mxu1 %v7968_v62  ;;  %7574 = vmatprep.subr.bf16.mxu0 %v9091_v1  ;;  %v1782_v62 = vld [vmem:[%s10219_s0 + $0x30] sm:$0xf] }
 0x137   : > { %7594 = vmatprep.subr.bf16.mxu1 %v9091_v1 }
 0x139   : > { %7575 = vmatpush3.bf16.msra.mxu0 %v7969_v63  ;;  %v8025_v63 = vld [vmem:[#allocation4] sm:$0xff]  }
 0x13a   : > { %7595 = vmatpush3.bf16.msra.mxu1 %v7970_v0  ;;  %7576 = vmatprep.subr.bf16.mxu0 %v9091_v1  ;;  %v1897_v0 = vld [vmem:[%s10219_s0 + $0x34] sm:$0xf] }
 0x13b   : > { %7596 = vmatprep.subr.bf16.mxu1 %v9091_v1 }
 0x13d   : > { %7577 = vmatpush3.bf16.msra.mxu0 %v7971_v2  ;;  %v8026_v2 = vld [vmem:[#allocation4] sm:$0xff]  }
 0x13e   : > { %7597 = vmatpush3.bf16.msra.mxu1 %v7972_v3  ;;  %7578 = vmatprep.subr.bf16.mxu0 %v9091_v1  ;;  %v8027_v3 = vld [vmem:[#allocation4 + $0x8] sm:$0xff]  }
 0x13f   : > { %7598 = vmatprep.subr.bf16.mxu1 %v9091_v1 }
 0x141   : > { %7579 = vmatpush3.bf16.msra.mxu0 %v7973_v4  ;;  %v8028_v4 = vld [vmem:[#allocation4 + $0x8] sm:$0xff]  }
 0x142   : > { %7599 = vmatpush3.bf16.msra.mxu1 %v7974_v5  ;;  %7580 = vmatprep.subr.bf16.mxu0 %v9091_v1  ;;  %v8029_v5 = vld [vmem:[#allocation4 + $0x10] sm:$0xff]  }
 0x143   : > { %7600 = vmatprep.subr.bf16.mxu1 %v9091_v1 }
 0x145   : > { %7581 = vmatpush3.bf16.msra.mxu0 %v7975_v6  ;;  %v8030_v6 = vld [vmem:[#allocation4 + $0x10] sm:$0xff]  }
 0x146   : > { %7601 = vmatpush3.bf16.msra.mxu1 %v7976_v7  ;;  %7606 = vmatprep.subr.bf16.mxu0 %v9091_v1  ;;  %v8031_v7 = vld [vmem:[#allocation4 + $0x18] sm:$0xff]  }
 0x147   : > { %7626 = vmatprep.subr.bf16.mxu1 %v9091_v1 }
 0x148   : > { %7583 = vmatmul.mubr.bf16.vlgmr.msra.gmra.mrb[12].mxu0 %v1092_v8  ;;  %v8032_v8 = vld [vmem:[#allocation4 + $0x18] sm:$0xff]  }
 0x149   : > { %7603 = vmatmul.mubr.bf16.vlgmr.msra.gmra.mrb[12].mxu1 %v1207_v9  ;;  %7607 = vmatpush3.bf16.msra.mxu0 %v7977_v10  ;;  %v8033_v9 = vld [vmem:[#allocation4 + $0x20] sm:$0xff]  }
 0x14a   : > { %7627 = vmatpush3.bf16.msra.mxu1 %v7978_v11  ;;  %7608 = vmatprep.subr.bf16.mxu0 %v9091_v1  ;;  %v8034_v10 = vld [vmem:[#allocation4 + $0x20] sm:$0xff]  }
 0x14b   : > { %7628 = vmatprep.subr.bf16.mxu1 %v9091_v1  ;;  %7622 = vmatprep.mubr.msk.bf16.mxu0 %vm9092_vm0, %v9091_v1  ;;  %v9585_v11 = vld [vmem:[#allocation6] ss:$0 sm:$0xff] }
 0x14c   : > { %7642 = vmatprep.mubr.msk.bf16.mxu1 %vm9092_vm0, %v9091_v1 }
 0x14d   : > { %7609 = vmatpush3.bf16.msra.mxu0 %v7979_v12  ;;  %v8035_v12 = vld [vmem:[#allocation4 + $0x28] sm:$0xff]  }
 0x14e   : > { %7629 = vmatpush3.bf16.msra.mxu1 %v7980_v13  ;;  %7610 = vmatprep.subr.bf16.mxu0 %v9091_v1  ;;  %v8036_v13 = vld [vmem:[#allocation4 + $0x28] sm:$0xff]  }
 0x14f   : > { %7630 = vmatprep.subr.bf16.mxu1 %v9091_v1 }
 0x151   : > { %7611 = vmatpush3.bf16.msra.mxu0 %v7981_v14 }
 0x152   : > { %7631 = vmatpush3.bf16.msra.mxu1 %v7982_v15  ;;  %7612 = vmatprep.subr.bf16.mxu0 %v9091_v1 }
 0x153   : > { %7632 = vmatprep.subr.bf16.mxu1 %v9091_v1 }
 0x155   : > { %7613 = vmatpush3.bf16.msra.mxu0 %v7983_v16 }
 0x156   : > { %7633 = vmatpush3.bf16.msra.mxu1 %v7984_v17  ;;  %7614 = vmatprep.subr.bf16.mxu0 %v9091_v1 }
 0x157   : > { %7634 = vmatprep.subr.bf16.mxu1 %v9091_v1 }
 0x159   : > { %7615 = vmatpush3.bf16.msra.mxu0 %v7985_v18 }
 0x15a   : > { %7635 = vmatpush3.bf16.msra.mxu1 %v7986_v19  ;;  %7616 = vmatprep.subr.bf16.mxu0 %v9091_v1 }
 0x15b   : > { %7636 = vmatprep.subr.bf16.mxu1 %v9091_v1 }
 0x15d   : > { %7617 = vmatpush3.bf16.msra.mxu0 %v7987_v20 }
 0x15e   : > { %7637 = vmatpush3.bf16.msra.mxu1 %v7988_v21  ;;  %7618 = vmatprep.subr.bf16.mxu0 %v9091_v1  ;;  %v1437_v1 = vld [vmem:[%s10219_s0 + $0x24] sm:$0xf]  ;;  %v8037_v21 = vld [vmem:[#allocation4 + $0x30] sm:$0xff]  }
 0x15f   : > { %7638 = vmatprep.subr.bf16.mxu1 %v9508_v24 }
 0x161   : > { %7619 = vmatpush3.bf16.msra.mxu0 %v7989_v22 }
 0x162   : > { %7639 = vmatpush3.bf16.msra.mxu1 %v7990_v23  ;;  %7620 = vmatprep.subr.bf16.mxu0 %v9508_v24 }
 0x163   : > { %7640 = vmatprep.subr.bf16.mxu1 %v9508_v24 }
 0x165   : > { %7621 = vmatpush3.bf16.msra.mxu0 %v7991_v25 }
 0x166   : > { %7641 = vmatpush3.bf16.msra.mxu1 %v7992_v26  ;;  %7646 = vmatprep.subr.bf16.mxu0 %v9508_v24  ;;  %v8038_v26 = vld [vmem:[#allocation4 + $0x30] sm:$0xff]  }
 0x167   : > { %7666 = vmatprep.subr.bf16.mxu1 %v9508_v24 }
 0x168   : > { %7623 = vmatmul.mubr.bf16.vlgmr.msra.gmra.mrb[16].mxu0 %v1322_v27 }
 0x169   : > { %7643 = vmatmul.mubr.bf16.vlgmr.msra.gmra.mrb[16].mxu1 %v1437_v1  ;;  %7647 = vmatpush3.bf16.msra.mxu0 %v7993_v28 }
 0x16a   : > { %7667 = vmatpush3.bf16.msra.mxu1 %v7994_v29  ;;  %7648 = vmatprep.subr.bf16.mxu0 %v9508_v24 }
 0x16b   : > { %7668 = vmatprep.subr.bf16.mxu1 %v9508_v24  ;;  %7662 = vmatprep.mubr.msk.bf16.mxu0 %vm9092_vm0, %v9508_v24 }
 0x16c   : > { %7682 = vmatprep.mubr.msk.bf16.mxu1 %vm9092_vm0, %v9508_v24 }
 0x16d   : > { %7649 = vmatpush3.bf16.msra.mxu0 %v7995_v30  ;;  %v8039_v30 = vld [vmem:[#allocation4 + $0x38] sm:$0xff]  }
 0x16e   : > { %7669 = vmatpush3.bf16.msra.mxu1 %v7996_v31  ;;  %7650 = vmatprep.subr.bf16.mxu0 %v9508_v24  ;;  %v8040_v31 = vld [vmem:[#allocation4 + $0x38] sm:$0xff]  }
 0x16f   : > { %7670 = vmatprep.subr.bf16.mxu1 %v9508_v24 }
 0x171   : > { %7651 = vmatpush3.bf16.msra.mxu0 %v7997_v32  ;;  %v2012_v32 = vld [vmem:[%s10219_s0 + $0x38] sm:$0xf] }
 0x172   : > { %7671 = vmatpush3.bf16.msra.mxu1 %v7998_v33  ;;  %7652 = vmatprep.subr.bf16.mxu0 %v9508_v24  ;;  %v2127_v33 = vld [vmem:[%s10219_s0 + $0x3c] sm:$0xf] }
 0x173   : > { %7672 = vmatprep.subr.bf16.mxu1 %v9508_v24 }
 0x175   : > { %7653 = vmatpush3.bf16.msra.mxu0 %v7999_v34 }
 0x176   : > { %7673 = vmatpush3.bf16.msra.mxu1 %v8000_v35  ;;  %7654 = vmatprep.subr.bf16.mxu0 %v9508_v24 }
 0x177   : > { %7674 = vmatprep.subr.bf16.mxu1 %v9508_v24 }
 0x179   : > { %7655 = vmatpush3.bf16.msra.mxu0 %v8001_v36 }
 0x17a   : > { %7675 = vmatpush3.bf16.msra.mxu1 %v8002_v37  ;;  %7656 = vmatprep.subr.bf16.mxu0 %v9508_v24 }
 0x17b   : > { %7676 = vmatprep.subr.bf16.mxu1 %v9508_v24 }
 0x17d   : > { %7657 = vmatpush3.bf16.msra.mxu0 %v8003_v38 }
 0x17e   : > { %7677 = vmatpush3.bf16.msra.mxu1 %v8004_v39  ;;  %7658 = vmatprep.subr.bf16.mxu0 %v9508_v24 }
 0x17f   : > { %7678 = vmatprep.subr.bf16.mxu1 %v9508_v24 }
 0x181   : > { %7659 = vmatpush3.bf16.msra.mxu0 %v8005_v40 }
 0x182   : > { %7679 = vmatpush3.bf16.msra.mxu1 %v8006_v41  ;;  %7660 = vmatprep.subr.bf16.mxu0 %v9508_v24 }
 0x183   : > { %7680 = vmatprep.subr.bf16.mxu1 %v9508_v24 }
 0x185   : > { %7661 = vmatpush3.bf16.msra.mxu0 %v8007_v42 }
 0x186   : > { %7681 = vmatpush3.bf16.msra.mxu1 %v8008_v43  ;;  %7686 = vmatprep.subr.bf16.mxu0 %v9508_v24 }
 0x187   : > { %7706 = vmatprep.subr.bf16.mxu1 %v9508_v24 }
 0x188   : > { %7663 = vmatmul.mubr.bf16.vlgmr.msra.gmra.mrb[20].mxu0 %v1552_v44 }
 0x189   : > { %7683 = vmatmul.mubr.bf16.vlgmr.msra.gmra.mrb[20].mxu1 %v1667_v46  ;;  %7687 = vmatpush3.bf16.msra.mxu0 %v8009_v45 }
 0x18a   : > { %7707 = vmatpush3.bf16.msra.mxu1 %v8010_v47  ;;  %7688 = vmatprep.subr.bf16.mxu0 %v9508_v24 }
 0x18b   : > { %7708 = vmatprep.subr.bf16.mxu1 %v9508_v24  ;;  %7702 = vmatprep.mubr.msk.bf16.mxu0 %vm9092_vm0, %v9508_v24 }
 0x18c   : > { %7722 = vmatprep.mubr.msk.bf16.mxu1 %vm9092_vm0, %v9508_v24 }
 0x18d   : > { %7689 = vmatpush3.bf16.msra.mxu0 %v8011_v48 }
 0x18e   : > { %7709 = vmatpush3.bf16.msra.mxu1 %v8012_v49  ;;  %7690 = vmatprep.subr.bf16.mxu0 %v9508_v24 }
 0x18f   : > { %7710 = vmatprep.subr.bf16.mxu1 %v9508_v24 }
 0x191   : > { %7691 = vmatpush3.bf16.msra.mxu0 %v8013_v50 }
 0x192   : > { %7711 = vmatpush3.bf16.msra.mxu1 %v8014_v51  ;;  %7692 = vmatprep.subr.bf16.mxu0 %v9508_v24 }
 0x193   : > { %7712 = vmatprep.subr.bf16.mxu1 %v9508_v24 }
 0x195   : > { %7693 = vmatpush3.bf16.msra.mxu0 %v8015_v52 }
 0x196   : > { %7713 = vmatpush3.bf16.msra.mxu1 %v8016_v53  ;;  %7694 = vmatprep.subr.bf16.mxu0 %v9508_v24 }
 0x197   : > { %7714 = vmatprep.subr.bf16.mxu1 %v9508_v24 }
 0x199   : > { %7695 = vmatpush3.bf16.msra.mxu0 %v8017_v54 }
 0x19a   : > { %7715 = vmatpush3.bf16.msra.mxu1 %v8018_v55  ;;  %7696 = vmatprep.subr.bf16.mxu0 %v9508_v24 }
 0x19b   : > { %7716 = vmatprep.subr.bf16.mxu1 %v9508_v24 }
 0x19d   : > { %7697 = vmatpush3.bf16.msra.mxu0 %v8019_v56 }
 0x19e   : > { %7717 = vmatpush3.bf16.msra.mxu1 %v8020_v57  ;;  %7698 = vmatprep.subr.bf16.mxu0 %v9508_v24 }
 0x19f   : > { %7718 = vmatprep.subr.bf16.mxu1 %v9508_v24 }
 0x1a1   : > { %7699 = vmatpush3.bf16.msra.mxu0 %v8021_v58 }
 0x1a2   : > { %7719 = vmatpush3.bf16.msra.mxu1 %v8022_v59  ;;  %7700 = vmatprep.subr.bf16.mxu0 %v9508_v24 }
 0x1a3   : > { %7720 = vmatprep.subr.bf16.mxu1 %v9508_v24 }
 0x1a5   : > { %7701 = vmatpush3.bf16.msra.mxu0 %v8023_v60 }
 0x1a6   : > { %7721 = vmatpush3.bf16.msra.mxu1 %v8024_v61  ;;  %7726 = vmatprep.subr.bf16.mxu0 %v9508_v24 }
 0x1a7   : > { %7746 = vmatprep.subr.bf16.mxu1 %v9508_v24 }
 0x1a8   : > { %7703 = vmatmul.mubr.bf16.vlgmr.msra.gmra.mrb[24].mxu0 %v1782_v62 }
 0x1a9   : > { %7723 = vmatmul.mubr.bf16.vlgmr.msra.gmra.mrb[24].mxu1 %v1897_v0  ;;  %7727 = vmatpush3.bf16.msra.mxu0 %v8025_v63 }
 0x1aa   : > { %7747 = vmatpush3.bf16.msra.mxu1 %v8026_v2  ;;  %7728 = vmatprep.subr.bf16.mxu0 %v9508_v24 }
 0x1ab   : > { %7748 = vmatprep.subr.bf16.mxu1 %v9508_v24  ;;  %7742 = vmatprep.mubr.msk.bf16.mxu0 %vm9092_vm0, %v9508_v24 }
 0x1ac   : > { %7762 = vmatprep.mubr.msk.bf16.mxu1 %vm9092_vm0, %v9508_v24 }
 0x1ad   : > { %7729 = vmatpush3.bf16.msra.mxu0 %v8027_v3 }
 0x1ae   : > { %7749 = vmatpush3.bf16.msra.mxu1 %v8028_v4  ;;  %7730 = vmatprep.subr.bf16.mxu0 %v9508_v24 }
 0x1af   : > { %7750 = vmatprep.subr.bf16.mxu1 %v9508_v24 }
 0x1b1   : > { %7731 = vmatpush3.bf16.msra.mxu0 %v8029_v5 }
 0x1b2   : > { %7751 = vmatpush3.bf16.msra.mxu1 %v8030_v6  ;;  %7732 = vmatprep.subr.bf16.mxu0 %v9508_v24 }
 0x1b3   : > { %7752 = vmatprep.subr.bf16.mxu1 %v9508_v24 }
 0x1b5   : > { %7733 = vmatpush3.bf16.msra.mxu0 %v8031_v7 }
 0x1b6   : > { %7753 = vmatpush3.bf16.msra.mxu1 %v8032_v8  ;;  %7734 = vmatprep.subr.bf16.mxu0 %v9508_v24 }
 0x1b7   : > { %7754 = vmatprep.subr.bf16.mxu1 %v9508_v24 }
 0x1b9   : > { %7735 = vmatpush3.bf16.msra.mxu0 %v8033_v9 }
 0x1ba   : > { %7755 = vmatpush3.bf16.msra.mxu1 %v8034_v10  ;;  %7736 = vmatprep.subr.bf16.mxu0 %v9508_v24 }
 0x1bb   : > { %v508_v14 = vpop.f32.mrb[0].mxu0  ;;  %7756 = vmatprep.subr.bf16.mxu1 %v9508_v24 }
 0x1bc   : > { %v509_v15 = vadd.f32 %v9585_v11, %v508_v14  ;;  %v623_v16 = vpop.f32.mrb[0].mxu1  ;;  %v7464_v17 = vpop.f32.mrb[1].mxu0 }
 0x1bd   : > { %v624_v18 = vadd.f32 %v9585_v11, %v623_v16  ;;  %v7484_v19 = vpop.f32.mrb[1].mxu1  ;;  %v511_v20 = vpop.f32.mrb[2].mxu0  ;;  %7737 = vmatpush3.bf16.msra.mxu0 %v8035_v12 }
 0x1be   : > { %v514_v22 = vmax.f32 %v509_v15, 0.0  ;;  %v626_v23 = vpop.f32.mrb[2].mxu1  ;;  %7757 = vmatpush3.bf16.msra.mxu1 %v8036_v13  ;;  %v7465_v25 = vpop.f32.mrb[3].mxu0  ;;  %7738 = vmatprep.subr.bf16.mxu0 %v9508_v24 }
 0x1bf   : > { %v629_v27 = vmax.f32 %v624_v18, 0.0  ;;  %v7485_v28 = vpop.f32.mrb[3].mxu1  ;;  %7758 = vmatprep.subr.bf16.mxu1 %v9508_v24 }
 0x1c0   : > { %v515_v1 = vpack.c.bf16 %v514_v22, %v514_v22 }
 0x1c1   : > { %v630_v29 = vpack.c.bf16 %v629_v27, %v629_v27  ;;  %7739 = vmatpush3.bf16.msra.mxu0 %v8037_v21 }
 0x1c2   : > { %516 = vst [vmem:[#allocation2] sm:$0xf] %v515_v1  ;;  %7759 = vmatpush3.bf16.msra.mxu1 %v8038_v26  ;;  %7740 = vmatprep.subr.bf16.mxu0 %v9508_v24 }
 0x1c3   : > { %631 = vst [vmem:[#allocation2 + $0x4] sm:$0xf] %v630_v29  ;;  %7760 = vmatprep.subr.bf16.mxu1 %v9508_v24 }
 0x1c5   : > { %7741 = vmatpush3.bf16.msra.mxu0 %v8039_v30 }
 0x1c6   : > { %7761 = vmatpush3.bf16.msra.mxu1 %v8040_v31 }
 0x1c8   : > { %7743 = vmatmul.mubr.bf16.vlgmr.msra.gmra.mrb[28].mxu0 %v2012_v32 }
 0x1c9   : > { %7763 = vmatmul.mubr.bf16.vlgmr.msra.gmra.mrb[28].mxu1 %v2127_v33 }
 0x1db   : > { %v738_v34 = vpop.f32.mrb[4].mxu0 }
 0x1dc   : > { %v739_v35 = vadd.f32 %v9585_v11, %v738_v34  ;;  %v853_v36 = vpop.f32.mrb[4].mxu1  ;;  %v7504_v37 = vpop.f32.mrb[5].mxu0 }
 0x1dd   : > { %v854_v38 = vadd.f32 %v9585_v11, %v853_v36  ;;  %v7524_v24 = vpop.f32.mrb[5].mxu1  ;;  %v741_v39 = vpop.f32.mrb[6].mxu0 }
 0x1de   : > { %v744_v40 = vmax.f32 %v739_v35, 0.0  ;;  %v856_v41 = vpop.f32.mrb[6].mxu1  ;;  %v7505_v42 = vpop.f32.mrb[7].mxu0 }
 0x1df   : > { %v859_v43 = vmax.f32 %v854_v38, 0.0  ;;  %v7525_v44 = vpop.f32.mrb[7].mxu1 }
 0x1e0   : > { %v745_v45 = vpack.c.bf16 %v744_v40, %v744_v40 }
 0x1e1   : > { %v860_v46 = vpack.c.bf16 %v859_v43, %v859_v43 }
 0x1e2   : > { %746 = vst [vmem:[#allocation2 + $0x8] sm:$0xf] %v745_v45 }
 0x1e3   : > { %861 = vst [vmem:[#allocation2 + $0xc] sm:$0xf] %v860_v46 }
 0x1fb   : > { %v968_v47 = vpop.f32.mrb[8].mxu0 }
 0x1fc   : > { %v969_v48 = vadd.f32 %v9585_v11, %v968_v47  ;;  %v1083_v49 = vpop.f32.mrb[8].mxu1  ;;  %v7544_v50 = vpop.f32.mrb[9].mxu0 }
 0x1fd   : > { %v1084_v51 = vadd.f32 %v9585_v11, %v1083_v49  ;;  %v7564_v52 = vpop.f32.mrb[9].mxu1  ;;  %v971_v53 = vpop.f32.mrb[10].mxu0 }
 0x1fe   : > { %v974_v54 = vmax.f32 %v969_v48, 0.0  ;;  %v1086_v55 = vpop.f32.mrb[10].mxu1  ;;  %v7545_v56 = vpop.f32.mrb[11].mxu0 }
 0x1ff   : > { %v1089_v57 = vmax.f32 %v1084_v51, 0.0  ;;  %v7565_v58 = vpop.f32.mrb[11].mxu1 }
 0x200   : > { %v975_v59 = vpack.c.bf16 %v974_v54, %v974_v54 }
 0x201   : > { %v1090_v60 = vpack.c.bf16 %v1089_v57, %v1089_v57 }
 0x202   : > { %976 = vst [vmem:[#allocation2 + $0x10] sm:$0xf] %v975_v59 }
 0x203   : > { %1091 = vst [vmem:[#allocation2 + $0x14] sm:$0xf] %v1090_v60 }
 0x21b   : > { %v1198_v61 = vpop.f32.mrb[12].mxu0 }
 0x21c   : > { %v1199_v62 = vadd.f32 %v9585_v11, %v1198_v61  ;;  %v1313_v63 = vpop.f32.mrb[12].mxu1  ;;  %v7584_v0 = vpop.f32.mrb[13].mxu0 }
 0x21d   : > { %v1314_v2 = vadd.f32 %v9585_v11, %v1313_v63  ;;  %v7604_v3 = vpop.f32.mrb[13].mxu1  ;;  %v1201_v4 = vpop.f32.mrb[14].mxu0 }
 0x21e   : > { %v1204_v5 = vmax.f32 %v1199_v62, 0.0  ;;  %v1316_v6 = vpop.f32.mrb[14].mxu1  ;;  %v7585_v7 = vpop.f32.mrb[15].mxu0 }
 0x21f   : > { %v1319_v8 = vmax.f32 %v1314_v2, 0.0  ;;  %v7605_v9 = vpop.f32.mrb[15].mxu1 }
 0x220   : > { %v1205_v10 = vpack.c.bf16 %v1204_v5, %v1204_v5 }
 0x221   : > { %v1320_v12 = vpack.c.bf16 %v1319_v8, %v1319_v8 }
 0x222   : > { %1206 = vst [vmem:[#allocation2 + $0x18] sm:$0xf] %v1205_v10 }
 0x223   : > { %1321 = vst [vmem:[#allocation2 + $0x1c] sm:$0xf] %v1320_v12 }
 0x23b   : > { %v1428_v13 = vpop.f32.mrb[16].mxu0 }
 0x23c   : > { %v1429_v14 = vadd.f32 %v9585_v11, %v1428_v13  ;;  %v1543_v15 = vpop.f32.mrb[16].mxu1  ;;  %v7624_v16 = vpop.f32.mrb[17].mxu0 }
 0x23d   : > { %v1544_v17 = vadd.f32 %v9585_v11, %v1543_v15  ;;  %v7644_v18 = vpop.f32.mrb[17].mxu1  ;;  %v1431_v19 = vpop.f32.mrb[18].mxu0 }
 0x23e   : > { %v1434_v20 = vmax.f32 %v1429_v14, 0.0  ;;  %v1546_v21 = vpop.f32.mrb[18].mxu1  ;;  %v7625_v22 = vpop.f32.mrb[19].mxu0 }
 0x23f   : > { %v1549_v23 = vmax.f32 %v1544_v17, 0.0  ;;  %v7645_v25 = vpop.f32.mrb[19].mxu1 }
 0x240   : > { %v1435_v26 = vpack.c.bf16 %v1434_v20, %v1434_v20 }
 0x241   : > { %v1550_v27 = vpack.c.bf16 %v1549_v23, %v1549_v23 }
 0x242   : > { %1436 = vst [vmem:[#allocation2 + $0x20] sm:$0xf] %v1435_v26 }
 0x243   : > { %1551 = vst [vmem:[#allocation2 + $0x24] sm:$0xf] %v1550_v27 }
 0x25b   : > { %v1658_v28 = vpop.f32.mrb[20].mxu0 }
 0x25c   : > { %v1659_v1 = vadd.f32 %v9585_v11, %v1658_v28  ;;  %v1773_v29 = vpop.f32.mrb[20].mxu1  ;;  %v7664_v30 = vpop.f32.mrb[21].mxu0 }
 0x25d   : > { %v1774_v31 = vadd.f32 %v9585_v11, %v1773_v29  ;;  %v7684_v32 = vpop.f32.mrb[21].mxu1  ;;  %v1661_v33 = vpop.f32.mrb[22].mxu0 }
 0x25e   : > { %v1664_v34 = vmax.f32 %v1659_v1, 0.0  ;;  %v1776_v35 = vpop.f32.mrb[22].mxu1  ;;  %v7665_v36 = vpop.f32.mrb[23].mxu0 }
 0x25f   : > { %v1779_v37 = vmax.f32 %v1774_v31, 0.0  ;;  %v7685_v38 = vpop.f32.mrb[23].mxu1 }
 0x260   : > { %v1665_v24 = vpack.c.bf16 %v1664_v34, %v1664_v34 }
 0x261   : > { %v1780_v39 = vpack.c.bf16 %v1779_v37, %v1779_v37 }
 0x262   : > { %1666 = vst [vmem:[#allocation2 + $0x28] sm:$0xf] %v1665_v24 }
 0x263   : > { %1781 = vst [vmem:[#allocation2 + $0x2c] sm:$0xf] %v1780_v39 }
 0x27b   : > { %v1888_v40 = vpop.f32.mrb[24].mxu0 }
 0x27c   : > { %v1889_v41 = vadd.f32 %v9585_v11, %v1888_v40  ;;  %v2003_v42 = vpop.f32.mrb[24].mxu1  ;;  %v7704_v43 = vpop.f32.mrb[25].mxu0 }
 0x27d   : > { %v2004_v44 = vadd.f32 %v9585_v11, %v2003_v42  ;;  %v7724_v45 = vpop.f32.mrb[25].mxu1  ;;  %v1891_v46 = vpop.f32.mrb[26].mxu0 }
 0x27e   : > { %v1894_v47 = vmax.f32 %v1889_v41, 0.0  ;;  %v2006_v48 = vpop.f32.mrb[26].mxu1  ;;  %v7705_v49 = vpop.f32.mrb[27].mxu0 }
 0x27f   : > { %v2009_v50 = vmax.f32 %v2004_v44, 0.0  ;;  %v7725_v51 = vpop.f32.mrb[27].mxu1 }
 0x280   : > { %v1895_v52 = vpack.c.bf16 %v1894_v47, %v1894_v47 }
 0x281   : > { %v2010_v53 = vpack.c.bf16 %v2009_v50, %v2009_v50 }
 0x282   : > { %1896 = vst [vmem:[#allocation2 + $0x30] sm:$0xf] %v1895_v52 }
 0x283   : > { %2011 = vst [vmem:[#allocation2 + $0x34] sm:$0xf] %v2010_v53 }
 0x29b   : > { %v2118_v54 = vpop.f32.mrb[28].mxu0 }
 0x29c   : > { %v2119_v55 = vadd.f32 %v9585_v11, %v2118_v54  ;;  %v2233_v56 = vpop.f32.mrb[28].mxu1  ;;  %v7744_v57 = vpop.f32.mrb[29].mxu0 }
 0x29d   : > { %v2234_v58 = vadd.f32 %v9585_v11, %v2233_v56  ;;  %v7764_v59 = vpop.f32.mrb[29].mxu1  ;;  %v2121_v60 = vpop.f32.mrb[30].mxu0 }
 0x29e   : > { %v2124_v61 = vmax.f32 %v2119_v55, 0.0  ;;  %v2236_v62 = vpop.f32.mrb[30].mxu1  ;;  %v7745_v63 = vpop.f32.mrb[31].mxu0 }
 0x29f   : > { %v2239_v0 = vmax.f32 %v2234_v58, 0.0  ;;  %v7765_v2 = vpop.f32.mrb[31].mxu1 }
 0x2a0   : > { %v2125_v3 = vpack.c.bf16 %v2124_v61, %v2124_v61 }
 0x2a1   : > { %v2240_v4 = vpack.c.bf16 %v2239_v0, %v2239_v0 }
 0x2a2   : > { %2126 = vst [vmem:[#allocation2 + $0x38] sm:$0xf] %v2125_v3 }
 0x2a3   : > { %2241 = vst [vmem:[#allocation2 + $0x3c] sm:$0xf] %v2240_v4 }
 0x2a4 PF: > { %v8042_v11 = vld [vmem:[%s9370_s7 + $0x4] ss:$16 sps:$4 sm:$0xff]   ;;  %v8044_v5 = vld [vmem:[%s9370_s7 + $0xc] ss:$16 sps:$4 sm:$0xff]   ;;  %v8046_v6 = vld [vmem:[%s9370_s7] ss:$16 sps:$4 sm:$0xff]  }
 0x2a5   : > { %5400 = vmatprep.subr.bf16.mxu0 %v8042_v11  ;;  %v8047_v7 = vld [vmem:[%s9370_s7 + $0x8] ss:$16 sps:$4 sm:$0xff]   ;;  %5728 = vmatprep.subr.bf16.mxu1 %v8044_v5  ;;  %v8048_v8 = vld [vmem:[%s9370_s7 + $0x24] ss:$16 sps:$4 sm:$0xff]   ;;  %v8050_v9 = vld [vmem:[%s9370_s7 + $0x2c] ss:$16 sps:$4 sm:$0xff]  }
 0x2a6   : > { %5401 = vmatpush1.bf16.msra.mxu0 %v8046_v6  ;;  %5729 = vmatpush1.bf16.msra.mxu1 %v8047_v7  ;;  %v8052_v10 = vld [vmem:[%s9370_s7 + $0x20] ss:$16 sps:$4 sm:$0xff]   ;;  %v8053_v12 = vld [vmem:[%s9370_s7 + $0x28] ss:$16 sps:$4 sm:$0xff]   ;;  %v8054_v13 = vld [vmem:[%s9370_s7 + $0x44] ss:$16 sps:$4 sm:$0xff]  }
 0x2a7   : > { %5402 = vmatprep.subr.bf16.mxu0 %v8048_v8  ;;  %5730 = vmatprep.subr.bf16.mxu1 %v8050_v9  ;;  %v8056_v14 = vld [vmem:[%s9370_s7 + $0x4c] ss:$16 sps:$4 sm:$0xff]   ;;  %v8058_v15 = vld [vmem:[%s9370_s7 + $0x40] ss:$16 sps:$4 sm:$0xff]   ;;  %v8059_v16 = vld [vmem:[%s9370_s7 + $0x48] ss:$16 sps:$4 sm:$0xff]  }
 0x2a8   : > { %v8060_v17 = vld [vmem:[%s9370_s7 + $0x64] ss:$16 sps:$4 sm:$0xff]   ;;  %v8062_v18 = vld [vmem:[%s9370_s7 + $0x6c] ss:$16 sps:$4 sm:$0xff]   ;;  %v8064_v19 = vld [vmem:[%s9370_s7 + $0x60] ss:$16 sps:$4 sm:$0xff]  }
 0x2a9   : > { %v8065_v20 = vld [vmem:[%s9370_s7 + $0x68] ss:$16 sps:$4 sm:$0xff]   ;;  %v8066_v21 = vld [vmem:[%s9370_s7 + $0x84] ss:$16 sps:$4 sm:$0xff]   ;;  %v8068_v22 = vld [vmem:[%s9370_s7 + $0x8c] ss:$16 sps:$4 sm:$0xff]  }
 0x2aa   : > { %5403 = vmatpush1.bf16.msra.mxu0 %v8052_v10  ;;  %5731 = vmatpush1.bf16.msra.mxu1 %v8053_v12  ;;  %v8070_v23 = vld [vmem:[%s9370_s7 + $0x80] ss:$16 sps:$4 sm:$0xff]   ;;  %v8071_v25 = vld [vmem:[%s9370_s7 + $0x88] ss:$16 sps:$4 sm:$0xff]   ;;  %v8072_v26 = vld [vmem:[%s9370_s7 + $0xa4] ss:$16 sps:$4 sm:$0xff]  }
 0x2ab   : > { %5404 = vmatprep.subr.bf16.mxu0 %v8054_v13  ;;  %5732 = vmatprep.subr.bf16.mxu1 %v8056_v14  ;;  %v8074_v27 = vld [vmem:[%s9370_s7 + $0xac] ss:$16 sps:$4 sm:$0xff]   ;;  %v8076_v28 = vld [vmem:[%s9370_s7 + $0xa0] ss:$16 sps:$4 sm:$0xff]   ;;  %v8077_v1 = vld [vmem:[%s9370_s7 + $0xa8] ss:$16 sps:$4 sm:$0xff]  }
 0x2ac   : > { %v8078_v29 = vld [vmem:[%s9370_s7 + $0xc4] ss:$16 sps:$4 sm:$0xff]   ;;  %v8080_v30 = vld [vmem:[%s9370_s7 + $0xcc] ss:$16 sps:$4 sm:$0xff]   ;;  %v8082_v31 = vld [vmem:[%s9370_s7 + $0xc0] ss:$16 sps:$4 sm:$0xff]  }
 0x2ad   : > { %v8083_v32 = vld [vmem:[%s9370_s7 + $0xc8] ss:$16 sps:$4 sm:$0xff]   ;;  %v8084_v33 = vld [vmem:[%s9370_s7 + $0xe4] ss:$16 sps:$4 sm:$0xff]   ;;  %v8086_v34 = vld [vmem:[%s9370_s7 + $0xec] ss:$16 sps:$4 sm:$0xff]  }
 0x2ae   : > { %5405 = vmatpush1.bf16.msra.mxu0 %v8058_v15  ;;  %5733 = vmatpush1.bf16.msra.mxu1 %v8059_v16  ;;  %v8088_v35 = vld [vmem:[%s9370_s7 + $0xe0] ss:$16 sps:$4 sm:$0xff]   ;;  %v8089_v36 = vld [vmem:[%s9370_s7 + $0xe8] ss:$16 sps:$4 sm:$0xff]   ;;  %v8090_v37 = vld [vmem:[%s9370_s7 + $0x104] ss:$16 sps:$4 sm:$0xff]  }
 0x2af   : > { %5406 = vmatprep.subr.bf16.mxu0 %v8060_v17  ;;  %5734 = vmatprep.subr.bf16.mxu1 %v8062_v18  ;;  %v8092_v38 = vld [vmem:[%s9370_s7 + $0x10c] ss:$16 sps:$4 sm:$0xff]   ;;  %v8094_v24 = vld [vmem:[%s9370_s7 + $0x100] ss:$16 sps:$4 sm:$0xff]   ;;  %v8095_v39 = vld [vmem:[%s9370_s7 + $0x108] ss:$16 sps:$4 sm:$0xff]  }
 0x2b0   : > { %v8096_v40 = vld [vmem:[%s9370_s7 + $0x124] ss:$16 sps:$4 sm:$0xff]   ;;  %v8098_v41 = vld [vmem:[%s9370_s7 + $0x12c] ss:$16 sps:$4 sm:$0xff]   ;;  %v8100_v42 = vld [vmem:[%s9370_s7 + $0x120] ss:$16 sps:$4 sm:$0xff]  }
 0x2b1   : > { %v8101_v43 = vld [vmem:[%s9370_s7 + $0x128] ss:$16 sps:$4 sm:$0xff]   ;;  %v8102_v44 = vld [vmem:[%s9370_s7 + $0x144] ss:$16 sps:$4 sm:$0xff]   ;;  %v8104_v45 = vld [vmem:[%s9370_s7 + $0x14c] ss:$16 sps:$4 sm:$0xff]  }
 0x2b2   : > { %5407 = vmatpush1.bf16.msra.mxu0 %v8064_v19  ;;  %5735 = vmatpush1.bf16.msra.mxu1 %v8065_v20  ;;  %v8106_v46 = vld [vmem:[%s9370_s7 + $0x140] ss:$16 sps:$4 sm:$0xff]   ;;  %v8107_v47 = vld [vmem:[%s9370_s7 + $0x148] ss:$16 sps:$4 sm:$0xff]   ;;  %v8108_v48 = vld [vmem:[%s9370_s7 + $0x164] ss:$16 sps:$4 sm:$0xff]  }
 0x2b3   : > { %5408 = vmatprep.subr.bf16.mxu0 %v8066_v21  ;;  %5736 = vmatprep.subr.bf16.mxu1 %v8068_v22  ;;  %v8110_v49 = vld [vmem:[%s9370_s7 + $0x16c] ss:$16 sps:$4 sm:$0xff]   ;;  %v8112_v51 = vld [vmem:[%s9370_s7 + $0x160] ss:$16 sps:$4 sm:$0xff]   ;;  %v8113_v53 = vld [vmem:[%s9370_s7 + $0x168] ss:$16 sps:$4 sm:$0xff]  }
 0x2b4   : > { %v2242_v50 = vld [vmem:[#allocation2] sm:$0xff]  ;;  %v8118_v56 = vld [vmem:[%s9370_s7 + $0x180] ss:$16 sps:$4 sm:$0xff]   ;;  %p7251_p2 = scmp.ne.s32.totalorder %s9152_s28, 1 }
 0x2b5   : > { %v6692_v52 = vcombine.high %v2242_v50, %v2242_v50  ;;  %v8114_v54 = vld [vmem:[%s9370_s7 + $0x184] ss:$16 sps:$4 sm:$0xff]   ;;  %v8116_v55 = vld [vmem:[%s9370_s7 + $0x18c] ss:$16 sps:$4 sm:$0xff]   ;;  %v8119_v57 = vld [vmem:[%s9370_s7 + $0x188] ss:$16 sps:$4 sm:$0xff]   ;;  %v6691_v8 = vcombine.low %v2242_v50, %v2242_v50 }
 0x2b6   : > { %5409 = vmatpush1.bf16.msra.mxu0 %v8070_v23  ;;  %5737 = vmatpush1.bf16.msra.mxu1 %v8071_v25  ;;  %v8120_v58 = vld [vmem:[%s9370_s7 + $0x1a4] ss:$16 sps:$4 sm:$0xff]   ;;  %v8122_v59 = vld [vmem:[%s9370_s7 + $0x1ac] ss:$16 sps:$4 sm:$0xff]   ;;  %v8124_v60 = vld [vmem:[%s9370_s7 + $0x1a0] ss:$16 sps:$4 sm:$0xff]  }
 0x2b7   : > { %5410 = vmatprep.subr.bf16.mxu0 %v8072_v26  ;;  %5738 = vmatprep.subr.bf16.mxu1 %v8074_v27  ;;  %v8125_v61 = vld [vmem:[%s9370_s7 + $0x1a8] ss:$16 sps:$4 sm:$0xff]   ;;  %v8126_v62 = vld [vmem:[%s9370_s7 + $0x1c4] ss:$16 sps:$4 sm:$0xff]   ;;  %v8128_v63 = vld [vmem:[%s9370_s7 + $0x1cc] ss:$16 sps:$4 sm:$0xff]  }
 0x2b8   : > { %5432 = vmatprep.mubr.bf16.mxu0 %v6692_v52  ;;  %5760 = vmatprep.mubr.bf16.mxu1 %v6692_v52  ;;  %v8130_v0 = vld [vmem:[%s9370_s7 + $0x1c0] ss:$16 sps:$4 sm:$0xff]   ;;  %v8131_v2 = vld [vmem:[%s9370_s7 + $0x1c8] ss:$16 sps:$4 sm:$0xff]   ;;  %v8132_v3 = vld [vmem:[%s9370_s7 + $0x1e4] ss:$16 sps:$4 sm:$0xff]  }
 0x2b9   : > { %v8134_v4 = vld [vmem:[%s9370_s7 + $0x1ec] ss:$16 sps:$4 sm:$0xff]   ;;  %v8136_v11 = vld [vmem:[%s9370_s7 + $0x1e0] ss:$16 sps:$4 sm:$0xff]   ;;  %v8137_v5 = vld [vmem:[%s9370_s7 + $0x1e8] ss:$16 sps:$4 sm:$0xff]  }
 0x2ba   : > { %5411 = vmatpush1.bf16.msra.mxu0 %v8076_v28  ;;  %5739 = vmatpush1.bf16.msra.mxu1 %v8077_v1  ;;  %v8142_v6 = vld [vmem:[%s9370_s7 + $0x204] ss:$16 sps:$4 sm:$0xff]   ;;  %v8145_v7 = vld [vmem:[%s9370_s7 + $0x20c] ss:$16 sps:$4 sm:$0xff]   ;;  %v8140_v9 = vld [vmem:[%s9370_s7 + $0x200] ss:$16 sps:$4 sm:$0xff]  }
 0x2bb   : > { %5412 = vmatprep.subr.bf16.mxu0 %v8078_v29  ;;  %5740 = vmatprep.subr.bf16.mxu1 %v8080_v30  ;;  %v8143_v10 = vld [vmem:[%s9370_s7 + $0x208] ss:$16 sps:$4 sm:$0xff]   ;;  %v8148_v12 = vld [vmem:[%s9370_s7 + $0x224] ss:$16 sps:$4 sm:$0xff]   ;;  %v8151_v13 = vld [vmem:[%s9370_s7 + $0x22c] ss:$16 sps:$4 sm:$0xff]  }
 0x2bc   : > { %v8146_v14 = vld [vmem:[%s9370_s7 + $0x220] ss:$16 sps:$4 sm:$0xff]   ;;  %v8149_v15 = vld [vmem:[%s9370_s7 + $0x228] ss:$16 sps:$4 sm:$0xff]   ;;  %v8154_v16 = vld [vmem:[%s9370_s7 + $0x244] ss:$16 sps:$4 sm:$0xff]  }
 0x2bd   : > { %v8157_v17 = vld [vmem:[%s9370_s7 + $0x24c] ss:$16 sps:$4 sm:$0xff]   ;;  %v8152_v18 = vld [vmem:[%s9370_s7 + $0x240] ss:$16 sps:$4 sm:$0xff]   ;;  %v8155_v19 = vld [vmem:[%s9370_s7 + $0x248] ss:$16 sps:$4 sm:$0xff]  }
 0x2be   : > { %5413 = vmatpush1.bf16.msra.mxu0 %v8082_v31  ;;  %5741 = vmatpush1.bf16.msra.mxu1 %v8083_v32  ;;  %v8160_v20 = vld [vmem:[%s9370_s7 + $0x264] ss:$16 sps:$4 sm:$0xff]   ;;  %v8163_v21 = vld [vmem:[%s9370_s7 + $0x26c] ss:$16 sps:$4 sm:$0xff]   ;;  %v8158_v22 = vld [vmem:[%s9370_s7 + $0x260] ss:$16 sps:$4 sm:$0xff]  }
 0x2bf   : > { %5414 = vmatprep.subr.bf16.mxu0 %v8084_v33  ;;  %5742 = vmatprep.subr.bf16.mxu1 %v8086_v34  ;;  %v8161_v23 = vld [vmem:[%s9370_s7 + $0x268] ss:$16 sps:$4 sm:$0xff]   ;;  %v8166_v25 = vld [vmem:[%s9370_s7 + $0x284] ss:$16 sps:$4 sm:$0xff]   ;;  %v8169_v26 = vld [vmem:[%s9370_s7 + $0x28c] ss:$16 sps:$4 sm:$0xff]  }
 0x2c0   : > { %v8164_v27 = vld [vmem:[%s9370_s7 + $0x280] ss:$16 sps:$4 sm:$0xff]   ;;  %v8167_v28 = vld [vmem:[%s9370_s7 + $0x288] ss:$16 sps:$4 sm:$0xff]   ;;  %v8172_v1 = vld [vmem:[%s9370_s7 + $0x2a4] ss:$16 sps:$4 sm:$0xff]  }
 0x2c1   : > { %v8175_v29 = vld [vmem:[%s9370_s7 + $0x2ac] ss:$16 sps:$4 sm:$0xff]   ;;  %v8170_v30 = vld [vmem:[%s9370_s7 + $0x2a0] ss:$16 sps:$4 sm:$0xff]   ;;  %v8173_v31 = vld [vmem:[%s9370_s7 + $0x2a8] ss:$16 sps:$4 sm:$0xff]  }
 0x2c2   : > { %5415 = vmatpush1.bf16.msra.mxu0 %v8088_v35  ;;  %5743 = vmatpush1.bf16.msra.mxu1 %v8089_v36  ;;  %v8178_v32 = vld [vmem:[%s9370_s7 + $0x2c4] ss:$16 sps:$4 sm:$0xff]   ;;  %v8181_v33 = vld [vmem:[%s9370_s7 + $0x2cc] ss:$16 sps:$4 sm:$0xff]   ;;  %v8176_v36 = vld [vmem:[%s9370_s7 + $0x2c0] ss:$16 sps:$4 sm:$0xff]  }
 0x2c3   : > { %5416 = vmatprep.subr.bf16.mxu0 %v8090_v37  ;;  %5744 = vmatprep.subr.bf16.mxu1 %v8092_v38  ;;  %v9705_v34 = vld [vmem:[#allocation2 + $0x8] sm:$0xff]  ;;  %v8179_v37 = vld [vmem:[%s9370_s7 + $0x2c8] ss:$16 sps:$4 sm:$0xff]  }
 0x2c4   : > { %v6694_v35 = vcombine.high %v9705_v34, %v9705_v34  ;;  %v8184_v38 = vld [vmem:[%s9370_s7 + $0x2e4] ss:$16 sps:$4 sm:$0xff]   ;;  %v8205_v50 = vld [vmem:[%s9370_s7 + $0x34c] ss:$16 sps:$4 sm:$0xff]   ;;  %v8203_v52 = vld [vmem:[%s9370_s7 + $0x348] ss:$16 sps:$4 sm:$0xff]  }
 0x2c6   : > { %5417 = vmatpush1.bf16.msra.mxu0 %v8094_v24  ;;  %5745 = vmatpush1.bf16.msra.mxu1 %v8095_v39  ;;  %v8187_v24 = vld [vmem:[%s9370_s7 + $0x2ec] ss:$16 sps:$4 sm:$0xff]   ;;  %v8182_v39 = vld [vmem:[%s9370_s7 + $0x2e0] ss:$16 sps:$4 sm:$0xff]  }
 0x2c7   : > { %5418 = vmatprep.subr.bf16.mxu0 %v8096_v40  ;;  %5746 = vmatprep.subr.bf16.mxu1 %v8098_v41  ;;  %v8185_v40 = vld [vmem:[%s9370_s7 + $0x2e8] ss:$16 sps:$4 sm:$0xff]   ;;  %v8190_v41 = vld [vmem:[%s9370_s7 + $0x304] ss:$16 sps:$4 sm:$0xff]  }
 0x2ca   : > { %5419 = vmatpush1.bf16.msra.mxu0 %v8100_v42  ;;  %5747 = vmatpush1.bf16.msra.mxu1 %v8101_v43  ;;  %v8193_v42 = vld [vmem:[%s9370_s7 + $0x30c] ss:$16 sps:$4 sm:$0xff]   ;;  %v8188_v43 = vld [vmem:[%s9370_s7 + $0x300] ss:$16 sps:$4 sm:$0xff]  }
 0x2cb   : > { %5420 = vmatprep.subr.bf16.mxu0 %v8102_v44  ;;  %5748 = vmatprep.subr.bf16.mxu1 %v8104_v45  ;;  %v8191_v44 = vld [vmem:[%s9370_s7 + $0x308] ss:$16 sps:$4 sm:$0xff]   ;;  %v8196_v45 = vld [vmem:[%s9370_s7 + $0x324] ss:$16 sps:$4 sm:$0xff]  }
 0x2ce   : > { %5421 = vmatpush1.bf16.msra.mxu0 %v8106_v46  ;;  %5749 = vmatpush1.bf16.msra.mxu1 %v8107_v47  ;;  %v8199_v46 = vld [vmem:[%s9370_s7 + $0x32c] ss:$16 sps:$4 sm:$0xff]   ;;  %v8194_v47 = vld [vmem:[%s9370_s7 + $0x320] ss:$16 sps:$4 sm:$0xff]  }
 0x2cf   : > { %5422 = vmatprep.subr.bf16.mxu0 %v8108_v48  ;;  %5750 = vmatprep.subr.bf16.mxu1 %v8110_v49  ;;  %v8197_v48 = vld [vmem:[%s9370_s7 + $0x328] ss:$16 sps:$4 sm:$0xff]   ;;  %v8202_v49 = vld [vmem:[%s9370_s7 + $0x344] ss:$16 sps:$4 sm:$0xff]  }
 0x2d2   : > { %5423 = vmatpush1.bf16.msra.mxu0 %v8112_v51  ;;  %5751 = vmatpush1.bf16.msra.mxu1 %v8113_v53  ;;  %v8200_v51 = vld [vmem:[%s9370_s7 + $0x340] ss:$16 sps:$4 sm:$0xff]   ;;  %v8208_v53 = vld [vmem:[%s9370_s7 + $0x364] ss:$16 sps:$4 sm:$0xff]  }
 0x2d3   : > { %5424 = vmatprep.subr.bf16.mxu0 %v8114_v54  ;;  %5752 = vmatprep.subr.bf16.mxu1 %v8116_v55  ;;  %v8211_v54 = vld [vmem:[%s9370_s7 + $0x36c] ss:$16 sps:$4 sm:$0xff]   ;;  %v8206_v55 = vld [vmem:[%s9370_s7 + $0x360] ss:$16 sps:$4 sm:$0xff]  }
 0x2d6   : > { %5425 = vmatpush1.bf16.msra.mxu0 %v8118_v56  ;;  %5753 = vmatpush1.bf16.msra.mxu1 %v8119_v57  ;;  %v8209_v56 = vld [vmem:[%s9370_s7 + $0x368] ss:$16 sps:$4 sm:$0xff]   ;;  %v8214_v57 = vld [vmem:[%s9370_s7 + $0x384] ss:$16 sps:$4 sm:$0xff]  }
 0x2d7   : > { %5426 = vmatprep.subr.bf16.mxu0 %v8120_v58  ;;  %5754 = vmatprep.subr.bf16.mxu1 %v8122_v59  ;;  %v8217_v58 = vld [vmem:[%s9370_s7 + $0x38c] ss:$16 sps:$4 sm:$0xff]   ;;  %v8212_v59 = vld [vmem:[%s9370_s7 + $0x380] ss:$16 sps:$4 sm:$0xff]  }
 0x2da   : > { %5427 = vmatpush1.bf16.msra.mxu0 %v8124_v60  ;;  %5755 = vmatpush1.bf16.msra.mxu1 %v8125_v61  ;;  %v8215_v60 = vld [vmem:[%s9370_s7 + $0x388] ss:$16 sps:$4 sm:$0xff]   ;;  %v8220_v61 = vld [vmem:[%s9370_s7 + $0x3a4] ss:$16 sps:$4 sm:$0xff]  }
 0x2db   : > { %5428 = vmatprep.subr.bf16.mxu0 %v8126_v62  ;;  %5756 = vmatprep.subr.bf16.mxu1 %v8128_v63  ;;  %v8223_v62 = vld [vmem:[%s9370_s7 + $0x3ac] ss:$16 sps:$4 sm:$0xff]   ;;  %v8218_v63 = vld [vmem:[%s9370_s7 + $0x3a0] ss:$16 sps:$4 sm:$0xff]  }
 0x2de   : > { %5429 = vmatpush1.bf16.msra.mxu0 %v8130_v0  ;;  %5757 = vmatpush1.bf16.msra.mxu1 %v8131_v2  ;;  %v8221_v0 = vld [vmem:[%s9370_s7 + $0x3a8] ss:$16 sps:$4 sm:$0xff]   ;;  %v8226_v2 = vld [vmem:[%s9370_s7 + $0x3c4] ss:$16 sps:$4 sm:$0xff]  }
 0x2df   : > { %5430 = vmatprep.subr.bf16.mxu0 %v8132_v3  ;;  %5758 = vmatprep.subr.bf16.mxu1 %v8134_v4  ;;  %v8229_v3 = vld [vmem:[%s9370_s7 + $0x3cc] ss:$16 sps:$4 sm:$0xff]   ;;  %v8224_v4 = vld [vmem:[%s9370_s7 + $0x3c0] ss:$16 sps:$4 sm:$0xff]  }
 0x2e2   : > { %5431 = vmatpush1.bf16.msra.mxu0 %v8136_v11  ;;  %5759 = vmatpush1.bf16.msra.mxu1 %v8137_v5  ;;  %v8227_v11 = vld [vmem:[%s9370_s7 + $0x3c8] ss:$16 sps:$4 sm:$0xff]   ;;  %v8232_v5 = vld [vmem:[%s9370_s7 + $0x3e4] ss:$16 sps:$4 sm:$0xff]  }
 0x2e3   : > { %5441 = vmatprep.subr.bf16.mxu0 %v8142_v6  ;;  %5769 = vmatprep.subr.bf16.mxu1 %v8145_v7  ;;  %v8235_v6 = vld [vmem:[%s9370_s7 + $0x3ec] ss:$16 sps:$4 sm:$0xff]   ;;  %v8230_v7 = vld [vmem:[%s9370_s7 + $0x3e0] ss:$16 sps:$4 sm:$0xff]  }
 0x2e5   : > { %5433 = vmatmul.mubr.bf16.vlgmr.msra.gmra.mrb[0].mxu0 %v6691_v8  ;;  %5761 = vmatmul.mubr.bf16.vlgmr.msra.gmra.mrb[0].mxu1 %v6691_v8  ;;  %v8233_v8 = vld [vmem:[%s9370_s7 + $0x3e8] ss:$16 sps:$4 sm:$0xff]  }
 0x2e6   : > { %5442 = vmatpush1.bf16.msra.mxu0 %v8140_v9  ;;  %5770 = vmatpush1.bf16.msra.mxu1 %v8143_v10  ;;  %v8240_v9 = vld [vmem:[%s9370_s7 + $0x404] ss:$16 sps:$4 sm:$0xff]   ;;  %v8243_v10 = vld [vmem:[%s9370_s7 + $0x40c] ss:$16 sps:$4 sm:$0xff]  }
 0x2e7   : > { %5443 = vmatprep.subr.bf16.mxu0 %v8148_v12  ;;  %5771 = vmatprep.subr.bf16.mxu1 %v8151_v13  ;;  %v6693_v12 = vcombine.low %v9705_v34, %v9705_v34  ;;  %v8238_v13 = vld [vmem:[%s9370_s7 + $0x400] ss:$16 sps:$4 sm:$0xff]   ;;  %v8273_v34 = vld [vmem:[%s9370_s7 + $0x4ac] ss:$16 sps:$4 sm:$0xff]  }
 0x2e8   : > { %5473 = vmatprep.mubr.bf16.mxu0 %v6694_v35  ;;  %5801 = vmatprep.mubr.bf16.mxu1 %v6694_v35  ;;  %v8268_v35 = vld [vmem:[%s9370_s7 + $0x4a0] ss:$16 sps:$4 sm:$0xff]  }
 0x2ea   : > { %5444 = vmatpush1.bf16.msra.mxu0 %v8146_v14  ;;  %5772 = vmatpush1.bf16.msra.mxu1 %v8149_v15  ;;  %v8241_v14 = vld [vmem:[%s9370_s7 + $0x408] ss:$16 sps:$4 sm:$0xff]   ;;  %v8246_v15 = vld [vmem:[%s9370_s7 + $0x424] ss:$16 sps:$4 sm:$0xff]  }
 0x2eb   : > { %5445 = vmatprep.subr.bf16.mxu0 %v8154_v16  ;;  %5773 = vmatprep.subr.bf16.mxu1 %v8157_v17  ;;  %v9754_v16 = vld [vmem:[#allocation2 + $0x10] sm:$0xff] }
 0x2ec   : > { %v8249_v17 = vld [vmem:[%s9370_s7 + $0x42c] ss:$16 sps:$4 sm:$0xff]  }
 0x2ee   : > { %5446 = vmatpush1.bf16.msra.mxu0 %v8152_v18  ;;  %5774 = vmatpush1.bf16.msra.mxu1 %v8155_v19  ;;  %v6696_v18 = vcombine.high %v9754_v16, %v9754_v16  ;;  %v8244_v19 = vld [vmem:[%s9370_s7 + $0x420] ss:$16 sps:$4 sm:$0xff]  }
 0x2ef   : > { %5447 = vmatprep.subr.bf16.mxu0 %v8160_v20  ;;  %5775 = vmatprep.subr.bf16.mxu1 %v8163_v21  ;;  %v8247_v20 = vld [vmem:[%s9370_s7 + $0x428] ss:$16 sps:$4 sm:$0xff]   ;;  %v8252_v21 = vld [vmem:[%s9370_s7 + $0x444] ss:$16 sps:$4 sm:$0xff]  }
 0x2f2   : > { %5448 = vmatpush1.bf16.msra.mxu0 %v8158_v22  ;;  %5776 = vmatpush1.bf16.msra.mxu1 %v8161_v23  ;;  %v8255_v22 = vld [vmem:[%s9370_s7 + $0x44c] ss:$16 sps:$4 sm:$0xff]   ;;  %v8250_v23 = vld [vmem:[%s9370_s7 + $0x440] ss:$16 sps:$4 sm:$0xff]  }
 0x2f3   : > { %5449 = vmatprep.subr.bf16.mxu0 %v8166_v25  ;;  %5777 = vmatprep.subr.bf16.mxu1 %v8169_v26  ;;  %v8253_v25 = vld [vmem:[%s9370_s7 + $0x448] ss:$16 sps:$4 sm:$0xff]   ;;  %v8258_v26 = vld [vmem:[%s9370_s7 + $0x464] ss:$16 sps:$4 sm:$0xff]  }
 0x2f6   : > { %5450 = vmatpush1.bf16.msra.mxu0 %v8164_v27  ;;  %5778 = vmatpush1.bf16.msra.mxu1 %v8167_v28  ;;  %v8261_v27 = vld [vmem:[%s9370_s7 + $0x46c] ss:$16 sps:$4 sm:$0xff]   ;;  %v8256_v28 = vld [vmem:[%s9370_s7 + $0x460] ss:$16 sps:$4 sm:$0xff]  }
 0x2f7   : > { %5451 = vmatprep.subr.bf16.mxu0 %v8172_v1  ;;  %5779 = vmatprep.subr.bf16.mxu1 %v8175_v29  ;;  %v8259_v1 = vld [vmem:[%s9370_s7 + $0x468] ss:$16 sps:$4 sm:$0xff]   ;;  %v8264_v29 = vld [vmem:[%s9370_s7 + $0x484] ss:$16 sps:$4 sm:$0xff]  }
 0x2fa   : > { %5452 = vmatpush1.bf16.msra.mxu0 %v8170_v30  ;;  %5780 = vmatpush1.bf16.msra.mxu1 %v8173_v31  ;;  %v8267_v30 = vld [vmem:[%s9370_s7 + $0x48c] ss:$16 sps:$4 sm:$0xff]   ;;  %v8262_v31 = vld [vmem:[%s9370_s7 + $0x480] ss:$16 sps:$4 sm:$0xff]  }
 0x2fb   : > { %5453 = vmatprep.subr.bf16.mxu0 %v8178_v32  ;;  %5781 = vmatprep.subr.bf16.mxu1 %v8181_v33  ;;  %v8265_v32 = vld [vmem:[%s9370_s7 + $0x488] ss:$16 sps:$4 sm:$0xff]   ;;  %v8270_v33 = vld [vmem:[%s9370_s7 + $0x4a4] ss:$16 sps:$4 sm:$0xff]  }
 0x2fe   : > { %5454 = vmatpush1.bf16.msra.mxu0 %v8176_v36  ;;  %5782 = vmatpush1.bf16.msra.mxu1 %v8179_v37  ;;  %v8271_v36 = vld [vmem:[%s9370_s7 + $0x4a8] ss:$16 sps:$4 sm:$0xff]   ;;  %v8276_v37 = vld [vmem:[%s9370_s7 + $0x4c4] ss:$16 sps:$4 sm:$0xff]  }
 0x2ff   : > { %5455 = vmatprep.subr.bf16.mxu0 %v8184_v38  ;;  %5783 = vmatprep.subr.bf16.mxu1 %v8187_v24  ;;  %v8279_v38 = vld [vmem:[%s9370_s7 + $0x4cc] ss:$16 sps:$4 sm:$0xff]   ;;  %v8274_v24 = vld [vmem:[%s9370_s7 + $0x4c0] ss:$16 sps:$4 sm:$0xff]  }
 0x302   : > { %5456 = vmatpush1.bf16.msra.mxu0 %v8182_v39  ;;  %5784 = vmatpush1.bf16.msra.mxu1 %v8185_v40  ;;  %v8277_v39 = vld [vmem:[%s9370_s7 + $0x4c8] ss:$16 sps:$4 sm:$0xff]   ;;  %v8282_v40 = vld [vmem:[%s9370_s7 + $0x4e4] ss:$16 sps:$4 sm:$0xff]  }
 0x303   : > { %5457 = vmatprep.subr.bf16.mxu0 %v8190_v41  ;;  %5785 = vmatprep.subr.bf16.mxu1 %v8193_v42  ;;  %v8285_v41 = vld [vmem:[%s9370_s7 + $0x4ec] ss:$16 sps:$4 sm:$0xff]   ;;  %v8280_v42 = vld [vmem:[%s9370_s7 + $0x4e0] ss:$16 sps:$4 sm:$0xff]  }
 0x306   : > { %5458 = vmatpush1.bf16.msra.mxu0 %v8188_v43  ;;  %5786 = vmatpush1.bf16.msra.mxu1 %v8191_v44  ;;  %v8283_v43 = vld [vmem:[%s9370_s7 + $0x4e8] ss:$16 sps:$4 sm:$0xff]   ;;  %v8288_v44 = vld [vmem:[%s9370_s7 + $0x504] ss:$16 sps:$4 sm:$0xff]  }
 0x307   : > { %5459 = vmatprep.subr.bf16.mxu0 %v8196_v45  ;;  %5787 = vmatprep.subr.bf16.mxu1 %v8199_v46  ;;  %v8291_v45 = vld [vmem:[%s9370_s7 + $0x50c] ss:$16 sps:$4 sm:$0xff]   ;;  %v8286_v46 = vld [vmem:[%s9370_s7 + $0x500] ss:$16 sps:$4 sm:$0xff]  }
 0x30a   : > { %5460 = vmatpush1.bf16.msra.mxu0 %v8194_v47  ;;  %5788 = vmatpush1.bf16.msra.mxu1 %v8197_v48  ;;  %v8289_v47 = vld [vmem:[%s9370_s7 + $0x508] ss:$16 sps:$4 sm:$0xff]   ;;  %v8294_v48 = vld [vmem:[%s9370_s7 + $0x524] ss:$16 sps:$4 sm:$0xff]  }
 0x30b   : > { %5461 = vmatprep.subr.bf16.mxu0 %v8202_v49  ;;  %5789 = vmatprep.subr.bf16.mxu1 %v8205_v50  ;;  %v8297_v49 = vld [vmem:[%s9370_s7 + $0x52c] ss:$16 sps:$4 sm:$0xff]   ;;  %v8292_v50 = vld [vmem:[%s9370_s7 + $0x520] ss:$16 sps:$4 sm:$0xff]  }
 0x30e   : > { %5462 = vmatpush1.bf16.msra.mxu0 %v8200_v51  ;;  %5790 = vmatpush1.bf16.msra.mxu1 %v8203_v52  ;;  %v8295_v51 = vld [vmem:[%s9370_s7 + $0x528] ss:$16 sps:$4 sm:$0xff]   ;;  %v8300_v52 = vld [vmem:[%s9370_s7 + $0x544] ss:$16 sps:$4 sm:$0xff]  }
 0x30f   : > { %5463 = vmatprep.subr.bf16.mxu0 %v8208_v53  ;;  %5791 = vmatprep.subr.bf16.mxu1 %v8211_v54  ;;  %v8303_v53 = vld [vmem:[%s9370_s7 + $0x54c] ss:$16 sps:$4 sm:$0xff]   ;;  %v8298_v54 = vld [vmem:[%s9370_s7 + $0x540] ss:$16 sps:$4 sm:$0xff]  }
 0x312   : > { %5464 = vmatpush1.bf16.msra.mxu0 %v8206_v55  ;;  %5792 = vmatpush1.bf16.msra.mxu1 %v8209_v56  ;;  %v8301_v55 = vld [vmem:[%s9370_s7 + $0x548] ss:$16 sps:$4 sm:$0xff]   ;;  %v8306_v56 = vld [vmem:[%s9370_s7 + $0x564] ss:$16 sps:$4 sm:$0xff]  }
 0x313   : > { %5465 = vmatprep.subr.bf16.mxu0 %v8214_v57  ;;  %5793 = vmatprep.subr.bf16.mxu1 %v8217_v58  ;;  %v8309_v57 = vld [vmem:[%s9370_s7 + $0x56c] ss:$16 sps:$4 sm:$0xff]   ;;  %v8304_v58 = vld [vmem:[%s9370_s7 + $0x560] ss:$16 sps:$4 sm:$0xff]  }
 0x316   : > { %5466 = vmatpush1.bf16.msra.mxu0 %v8212_v59  ;;  %5794 = vmatpush1.bf16.msra.mxu1 %v8215_v60  ;;  %v8307_v59 = vld [vmem:[%s9370_s7 + $0x568] ss:$16 sps:$4 sm:$0xff]   ;;  %v8312_v60 = vld [vmem:[%s9370_s7 + $0x584] ss:$16 sps:$4 sm:$0xff]  }
 0x317   : > { %5467 = vmatprep.subr.bf16.mxu0 %v8220_v61  ;;  %5795 = vmatprep.subr.bf16.mxu1 %v8223_v62  ;;  %v8315_v61 = vld [vmem:[%s9370_s7 + $0x58c] ss:$16 sps:$4 sm:$0xff]   ;;  %v8310_v62 = vld [vmem:[%s9370_s7 + $0x580] ss:$16 sps:$4 sm:$0xff]  }
 0x31a   : > { %5468 = vmatpush1.bf16.msra.mxu0 %v8218_v63  ;;  %5796 = vmatpush1.bf16.msra.mxu1 %v8221_v0  ;;  %v8313_v63 = vld [vmem:[%s9370_s7 + $0x588] ss:$16 sps:$4 sm:$0xff]   ;;  %v8318_v0 = vld [vmem:[%s9370_s7 + $0x5a4] ss:$16 sps:$4 sm:$0xff]  }
 0x31b   : > { %5469 = vmatprep.subr.bf16.mxu0 %v8226_v2  ;;  %5797 = vmatprep.subr.bf16.mxu1 %v8229_v3  ;;  %v8321_v2 = vld [vmem:[%s9370_s7 + $0x5ac] ss:$16 sps:$4 sm:$0xff]   ;;  %v8316_v3 = vld [vmem:[%s9370_s7 + $0x5a0] ss:$16 sps:$4 sm:$0xff]  }
 0x31e   : > { %5470 = vmatpush1.bf16.msra.mxu0 %v8224_v4  ;;  %5798 = vmatpush1.bf16.msra.mxu1 %v8227_v11  ;;  %v8319_v4 = vld [vmem:[%s9370_s7 + $0x5a8] ss:$16 sps:$4 sm:$0xff]   ;;  %v8324_v11 = vld [vmem:[%s9370_s7 + $0x5c4] ss:$16 sps:$4 sm:$0xff]  }
 0x31f   : > { %5471 = vmatprep.subr.bf16.mxu0 %v8232_v5  ;;  %5799 = vmatprep.subr.bf16.mxu1 %v8235_v6  ;;  %v8327_v5 = vld [vmem:[%s9370_s7 + $0x5cc] ss:$16 sps:$4 sm:$0xff]   ;;  %v8322_v6 = vld [vmem:[%s9370_s7 + $0x5c0] ss:$16 sps:$4 sm:$0xff]  }
 0x322   : > { %5472 = vmatpush1.bf16.msra.mxu0 %v8230_v7  ;;  %5800 = vmatpush1.bf16.msra.mxu1 %v8233_v8  ;;  %v8325_v7 = vld [vmem:[%s9370_s7 + $0x5c8] ss:$16 sps:$4 sm:$0xff]   ;;  %v8330_v8 = vld [vmem:[%s9370_s7 + $0x5e4] ss:$16 sps:$4 sm:$0xff]  }
 0x323   : > { %5482 = vmatprep.subr.bf16.mxu0 %v8240_v9  ;;  %5810 = vmatprep.subr.bf16.mxu1 %v8243_v10  ;;  %v8333_v9 = vld [vmem:[%s9370_s7 + $0x5ec] ss:$16 sps:$4 sm:$0xff]   ;;  %v8328_v10 = vld [vmem:[%s9370_s7 + $0x5e0] ss:$16 sps:$4 sm:$0xff]  }
 0x325   : > { %5474 = vmatmul.mubr.bf16.vlgmr.msra.gmra.mrb[0].mxu0 %v6693_v12  ;;  %5802 = vmatmul.mubr.bf16.vlgmr.msra.gmra.mrb[0].mxu1 %v6693_v12  ;;  %v8331_v12 = vld [vmem:[%s9370_s7 + $0x5e8] ss:$16 sps:$4 sm:$0xff]  }
 0x326   : > { %5483 = vmatpush1.bf16.msra.mxu0 %v8238_v13  ;;  %5811 = vmatpush1.bf16.msra.mxu1 %v8241_v14  ;;  %v8338_v13 = vld [vmem:[%s9370_s7 + $0x604] ss:$16 sps:$4 sm:$0xff]   ;;  %v8341_v14 = vld [vmem:[%s9370_s7 + $0x60c] ss:$16 sps:$4 sm:$0xff]  }
 0x327   : > { %5484 = vmatprep.subr.bf16.mxu0 %v8246_v15  ;;  %5812 = vmatprep.subr.bf16.mxu1 %v8249_v17  ;;  %v8336_v15 = vld [vmem:[%s9370_s7 + $0x600] ss:$16 sps:$4 sm:$0xff]   ;;  %v6695_v17 = vcombine.low %v9754_v16, %v9754_v16 }
 0x328   : > { %5514 = vmatprep.mubr.bf16.mxu0 %v6696_v18  ;;  %5842 = vmatprep.mubr.bf16.mxu1 %v6696_v18  ;;  %v8339_v18 = vld [vmem:[%s9370_s7 + $0x608] ss:$16 sps:$4 sm:$0xff]   ;;  %v8342_v16 = vld [vmem:[%s9370_s7 + $0x620] ss:$16 sps:$4 sm:$0xff]  }
 0x32a   : > { %5485 = vmatpush1.bf16.msra.mxu0 %v8244_v19  ;;  %5813 = vmatpush1.bf16.msra.mxu1 %v8247_v20  ;;  %v9823_v19 = vld [vmem:[#allocation2 + $0x18] sm:$0xff] }
 0x32b   : > { %5486 = vmatprep.subr.bf16.mxu0 %v8252_v21  ;;  %5814 = vmatprep.subr.bf16.mxu1 %v8255_v22  ;;  %v8344_v20 = vld [vmem:[%s9370_s7 + $0x624] ss:$16 sps:$4 sm:$0xff]   ;;  %v8347_v21 = vld [vmem:[%s9370_s7 + $0x62c] ss:$16 sps:$4 sm:$0xff]   ;;  %v6698_v22 = vcombine.high %v9823_v19, %v9823_v19 }
 0x32e   : > { %5487 = vmatpush1.bf16.msra.mxu0 %v8250_v23  ;;  %5815 = vmatpush1.bf16.msra.mxu1 %v8253_v25  ;;  %v8345_v23 = vld [vmem:[%s9370_s7 + $0x628] ss:$16 sps:$4 sm:$0xff]   ;;  %v8350_v25 = vld [vmem:[%s9370_s7 + $0x644] ss:$16 sps:$4 sm:$0xff]  }
 0x32f   : > { %5488 = vmatprep.subr.bf16.mxu0 %v8258_v26  ;;  %5816 = vmatprep.subr.bf16.mxu1 %v8261_v27  ;;  %v8353_v26 = vld [vmem:[%s9370_s7 + $0x64c] ss:$16 sps:$4 sm:$0xff]   ;;  %v8348_v27 = vld [vmem:[%s9370_s7 + $0x640] ss:$16 sps:$4 sm:$0xff]  }
 0x332   : > { %5489 = vmatpush1.bf16.msra.mxu0 %v8256_v28  ;;  %5817 = vmatpush1.bf16.msra.mxu1 %v8259_v1  ;;  %v8351_v28 = vld [vmem:[%s9370_s7 + $0x648] ss:$16 sps:$4 sm:$0xff]   ;;  %v8356_v1 = vld [vmem:[%s9370_s7 + $0x664] ss:$16 sps:$4 sm:$0xff]  }
 0x333   : > { %5490 = vmatprep.subr.bf16.mxu0 %v8264_v29  ;;  %5818 = vmatprep.subr.bf16.mxu1 %v8267_v30  ;;  %v8359_v29 = vld [vmem:[%s9370_s7 + $0x66c] ss:$16 sps:$4 sm:$0xff]   ;;  %v8354_v30 = vld [vmem:[%s9370_s7 + $0x660] ss:$16 sps:$4 sm:$0xff]  }
 0x336   : > { %5491 = vmatpush1.bf16.msra.mxu0 %v8262_v31  ;;  %5819 = vmatpush1.bf16.msra.mxu1 %v8265_v32  ;;  %v8357_v31 = vld [vmem:[%s9370_s7 + $0x668] ss:$16 sps:$4 sm:$0xff]   ;;  %v8362_v32 = vld [vmem:[%s9370_s7 + $0x684] ss:$16 sps:$4 sm:$0xff]  }
 0x337   : > { %5492 = vmatprep.subr.bf16.mxu0 %v8270_v33  ;;  %5820 = vmatprep.subr.bf16.mxu1 %v8273_v34  ;;  %v8365_v33 = vld [vmem:[%s9370_s7 + $0x68c] ss:$16 sps:$4 sm:$0xff]   ;;  %v8360_v34 = vld [vmem:[%s9370_s7 + $0x680] ss:$16 sps:$4 sm:$0xff]  }
 0x33a   : > { %5493 = vmatpush1.bf16.msra.mxu0 %v8268_v35  ;;  %5821 = vmatpush1.bf16.msra.mxu1 %v8271_v36  ;;  %v8363_v35 = vld [vmem:[%s9370_s7 + $0x688] ss:$16 sps:$4 sm:$0xff]   ;;  %v8368_v36 = vld [vmem:[%s9370_s7 + $0x6a4] ss:$16 sps:$4 sm:$0xff]  }
 0x33b   : > { %5494 = vmatprep.subr.bf16.mxu0 %v8276_v37  ;;  %5822 = vmatprep.subr.bf16.mxu1 %v8279_v38  ;;  %v8371_v37 = vld [vmem:[%s9370_s7 + $0x6ac] ss:$16 sps:$4 sm:$0xff]   ;;  %v8366_v38 = vld [vmem:[%s9370_s7 + $0x6a0] ss:$16 sps:$4 sm:$0xff]  }
 0x33e   : > { %5495 = vmatpush1.bf16.msra.mxu0 %v8274_v24  ;;  %5823 = vmatpush1.bf16.msra.mxu1 %v8277_v39  ;;  %v8369_v24 = vld [vmem:[%s9370_s7 + $0x6a8] ss:$16 sps:$4 sm:$0xff]   ;;  %v8374_v39 = vld [vmem:[%s9370_s7 + $0x6c4] ss:$16 sps:$4 sm:$0xff]  }
 0x33f   : > { %5496 = vmatprep.subr.bf16.mxu0 %v8282_v40  ;;  %5824 = vmatprep.subr.bf16.mxu1 %v8285_v41  ;;  %v8377_v40 = vld [vmem:[%s9370_s7 + $0x6cc] ss:$16 sps:$4 sm:$0xff]   ;;  %v8372_v41 = vld [vmem:[%s9370_s7 + $0x6c0] ss:$16 sps:$4 sm:$0xff]  }
 0x342   : > { %5497 = vmatpush1.bf16.msra.mxu0 %v8280_v42  ;;  %5825 = vmatpush1.bf16.msra.mxu1 %v8283_v43  ;;  %v8375_v42 = vld [vmem:[%s9370_s7 + $0x6c8] ss:$16 sps:$4 sm:$0xff]   ;;  %v8380_v43 = vld [vmem:[%s9370_s7 + $0x6e4] ss:$16 sps:$4 sm:$0xff]  }
 0x343   : > { %5498 = vmatprep.subr.bf16.mxu0 %v8288_v44  ;;  %5826 = vmatprep.subr.bf16.mxu1 %v8291_v45  ;;  %v8383_v44 = vld [vmem:[%s9370_s7 + $0x6ec] ss:$16 sps:$4 sm:$0xff]   ;;  %v8378_v45 = vld [vmem:[%s9370_s7 + $0x6e0] ss:$16 sps:$4 sm:$0xff]  }
 0x346   : > { %5499 = vmatpush1.bf16.msra.mxu0 %v8286_v46  ;;  %5827 = vmatpush1.bf16.msra.mxu1 %v8289_v47  ;;  %v8381_v46 = vld [vmem:[%s9370_s7 + $0x6e8] ss:$16 sps:$4 sm:$0xff]   ;;  %v8386_v47 = vld [vmem:[%s9370_s7 + $0x704] ss:$16 sps:$4 sm:$0xff]  }
 0x347   : > { %5500 = vmatprep.subr.bf16.mxu0 %v8294_v48  ;;  %5828 = vmatprep.subr.bf16.mxu1 %v8297_v49  ;;  %v8389_v48 = vld [vmem:[%s9370_s7 + $0x70c] ss:$16 sps:$4 sm:$0xff]   ;;  %v8384_v49 = vld [vmem:[%s9370_s7 + $0x700] ss:$16 sps:$4 sm:$0xff]  }
 0x34a   : > { %5501 = vmatpush1.bf16.msra.mxu0 %v8292_v50  ;;  %5829 = vmatpush1.bf16.msra.mxu1 %v8295_v51  ;;  %v8387_v50 = vld [vmem:[%s9370_s7 + $0x708] ss:$16 sps:$4 sm:$0xff]   ;;  %v8392_v51 = vld [vmem:[%s9370_s7 + $0x724] ss:$16 sps:$4 sm:$0xff]  }
 0x34b   : > { %5502 = vmatprep.subr.bf16.mxu0 %v8300_v52  ;;  %5830 = vmatprep.subr.bf16.mxu1 %v8303_v53  ;;  %v8395_v52 = vld [vmem:[%s9370_s7 + $0x72c] ss:$16 sps:$4 sm:$0xff]   ;;  %v8390_v53 = vld [vmem:[%s9370_s7 + $0x720] ss:$16 sps:$4 sm:$0xff]  }
 0x34e   : > { %5503 = vmatpush1.bf16.msra.mxu0 %v8298_v54  ;;  %5831 = vmatpush1.bf16.msra.mxu1 %v8301_v55  ;;  %v8393_v54 = vld [vmem:[%s9370_s7 + $0x728] ss:$16 sps:$4 sm:$0xff]   ;;  %v8398_v55 = vld [vmem:[%s9370_s7 + $0x744] ss:$16 sps:$4 sm:$0xff]  }
 0x34f   : > { %5504 = vmatprep.subr.bf16.mxu0 %v8306_v56  ;;  %5832 = vmatprep.subr.bf16.mxu1 %v8309_v57  ;;  %v8401_v56 = vld [vmem:[%s9370_s7 + $0x74c] ss:$16 sps:$4 sm:$0xff]   ;;  %v8396_v57 = vld [vmem:[%s9370_s7 + $0x740] ss:$16 sps:$4 sm:$0xff]  }
 0x352   : > { %5505 = vmatpush1.bf16.msra.mxu0 %v8304_v58  ;;  %5833 = vmatpush1.bf16.msra.mxu1 %v8307_v59  ;;  %v8399_v58 = vld [vmem:[%s9370_s7 + $0x748] ss:$16 sps:$4 sm:$0xff]   ;;  %v8404_v59 = vld [vmem:[%s9370_s7 + $0x764] ss:$16 sps:$4 sm:$0xff]  }
 0x353   : > { %5506 = vmatprep.subr.bf16.mxu0 %v8312_v60  ;;  %5834 = vmatprep.subr.bf16.mxu1 %v8315_v61  ;;  %v8407_v60 = vld [vmem:[%s9370_s7 + $0x76c] ss:$16 sps:$4 sm:$0xff]   ;;  %v8402_v61 = vld [vmem:[%s9370_s7 + $0x760] ss:$16 sps:$4 sm:$0xff]  }
 0x356   : > { %5507 = vmatpush1.bf16.msra.mxu0 %v8310_v62  ;;  %5835 = vmatpush1.bf16.msra.mxu1 %v8313_v63  ;;  %v8405_v62 = vld [vmem:[%s9370_s7 + $0x768] ss:$16 sps:$4 sm:$0xff]   ;;  %v8410_v63 = vld [vmem:[%s9370_s7 + $0x784] ss:$16 sps:$4 sm:$0xff]  }
 0x357   : > { %5508 = vmatprep.subr.bf16.mxu0 %v8318_v0  ;;  %5836 = vmatprep.subr.bf16.mxu1 %v8321_v2  ;;  %v8413_v0 = vld [vmem:[%s9370_s7 + $0x78c] ss:$16 sps:$4 sm:$0xff]   ;;  %v8408_v2 = vld [vmem:[%s9370_s7 + $0x780] ss:$16 sps:$4 sm:$0xff]  }
 0x35a   : > { %5509 = vmatpush1.bf16.msra.mxu0 %v8316_v3  ;;  %5837 = vmatpush1.bf16.msra.mxu1 %v8319_v4  ;;  %v8411_v3 = vld [vmem:[%s9370_s7 + $0x788] ss:$16 sps:$4 sm:$0xff]   ;;  %v8416_v4 = vld [vmem:[%s9370_s7 + $0x7a4] ss:$16 sps:$4 sm:$0xff]  }
 0x35b   : > { %5510 = vmatprep.subr.bf16.mxu0 %v8324_v11  ;;  %5838 = vmatprep.subr.bf16.mxu1 %v8327_v5  ;;  %v8419_v11 = vld [vmem:[%s9370_s7 + $0x7ac] ss:$16 sps:$4 sm:$0xff]   ;;  %v8414_v5 = vld [vmem:[%s9370_s7 + $0x7a0] ss:$16 sps:$4 sm:$0xff]  }
 0x35e   : > { %5511 = vmatpush1.bf16.msra.mxu0 %v8322_v6  ;;  %5839 = vmatpush1.bf16.msra.mxu1 %v8325_v7  ;;  %v8417_v6 = vld [vmem:[%s9370_s7 + $0x7a8] ss:$16 sps:$4 sm:$0xff]   ;;  %v8422_v7 = vld [vmem:[%s9370_s7 + $0x7c4] ss:$16 sps:$4 sm:$0xff]  }
 0x35f   : > { %5512 = vmatprep.subr.bf16.mxu0 %v8330_v8  ;;  %5840 = vmatprep.subr.bf16.mxu1 %v8333_v9  ;;  %v8425_v8 = vld [vmem:[%s9370_s7 + $0x7cc] ss:$16 sps:$4 sm:$0xff]   ;;  %v8420_v9 = vld [vmem:[%s9370_s7 + $0x7c0] ss:$16 sps:$4 sm:$0xff]  }
 0x362   : > { %5513 = vmatpush1.bf16.msra.mxu0 %v8328_v10  ;;  %5841 = vmatpush1.bf16.msra.mxu1 %v8331_v12  ;;  %v8423_v10 = vld [vmem:[%s9370_s7 + $0x7c8] ss:$16 sps:$4 sm:$0xff]   ;;  %v8428_v12 = vld [vmem:[%s9370_s7 + $0x7e4] ss:$16 sps:$4 sm:$0xff]  }
 0x363   : > { %5523 = vmatprep.subr.bf16.mxu0 %v8338_v13  ;;  %5851 = vmatprep.subr.bf16.mxu1 %v8341_v14  ;;  %v8431_v13 = vld [vmem:[%s9370_s7 + $0x7ec] ss:$16 sps:$4 sm:$0xff]   ;;  %v8426_v14 = vld [vmem:[%s9370_s7 + $0x7e0] ss:$16 sps:$4 sm:$0xff]  }
 0x365   : > { %5515 = vmatmul.mubr.bf16.vlgmr.msra.gmra.mrb[0].mxu0 %v6695_v17  ;;  %5843 = vmatmul.mubr.bf16.vlgmr.msra.gmra.mrb[0].mxu1 %v6695_v17  ;;  %v8436_v17 = vld [vmem:[%s9370_s7 + $0x804] ss:$16 sps:$4 sm:$0xff]  }
 0x366   : > { %5524 = vmatpush1.bf16.msra.mxu0 %v8336_v15  ;;  %5852 = vmatpush1.bf16.msra.mxu1 %v8339_v18  ;;  %v8429_v15 = vld [vmem:[%s9370_s7 + $0x7e8] ss:$16 sps:$4 sm:$0xff]   ;;  %v8439_v18 = vld [vmem:[%s9370_s7 + $0x80c] ss:$16 sps:$4 sm:$0xff]  }
 0x367   : > { %5525 = vmatprep.subr.bf16.mxu0 %v8344_v20  ;;  %5853 = vmatprep.subr.bf16.mxu1 %v8347_v21  ;;  %v8434_v20 = vld [vmem:[%s9370_s7 + $0x800] ss:$16 sps:$4 sm:$0xff]   ;;  %v6697_v21 = vcombine.low %v9823_v19, %v9823_v19 }
 0x368   : > { %5555 = vmatprep.mubr.bf16.mxu0 %v6698_v22  ;;  %5883 = vmatprep.mubr.bf16.mxu1 %v6698_v22  ;;  %v9892_v22 = vld [vmem:[#allocation2 + $0x20] sm:$0xff]  ;;  %v8440_v19 = vld [vmem:[%s9370_s7 + $0x820] ss:$16 sps:$4 sm:$0xff]  }
 0x36a   : > { %5526 = vmatpush1.bf16.msra.mxu0 %v8342_v16  ;;  %5854 = vmatpush1.bf16.msra.mxu1 %v8345_v23  ;;  %v8437_v16 = vld [vmem:[%s9370_s7 + $0x808] ss:$16 sps:$4 sm:$0xff]   ;;  %v8442_v23 = vld [vmem:[%s9370_s7 + $0x824] ss:$16 sps:$4 sm:$0xff]  }
 0x36b   : > { %5527 = vmatprep.subr.bf16.mxu0 %v8350_v25  ;;  %5855 = vmatprep.subr.bf16.mxu1 %v8353_v26  ;;  %v8445_v25 = vld [vmem:[%s9370_s7 + $0x82c] ss:$16 sps:$4 sm:$0xff]   ;;  %v6700_v26 = vcombine.high %v9892_v22, %v9892_v22 }
 0x36e   : > { %5528 = vmatpush1.bf16.msra.mxu0 %v8348_v27  ;;  %5856 = vmatpush1.bf16.msra.mxu1 %v8351_v28  ;;  %v8443_v27 = vld [vmem:[%s9370_s7 + $0x828] ss:$16 sps:$4 sm:$0xff]   ;;  %v8448_v28 = vld [vmem:[%s9370_s7 + $0x844] ss:$16 sps:$4 sm:$0xff]  }
 0x36f   : > { %5529 = vmatprep.subr.bf16.mxu0 %v8356_v1  ;;  %5857 = vmatprep.subr.bf16.mxu1 %v8359_v29  ;;  %v8451_v1 = vld [vmem:[%s9370_s7 + $0x84c] ss:$16 sps:$4 sm:$0xff]   ;;  %v8446_v29 = vld [vmem:[%s9370_s7 + $0x840] ss:$16 sps:$4 sm:$0xff]  }
 0x372   : > { %5530 = vmatpush1.bf16.msra.mxu0 %v8354_v30  ;;  %5858 = vmatpush1.bf16.msra.mxu1 %v8357_v31  ;;  %v8449_v30 = vld [vmem:[%s9370_s7 + $0x848] ss:$16 sps:$4 sm:$0xff]   ;;  %v8454_v31 = vld [vmem:[%s9370_s7 + $0x864] ss:$16 sps:$4 sm:$0xff]  }
 0x373   : > { %5531 = vmatprep.subr.bf16.mxu0 %v8362_v32  ;;  %5859 = vmatprep.subr.bf16.mxu1 %v8365_v33  ;;  %v8457_v32 = vld [vmem:[%s9370_s7 + $0x86c] ss:$16 sps:$4 sm:$0xff]   ;;  %v8452_v33 = vld [vmem:[%s9370_s7 + $0x860] ss:$16 sps:$4 sm:$0xff]  }
 0x376   : > { %5532 = vmatpush1.bf16.msra.mxu0 %v8360_v34  ;;  %5860 = vmatpush1.bf16.msra.mxu1 %v8363_v35  ;;  %v8455_v34 = vld [vmem:[%s9370_s7 + $0x868] ss:$16 sps:$4 sm:$0xff]   ;;  %v8460_v35 = vld [vmem:[%s9370_s7 + $0x884] ss:$16 sps:$4 sm:$0xff]  }
 0x377   : > { %5533 = vmatprep.subr.bf16.mxu0 %v8368_v36  ;;  %5861 = vmatprep.subr.bf16.mxu1 %v8371_v37  ;;  %v8463_v36 = vld [vmem:[%s9370_s7 + $0x88c] ss:$16 sps:$4 sm:$0xff]   ;;  %v8458_v37 = vld [vmem:[%s9370_s7 + $0x880] ss:$16 sps:$4 sm:$0xff]  }
 0x37a   : > { %5534 = vmatpush1.bf16.msra.mxu0 %v8366_v38  ;;  %5862 = vmatpush1.bf16.msra.mxu1 %v8369_v24  ;;  %v8461_v38 = vld [vmem:[%s9370_s7 + $0x888] ss:$16 sps:$4 sm:$0xff]   ;;  %v8466_v24 = vld [vmem:[%s9370_s7 + $0x8a4] ss:$16 sps:$4 sm:$0xff]  }
 0x37b   : > { %5535 = vmatprep.subr.bf16.mxu0 %v8374_v39  ;;  %5863 = vmatprep.subr.bf16.mxu1 %v8377_v40  ;;  %v8469_v39 = vld [vmem:[%s9370_s7 + $0x8ac] ss:$16 sps:$4 sm:$0xff]   ;;  %v8464_v40 = vld [vmem:[%s9370_s7 + $0x8a0] ss:$16 sps:$4 sm:$0xff]  }
 0x37e   : > { %5536 = vmatpush1.bf16.msra.mxu0 %v8372_v41  ;;  %5864 = vmatpush1.bf16.msra.mxu1 %v8375_v42  ;;  %v8467_v41 = vld [vmem:[%s9370_s7 + $0x8a8] ss:$16 sps:$4 sm:$0xff]   ;;  %v8472_v42 = vld [vmem:[%s9370_s7 + $0x8c4] ss:$16 sps:$4 sm:$0xff]  }
 0x37f   : > { %5537 = vmatprep.subr.bf16.mxu0 %v8380_v43  ;;  %5865 = vmatprep.subr.bf16.mxu1 %v8383_v44  ;;  %v8475_v43 = vld [vmem:[%s9370_s7 + $0x8cc] ss:$16 sps:$4 sm:$0xff]   ;;  %v8470_v44 = vld [vmem:[%s9370_s7 + $0x8c0] ss:$16 sps:$4 sm:$0xff]  }
 0x382   : > { %5538 = vmatpush1.bf16.msra.mxu0 %v8378_v45  ;;  %5866 = vmatpush1.bf16.msra.mxu1 %v8381_v46  ;;  %v8473_v45 = vld [vmem:[%s9370_s7 + $0x8c8] ss:$16 sps:$4 sm:$0xff]   ;;  %v8478_v46 = vld [vmem:[%s9370_s7 + $0x8e4] ss:$16 sps:$4 sm:$0xff]  }
 0x383   : > { %5539 = vmatprep.subr.bf16.mxu0 %v8386_v47  ;;  %5867 = vmatprep.subr.bf16.mxu1 %v8389_v48  ;;  %v8481_v47 = vld [vmem:[%s9370_s7 + $0x8ec] ss:$16 sps:$4 sm:$0xff]   ;;  %v8476_v48 = vld [vmem:[%s9370_s7 + $0x8e0] ss:$16 sps:$4 sm:$0xff]  }
 0x386   : > { %5540 = vmatpush1.bf16.msra.mxu0 %v8384_v49  ;;  %5868 = vmatpush1.bf16.msra.mxu1 %v8387_v50  ;;  %v8479_v49 = vld [vmem:[%s9370_s7 + $0x8e8] ss:$16 sps:$4 sm:$0xff]   ;;  %v8484_v50 = vld [vmem:[%s9370_s7 + $0x904] ss:$16 sps:$4 sm:$0xff]  }
 0x387   : > { %5541 = vmatprep.subr.bf16.mxu0 %v8392_v51  ;;  %5869 = vmatprep.subr.bf16.mxu1 %v8395_v52  ;;  %v8487_v51 = vld [vmem:[%s9370_s7 + $0x90c] ss:$16 sps:$4 sm:$0xff]   ;;  %v8482_v52 = vld [vmem:[%s9370_s7 + $0x900] ss:$16 sps:$4 sm:$0xff]  }
 0x38a   : > { %5542 = vmatpush1.bf16.msra.mxu0 %v8390_v53  ;;  %5870 = vmatpush1.bf16.msra.mxu1 %v8393_v54  ;;  %v8485_v53 = vld [vmem:[%s9370_s7 + $0x908] ss:$16 sps:$4 sm:$0xff]   ;;  %v8490_v54 = vld [vmem:[%s9370_s7 + $0x924] ss:$16 sps:$4 sm:$0xff]  }
 0x38b   : > { %5543 = vmatprep.subr.bf16.mxu0 %v8398_v55  ;;  %5871 = vmatprep.subr.bf16.mxu1 %v8401_v56  ;;  %v8493_v55 = vld [vmem:[%s9370_s7 + $0x92c] ss:$16 sps:$4 sm:$0xff]   ;;  %v8488_v56 = vld [vmem:[%s9370_s7 + $0x920] ss:$16 sps:$4 sm:$0xff]  }
 0x38e   : > { %5544 = vmatpush1.bf16.msra.mxu0 %v8396_v57  ;;  %5872 = vmatpush1.bf16.msra.mxu1 %v8399_v58  ;;  %v8491_v57 = vld [vmem:[%s9370_s7 + $0x928] ss:$16 sps:$4 sm:$0xff]   ;;  %v8496_v58 = vld [vmem:[%s9370_s7 + $0x944] ss:$16 sps:$4 sm:$0xff]  }
 0x38f   : > { %5545 = vmatprep.subr.bf16.mxu0 %v8404_v59  ;;  %5873 = vmatprep.subr.bf16.mxu1 %v8407_v60  ;;  %v8499_v59 = vld [vmem:[%s9370_s7 + $0x94c] ss:$16 sps:$4 sm:$0xff]   ;;  %v8494_v60 = vld [vmem:[%s9370_s7 + $0x940] ss:$16 sps:$4 sm:$0xff]  }
 0x392   : > { %5546 = vmatpush1.bf16.msra.mxu0 %v8402_v61  ;;  %5874 = vmatpush1.bf16.msra.mxu1 %v8405_v62  ;;  %v8497_v61 = vld [vmem:[%s9370_s7 + $0x948] ss:$16 sps:$4 sm:$0xff]   ;;  %v8502_v62 = vld [vmem:[%s9370_s7 + $0x964] ss:$16 sps:$4 sm:$0xff]  }
 0x393   : > { %5547 = vmatprep.subr.bf16.mxu0 %v8410_v63  ;;  %5875 = vmatprep.subr.bf16.mxu1 %v8413_v0  ;;  %v8505_v63 = vld [vmem:[%s9370_s7 + $0x96c] ss:$16 sps:$4 sm:$0xff]   ;;  %v8500_v0 = vld [vmem:[%s9370_s7 + $0x960] ss:$16 sps:$4 sm:$0xff]  }
 0x396   : > { %5548 = vmatpush1.bf16.msra.mxu0 %v8408_v2  ;;  %5876 = vmatpush1.bf16.msra.mxu1 %v8411_v3  ;;  %v8503_v2 = vld [vmem:[%s9370_s7 + $0x968] ss:$16 sps:$4 sm:$0xff]   ;;  %v8508_v3 = vld [vmem:[%s9370_s7 + $0x984] ss:$16 sps:$4 sm:$0xff]  }
 0x397   : > { %5549 = vmatprep.subr.bf16.mxu0 %v8416_v4  ;;  %5877 = vmatprep.subr.bf16.mxu1 %v8419_v11  ;;  %v8511_v4 = vld [vmem:[%s9370_s7 + $0x98c] ss:$16 sps:$4 sm:$0xff]   ;;  %v8506_v11 = vld [vmem:[%s9370_s7 + $0x980] ss:$16 sps:$4 sm:$0xff]  }
 0x39a   : > { %5550 = vmatpush1.bf16.msra.mxu0 %v8414_v5  ;;  %5878 = vmatpush1.bf16.msra.mxu1 %v8417_v6  ;;  %v8509_v5 = vld [vmem:[%s9370_s7 + $0x988] ss:$16 sps:$4 sm:$0xff]   ;;  %v8514_v6 = vld [vmem:[%s9370_s7 + $0x9a4] ss:$16 sps:$4 sm:$0xff]  }
 0x39b   : > { %5551 = vmatprep.subr.bf16.mxu0 %v8422_v7  ;;  %5879 = vmatprep.subr.bf16.mxu1 %v8425_v8  ;;  %v8517_v7 = vld [vmem:[%s9370_s7 + $0x9ac] ss:$16 sps:$4 sm:$0xff]   ;;  %v8512_v8 = vld [vmem:[%s9370_s7 + $0x9a0] ss:$16 sps:$4 sm:$0xff]  }
 0x39e   : > { %5552 = vmatpush1.bf16.msra.mxu0 %v8420_v9  ;;  %5880 = vmatpush1.bf16.msra.mxu1 %v8423_v10  ;;  %v8515_v9 = vld [vmem:[%s9370_s7 + $0x9a8] ss:$16 sps:$4 sm:$0xff]   ;;  %v8520_v10 = vld [vmem:[%s9370_s7 + $0x9c4] ss:$16 sps:$4 sm:$0xff]  }
 0x39f   : > { %5553 = vmatprep.subr.bf16.mxu0 %v8428_v12  ;;  %5881 = vmatprep.subr.bf16.mxu1 %v8431_v13  ;;  %v8523_v12 = vld [vmem:[%s9370_s7 + $0x9cc] ss:$16 sps:$4 sm:$0xff]   ;;  %v8518_v13 = vld [vmem:[%s9370_s7 + $0x9c0] ss:$16 sps:$4 sm:$0xff]  }
 0x3a2   : > { %5554 = vmatpush1.bf16.msra.mxu0 %v8426_v14  ;;  %5882 = vmatpush1.bf16.msra.mxu1 %v8429_v15  ;;  %v8521_v14 = vld [vmem:[%s9370_s7 + $0x9c8] ss:$16 sps:$4 sm:$0xff]   ;;  %v8526_v15 = vld [vmem:[%s9370_s7 + $0x9e4] ss:$16 sps:$4 sm:$0xff]  }
 0x3a3   : > { %5564 = vmatprep.subr.bf16.mxu0 %v8436_v17  ;;  %5892 = vmatprep.subr.bf16.mxu1 %v8439_v18  ;;  %v8529_v17 = vld [vmem:[%s9370_s7 + $0x9ec] ss:$16 sps:$4 sm:$0xff]   ;;  %v8524_v18 = vld [vmem:[%s9370_s7 + $0x9e0] ss:$16 sps:$4 sm:$0xff]  }
 0x3a5   : > { %5556 = vmatmul.mubr.bf16.vlgmr.msra.gmra.mrb[0].mxu0 %v6697_v21  ;;  %5884 = vmatmul.mubr.bf16.vlgmr.msra.gmra.mrb[0].mxu1 %v6697_v21  ;;  %v8534_v21 = vld [vmem:[%s9370_s7 + $0xa04] ss:$16 sps:$4 sm:$0xff]  }
 0x3a6   : > { %5565 = vmatpush1.bf16.msra.mxu0 %v8434_v20  ;;  %5893 = vmatpush1.bf16.msra.mxu1 %v8437_v16  ;;  %v8527_v20 = vld [vmem:[%s9370_s7 + $0x9e8] ss:$16 sps:$4 sm:$0xff]   ;;  %v8537_v16 = vld [vmem:[%s9370_s7 + $0xa0c] ss:$16 sps:$4 sm:$0xff]  }
 0x3a7   : > { %5566 = vmatprep.subr.bf16.mxu0 %v8442_v23  ;;  %5894 = vmatprep.subr.bf16.mxu1 %v8445_v25  ;;  %v9959_v23 = vld [vmem:[#allocation2 + $0x28] sm:$0xff]  ;;  %v6699_v25 = vcombine.low %v9892_v22, %v9892_v22 }
 0x3a8   : > { %5596 = vmatprep.mubr.bf16.mxu0 %v6700_v26  ;;  %5924 = vmatprep.mubr.bf16.mxu1 %v6700_v26  ;;  %v8532_v26 = vld [vmem:[%s9370_s7 + $0xa00] ss:$16 sps:$4 sm:$0xff]  }
 0x3a9   : > { %v8538_v22 = vld [vmem:[%s9370_s7 + $0xa20] ss:$16 sps:$4 sm:$0xff]  }
 0x3aa   : > { %5567 = vmatpush1.bf16.msra.mxu0 %v8440_v19  ;;  %5895 = vmatpush1.bf16.msra.mxu1 %v8443_v27  ;;  %v8535_v19 = vld [vmem:[%s9370_s7 + $0xa08] ss:$16 sps:$4 sm:$0xff]   ;;  %v8540_v27 = vld [vmem:[%s9370_s7 + $0xa24] ss:$16 sps:$4 sm:$0xff]  }
 0x3ab   : > { %5568 = vmatprep.subr.bf16.mxu0 %v8448_v28  ;;  %5896 = vmatprep.subr.bf16.mxu1 %v8451_v1  ;;  %v8543_v28 = vld [vmem:[%s9370_s7 + $0xa2c] ss:$16 sps:$4 sm:$0xff]   ;;  %v6702_v1 = vcombine.high %v9959_v23, %v9959_v23 }
 0x3ae   : > { %5569 = vmatpush1.bf16.msra.mxu0 %v8446_v29  ;;  %5897 = vmatpush1.bf16.msra.mxu1 %v8449_v30  ;;  %v8541_v29 = vld [vmem:[%s9370_s7 + $0xa28] ss:$16 sps:$4 sm:$0xff]   ;;  %v8546_v30 = vld [vmem:[%s9370_s7 + $0xa44] ss:$16 sps:$4 sm:$0xff]  }
 0x3af   : > { %5570 = vmatprep.subr.bf16.mxu0 %v8454_v31  ;;  %5898 = vmatprep.subr.bf16.mxu1 %v8457_v32  ;;  %v8549_v31 = vld [vmem:[%s9370_s7 + $0xa4c] ss:$16 sps:$4 sm:$0xff]   ;;  %v8544_v32 = vld [vmem:[%s9370_s7 + $0xa40] ss:$16 sps:$4 sm:$0xff]  }
 0x3b2   : > { %5571 = vmatpush1.bf16.msra.mxu0 %v8452_v33  ;;  %5899 = vmatpush1.bf16.msra.mxu1 %v8455_v34  ;;  %v8547_v33 = vld [vmem:[%s9370_s7 + $0xa48] ss:$16 sps:$4 sm:$0xff]   ;;  %v8552_v34 = vld [vmem:[%s9370_s7 + $0xa64] ss:$16 sps:$4 sm:$0xff]  }
 0x3b3   : > { %5572 = vmatprep.subr.bf16.mxu0 %v8460_v35  ;;  %5900 = vmatprep.subr.bf16.mxu1 %v8463_v36  ;;  %v8555_v35 = vld [vmem:[%s9370_s7 + $0xa6c] ss:$16 sps:$4 sm:$0xff]   ;;  %v8550_v36 = vld [vmem:[%s9370_s7 + $0xa60] ss:$16 sps:$4 sm:$0xff]  }
 0x3b6   : > { %5573 = vmatpush1.bf16.msra.mxu0 %v8458_v37  ;;  %5901 = vmatpush1.bf16.msra.mxu1 %v8461_v38  ;;  %v8553_v37 = vld [vmem:[%s9370_s7 + $0xa68] ss:$16 sps:$4 sm:$0xff]   ;;  %v8558_v38 = vld [vmem:[%s9370_s7 + $0xa84] ss:$16 sps:$4 sm:$0xff]  }
 0x3b7   : > { %5574 = vmatprep.subr.bf16.mxu0 %v8466_v24  ;;  %5902 = vmatprep.subr.bf16.mxu1 %v8469_v39  ;;  %v8561_v24 = vld [vmem:[%s9370_s7 + $0xa8c] ss:$16 sps:$4 sm:$0xff]   ;;  %v8556_v39 = vld [vmem:[%s9370_s7 + $0xa80] ss:$16 sps:$4 sm:$0xff]  }
 0x3ba   : > { %5575 = vmatpush1.bf16.msra.mxu0 %v8464_v40  ;;  %5903 = vmatpush1.bf16.msra.mxu1 %v8467_v41  ;;  %v8559_v40 = vld [vmem:[%s9370_s7 + $0xa88] ss:$16 sps:$4 sm:$0xff]   ;;  %v8564_v41 = vld [vmem:[%s9370_s7 + $0xaa4] ss:$16 sps:$4 sm:$0xff]  }
 0x3bb   : > { %5576 = vmatprep.subr.bf16.mxu0 %v8472_v42  ;;  %5904 = vmatprep.subr.bf16.mxu1 %v8475_v43  ;;  %v8567_v42 = vld [vmem:[%s9370_s7 + $0xaac] ss:$16 sps:$4 sm:$0xff]   ;;  %v8562_v43 = vld [vmem:[%s9370_s7 + $0xaa0] ss:$16 sps:$4 sm:$0xff]  }
 0x3be   : > { %5577 = vmatpush1.bf16.msra.mxu0 %v8470_v44  ;;  %5905 = vmatpush1.bf16.msra.mxu1 %v8473_v45  ;;  %v8565_v44 = vld [vmem:[%s9370_s7 + $0xaa8] ss:$16 sps:$4 sm:$0xff]   ;;  %v8570_v45 = vld [vmem:[%s9370_s7 + $0xac4] ss:$16 sps:$4 sm:$0xff]  }
 0x3bf   : > { %5578 = vmatprep.subr.bf16.mxu0 %v8478_v46  ;;  %5906 = vmatprep.subr.bf16.mxu1 %v8481_v47  ;;  %v8573_v46 = vld [vmem:[%s9370_s7 + $0xacc] ss:$16 sps:$4 sm:$0xff]   ;;  %v8568_v47 = vld [vmem:[%s9370_s7 + $0xac0] ss:$16 sps:$4 sm:$0xff]  }
 0x3c2   : > { %5579 = vmatpush1.bf16.msra.mxu0 %v8476_v48  ;;  %5907 = vmatpush1.bf16.msra.mxu1 %v8479_v49  ;;  %v8571_v48 = vld [vmem:[%s9370_s7 + $0xac8] ss:$16 sps:$4 sm:$0xff]   ;;  %v8576_v49 = vld [vmem:[%s9370_s7 + $0xae4] ss:$16 sps:$4 sm:$0xff]  }
 0x3c3   : > { %5580 = vmatprep.subr.bf16.mxu0 %v8484_v50  ;;  %5908 = vmatprep.subr.bf16.mxu1 %v8487_v51  ;;  %v8579_v50 = vld [vmem:[%s9370_s7 + $0xaec] ss:$16 sps:$4 sm:$0xff]   ;;  %v8574_v51 = vld [vmem:[%s9370_s7 + $0xae0] ss:$16 sps:$4 sm:$0xff]  }
 0x3c6   : > { %5581 = vmatpush1.bf16.msra.mxu0 %v8482_v52  ;;  %5909 = vmatpush1.bf16.msra.mxu1 %v8485_v53  ;;  %v8577_v52 = vld [vmem:[%s9370_s7 + $0xae8] ss:$16 sps:$4 sm:$0xff]   ;;  %v8582_v53 = vld [vmem:[%s9370_s7 + $0xb04] ss:$16 sps:$4 sm:$0xff]  }
 0x3c7   : > { %5582 = vmatprep.subr.bf16.mxu0 %v8490_v54  ;;  %5910 = vmatprep.subr.bf16.mxu1 %v8493_v55  ;;  %v8585_v54 = vld [vmem:[%s9370_s7 + $0xb0c] ss:$16 sps:$4 sm:$0xff]   ;;  %v8580_v55 = vld [vmem:[%s9370_s7 + $0xb00] ss:$16 sps:$4 sm:$0xff]  }
 0x3ca   : > { %5583 = vmatpush1.bf16.msra.mxu0 %v8488_v56  ;;  %5911 = vmatpush1.bf16.msra.mxu1 %v8491_v57  ;;  %v8583_v56 = vld [vmem:[%s9370_s7 + $0xb08] ss:$16 sps:$4 sm:$0xff]   ;;  %v8588_v57 = vld [vmem:[%s9370_s7 + $0xb24] ss:$16 sps:$4 sm:$0xff]  }
 0x3cb   : > { %5584 = vmatprep.subr.bf16.mxu0 %v8496_v58  ;;  %5912 = vmatprep.subr.bf16.mxu1 %v8499_v59  ;;  %v8591_v58 = vld [vmem:[%s9370_s7 + $0xb2c] ss:$16 sps:$4 sm:$0xff]   ;;  %v8586_v59 = vld [vmem:[%s9370_s7 + $0xb20] ss:$16 sps:$4 sm:$0xff]  }
 0x3ce   : > { %5585 = vmatpush1.bf16.msra.mxu0 %v8494_v60  ;;  %5913 = vmatpush1.bf16.msra.mxu1 %v8497_v61  ;;  %v8589_v60 = vld [vmem:[%s9370_s7 + $0xb28] ss:$16 sps:$4 sm:$0xff]   ;;  %v8594_v61 = vld [vmem:[%s9370_s7 + $0xb44] ss:$16 sps:$4 sm:$0xff]  }
 0x3cf   : > { %5586 = vmatprep.subr.bf16.mxu0 %v8502_v62  ;;  %5914 = vmatprep.subr.bf16.mxu1 %v8505_v63  ;;  %v8597_v62 = vld [vmem:[%s9370_s7 + $0xb4c] ss:$16 sps:$4 sm:$0xff]   ;;  %v8592_v63 = vld [vmem:[%s9370_s7 + $0xb40] ss:$16 sps:$4 sm:$0xff]  }
 0x3d2   : > { %5587 = vmatpush1.bf16.msra.mxu0 %v8500_v0  ;;  %5915 = vmatpush1.bf16.msra.mxu1 %v8503_v2  ;;  %v8595_v0 = vld [vmem:[%s9370_s7 + $0xb48] ss:$16 sps:$4 sm:$0xff]   ;;  %v8600_v2 = vld [vmem:[%s9370_s7 + $0xb64] ss:$16 sps:$4 sm:$0xff]  }
 0x3d3   : > { %5588 = vmatprep.subr.bf16.mxu0 %v8508_v3  ;;  %5916 = vmatprep.subr.bf16.mxu1 %v8511_v4  ;;  %v8603_v3 = vld [vmem:[%s9370_s7 + $0xb6c] ss:$16 sps:$4 sm:$0xff]   ;;  %v8598_v4 = vld [vmem:[%s9370_s7 + $0xb60] ss:$16 sps:$4 sm:$0xff]  }
 0x3d6   : > { %5589 = vmatpush1.bf16.msra.mxu0 %v8506_v11  ;;  %5917 = vmatpush1.bf16.msra.mxu1 %v8509_v5  ;;  %v8601_v11 = vld [vmem:[%s9370_s7 + $0xb68] ss:$16 sps:$4 sm:$0xff]   ;;  %v8606_v5 = vld [vmem:[%s9370_s7 + $0xb84] ss:$16 sps:$4 sm:$0xff]  }
 0x3d7   : > { %5590 = vmatprep.subr.bf16.mxu0 %v8514_v6  ;;  %5918 = vmatprep.subr.bf16.mxu1 %v8517_v7  ;;  %v8609_v6 = vld [vmem:[%s9370_s7 + $0xb8c] ss:$16 sps:$4 sm:$0xff]   ;;  %v8604_v7 = vld [vmem:[%s9370_s7 + $0xb80] ss:$16 sps:$4 sm:$0xff]  }
 0x3da   : > { %5591 = vmatpush1.bf16.msra.mxu0 %v8512_v8  ;;  %5919 = vmatpush1.bf16.msra.mxu1 %v8515_v9  ;;  %v8607_v8 = vld [vmem:[%s9370_s7 + $0xb88] ss:$16 sps:$4 sm:$0xff]   ;;  %v8612_v9 = vld [vmem:[%s9370_s7 + $0xba4] ss:$16 sps:$4 sm:$0xff]  }
 0x3db   : > { %5592 = vmatprep.subr.bf16.mxu0 %v8520_v10  ;;  %5920 = vmatprep.subr.bf16.mxu1 %v8523_v12  ;;  %v8615_v10 = vld [vmem:[%s9370_s7 + $0xbac] ss:$16 sps:$4 sm:$0xff]   ;;  %v8610_v12 = vld [vmem:[%s9370_s7 + $0xba0] ss:$16 sps:$4 sm:$0xff]  }
 0x3de   : > { %5593 = vmatpush1.bf16.msra.mxu0 %v8518_v13  ;;  %5921 = vmatpush1.bf16.msra.mxu1 %v8521_v14  ;;  %v8613_v13 = vld [vmem:[%s9370_s7 + $0xba8] ss:$16 sps:$4 sm:$0xff]   ;;  %v8618_v14 = vld [vmem:[%s9370_s7 + $0xbc4] ss:$16 sps:$4 sm:$0xff]  }
 0x3df   : > { %5594 = vmatprep.subr.bf16.mxu0 %v8526_v15  ;;  %5922 = vmatprep.subr.bf16.mxu1 %v8529_v17  ;;  %v8621_v15 = vld [vmem:[%s9370_s7 + $0xbcc] ss:$16 sps:$4 sm:$0xff]   ;;  %v8616_v17 = vld [vmem:[%s9370_s7 + $0xbc0] ss:$16 sps:$4 sm:$0xff]  }
 0x3e2   : > { %5595 = vmatpush1.bf16.msra.mxu0 %v8524_v18  ;;  %5923 = vmatpush1.bf16.msra.mxu1 %v8527_v20  ;;  %v8619_v18 = vld [vmem:[%s9370_s7 + $0xbc8] ss:$16 sps:$4 sm:$0xff]   ;;  %v8624_v20 = vld [vmem:[%s9370_s7 + $0xbe4] ss:$16 sps:$4 sm:$0xff]  }
 0x3e3   : > { %5605 = vmatprep.subr.bf16.mxu0 %v8534_v21  ;;  %5933 = vmatprep.subr.bf16.mxu1 %v8537_v16  ;;  %v8627_v21 = vld [vmem:[%s9370_s7 + $0xbec] ss:$16 sps:$4 sm:$0xff]   ;;  %v8622_v16 = vld [vmem:[%s9370_s7 + $0xbe0] ss:$16 sps:$4 sm:$0xff]  }
 0x3e5   : > { %5597 = vmatmul.mubr.bf16.vlgmr.msra.gmra.mrb[0].mxu0 %v6699_v25  ;;  %5925 = vmatmul.mubr.bf16.vlgmr.msra.gmra.mrb[0].mxu1 %v6699_v25  ;;  %v8625_v25 = vld [vmem:[%s9370_s7 + $0xbe8] ss:$16 sps:$4 sm:$0xff]  }
 0x3e6   : > { %5606 = vmatpush1.bf16.msra.mxu0 %v8532_v26  ;;  %5934 = vmatpush1.bf16.msra.mxu1 %v8535_v19  ;;  %v8632_v26 = vld [vmem:[%s9370_s7 + $0xc04] ss:$16 sps:$4 sm:$0xff]   ;;  %v8635_v19 = vld [vmem:[%s9370_s7 + $0xc0c] ss:$16 sps:$4 sm:$0xff]  }
 0x3e7   : > { %5607 = vmatprep.subr.bf16.mxu0 %v8540_v27  ;;  %5935 = vmatprep.subr.bf16.mxu1 %v8543_v28  ;;  %v6701_v27 = vcombine.low %v9959_v23, %v9959_v23  ;;  %v10031_v28 = vld [vmem:[#allocation2 + $0x30] sm:$0xff]  ;;  %v8636_v23 = vld [vmem:[%s9370_s7 + $0xc20] ss:$16 sps:$4 sm:$0xff]  }
 0x3e8   : > { %5637 = vmatprep.mubr.bf16.mxu0 %v6702_v1  ;;  %5965 = vmatprep.mubr.bf16.mxu1 %v6702_v1  ;;  %v8630_v1 = vld [vmem:[%s9370_s7 + $0xc00] ss:$16 sps:$4 sm:$0xff]  }
 0x3ea   : > { %5608 = vmatpush1.bf16.msra.mxu0 %v8538_v22  ;;  %5936 = vmatpush1.bf16.msra.mxu1 %v8541_v29  ;;  %v8633_v22 = vld [vmem:[%s9370_s7 + $0xc08] ss:$16 sps:$4 sm:$0xff]   ;;  %v8638_v29 = vld [vmem:[%s9370_s7 + $0xc24] ss:$16 sps:$4 sm:$0xff]  }
 0x3eb   : > { %5609 = vmatprep.subr.bf16.mxu0 %v8546_v30  ;;  %5937 = vmatprep.subr.bf16.mxu1 %v8549_v31  ;;  %v8641_v30 = vld [vmem:[%s9370_s7 + $0xc2c] ss:$16 sps:$4 sm:$0xff]   ;;  %v6704_v31 = vcombine.high %v10031_v28, %v10031_v28 }
 0x3ee   : > { %5610 = vmatpush1.bf16.msra.mxu0 %v8544_v32  ;;  %5938 = vmatpush1.bf16.msra.mxu1 %v8547_v33  ;;  %v8639_v32 = vld [vmem:[%s9370_s7 + $0xc28] ss:$16 sps:$4 sm:$0xff]   ;;  %v8644_v33 = vld [vmem:[%s9370_s7 + $0xc44] ss:$16 sps:$4 sm:$0xff]  }
 0x3ef   : > { %5611 = vmatprep.subr.bf16.mxu0 %v8552_v34  ;;  %5939 = vmatprep.subr.bf16.mxu1 %v8555_v35  ;;  %v8647_v34 = vld [vmem:[%s9370_s7 + $0xc4c] ss:$16 sps:$4 sm:$0xff]   ;;  %v8642_v35 = vld [vmem:[%s9370_s7 + $0xc40] ss:$16 sps:$4 sm:$0xff]  }
 0x3f2   : > { %5612 = vmatpush1.bf16.msra.mxu0 %v8550_v36  ;;  %5940 = vmatpush1.bf16.msra.mxu1 %v8553_v37  ;;  %v8645_v36 = vld [vmem:[%s9370_s7 + $0xc48] ss:$16 sps:$4 sm:$0xff]   ;;  %v8650_v37 = vld [vmem:[%s9370_s7 + $0xc64] ss:$16 sps:$4 sm:$0xff]  }
 0x3f3   : > { %5613 = vmatprep.subr.bf16.mxu0 %v8558_v38  ;;  %5941 = vmatprep.subr.bf16.mxu1 %v8561_v24  ;;  %v8653_v38 = vld [vmem:[%s9370_s7 + $0xc6c] ss:$16 sps:$4 sm:$0xff]   ;;  %v8648_v24 = vld [vmem:[%s9370_s7 + $0xc60] ss:$16 sps:$4 sm:$0xff]  }
 0x3f6   : > { %5614 = vmatpush1.bf16.msra.mxu0 %v8556_v39  ;;  %5942 = vmatpush1.bf16.msra.mxu1 %v8559_v40  ;;  %v8651_v39 = vld [vmem:[%s9370_s7 + $0xc68] ss:$16 sps:$4 sm:$0xff]   ;;  %v8656_v40 = vld [vmem:[%s9370_s7 + $0xc84] ss:$16 sps:$4 sm:$0xff]  }
 0x3f7   : > { %5615 = vmatprep.subr.bf16.mxu0 %v8564_v41  ;;  %5943 = vmatprep.subr.bf16.mxu1 %v8567_v42  ;;  %v8659_v41 = vld [vmem:[%s9370_s7 + $0xc8c] ss:$16 sps:$4 sm:$0xff]   ;;  %v8654_v42 = vld [vmem:[%s9370_s7 + $0xc80] ss:$16 sps:$4 sm:$0xff]  }
 0x3fa   : > { %5616 = vmatpush1.bf16.msra.mxu0 %v8562_v43  ;;  %5944 = vmatpush1.bf16.msra.mxu1 %v8565_v44  ;;  %v8657_v43 = vld [vmem:[%s9370_s7 + $0xc88] ss:$16 sps:$4 sm:$0xff]   ;;  %v8662_v44 = vld [vmem:[%s9370_s7 + $0xca4] ss:$16 sps:$4 sm:$0xff]  }
 0x3fb   : > { %5617 = vmatprep.subr.bf16.mxu0 %v8570_v45  ;;  %5945 = vmatprep.subr.bf16.mxu1 %v8573_v46  ;;  %v8665_v45 = vld [vmem:[%s9370_s7 + $0xcac] ss:$16 sps:$4 sm:$0xff]   ;;  %v8660_v46 = vld [vmem:[%s9370_s7 + $0xca0] ss:$16 sps:$4 sm:$0xff]  }
 0x3fe   : > { %5618 = vmatpush1.bf16.msra.mxu0 %v8568_v47  ;;  %5946 = vmatpush1.bf16.msra.mxu1 %v8571_v48  ;;  %v8663_v47 = vld [vmem:[%s9370_s7 + $0xca8] ss:$16 sps:$4 sm:$0xff]   ;;  %v8668_v48 = vld [vmem:[%s9370_s7 + $0xcc4] ss:$16 sps:$4 sm:$0xff]  }
 0x3ff   : > { %5619 = vmatprep.subr.bf16.mxu0 %v8576_v49  ;;  %5947 = vmatprep.subr.bf16.mxu1 %v8579_v50  ;;  %v8671_v49 = vld [vmem:[%s9370_s7 + $0xccc] ss:$16 sps:$4 sm:$0xff]   ;;  %v8666_v50 = vld [vmem:[%s9370_s7 + $0xcc0] ss:$16 sps:$4 sm:$0xff]  }
 0x402   : > { %5620 = vmatpush1.bf16.msra.mxu0 %v8574_v51  ;;  %5948 = vmatpush1.bf16.msra.mxu1 %v8577_v52  ;;  %v8669_v51 = vld [vmem:[%s9370_s7 + $0xcc8] ss:$16 sps:$4 sm:$0xff]   ;;  %v8674_v52 = vld [vmem:[%s9370_s7 + $0xce4] ss:$16 sps:$4 sm:$0xff]  }
 0x403   : > { %5621 = vmatprep.subr.bf16.mxu0 %v8582_v53  ;;  %5949 = vmatprep.subr.bf16.mxu1 %v8585_v54  ;;  %v8677_v53 = vld [vmem:[%s9370_s7 + $0xcec] ss:$16 sps:$4 sm:$0xff]   ;;  %v8672_v54 = vld [vmem:[%s9370_s7 + $0xce0] ss:$16 sps:$4 sm:$0xff]  }
 0x406   : > { %5622 = vmatpush1.bf16.msra.mxu0 %v8580_v55  ;;  %5950 = vmatpush1.bf16.msra.mxu1 %v8583_v56  ;;  %v8675_v55 = vld [vmem:[%s9370_s7 + $0xce8] ss:$16 sps:$4 sm:$0xff]   ;;  %v8680_v56 = vld [vmem:[%s9370_s7 + $0xd04] ss:$16 sps:$4 sm:$0xff]  }
 0x407   : > { %5623 = vmatprep.subr.bf16.mxu0 %v8588_v57  ;;  %5951 = vmatprep.subr.bf16.mxu1 %v8591_v58  ;;  %v8683_v57 = vld [vmem:[%s9370_s7 + $0xd0c] ss:$16 sps:$4 sm:$0xff]   ;;  %v8678_v58 = vld [vmem:[%s9370_s7 + $0xd00] ss:$16 sps:$4 sm:$0xff]  }
 0x40a   : > { %5624 = vmatpush1.bf16.msra.mxu0 %v8586_v59  ;;  %5952 = vmatpush1.bf16.msra.mxu1 %v8589_v60  ;;  %v8681_v59 = vld [vmem:[%s9370_s7 + $0xd08] ss:$16 sps:$4 sm:$0xff]   ;;  %v8686_v60 = vld [vmem:[%s9370_s7 + $0xd24] ss:$16 sps:$4 sm:$0xff]  }
 0x40b   : > { %5625 = vmatprep.subr.bf16.mxu0 %v8594_v61  ;;  %5953 = vmatprep.subr.bf16.mxu1 %v8597_v62  ;;  %v8689_v61 = vld [vmem:[%s9370_s7 + $0xd2c] ss:$16 sps:$4 sm:$0xff]   ;;  %v8684_v62 = vld [vmem:[%s9370_s7 + $0xd20] ss:$16 sps:$4 sm:$0xff]  }
 0x40e   : > { %5626 = vmatpush1.bf16.msra.mxu0 %v8592_v63  ;;  %5954 = vmatpush1.bf16.msra.mxu1 %v8595_v0  ;;  %v8687_v63 = vld [vmem:[%s9370_s7 + $0xd28] ss:$16 sps:$4 sm:$0xff]   ;;  %v8692_v0 = vld [vmem:[%s9370_s7 + $0xd44] ss:$16 sps:$4 sm:$0xff]  }
 0x40f   : > { %5627 = vmatprep.subr.bf16.mxu0 %v8600_v2  ;;  %5955 = vmatprep.subr.bf16.mxu1 %v8603_v3  ;;  %v8695_v2 = vld [vmem:[%s9370_s7 + $0xd4c] ss:$16 sps:$4 sm:$0xff]   ;;  %v8690_v3 = vld [vmem:[%s9370_s7 + $0xd40] ss:$16 sps:$4 sm:$0xff]  }
 0x412   : > { %5628 = vmatpush1.bf16.msra.mxu0 %v8598_v4  ;;  %5956 = vmatpush1.bf16.msra.mxu1 %v8601_v11  ;;  %v8693_v4 = vld [vmem:[%s9370_s7 + $0xd48] ss:$16 sps:$4 sm:$0xff]   ;;  %v8698_v11 = vld [vmem:[%s9370_s7 + $0xd64] ss:$16 sps:$4 sm:$0xff]  }
 0x413   : > { %5629 = vmatprep.subr.bf16.mxu0 %v8606_v5  ;;  %5957 = vmatprep.subr.bf16.mxu1 %v8609_v6  ;;  %v8701_v5 = vld [vmem:[%s9370_s7 + $0xd6c] ss:$16 sps:$4 sm:$0xff]   ;;  %v8696_v6 = vld [vmem:[%s9370_s7 + $0xd60] ss:$16 sps:$4 sm:$0xff]  }
 0x416   : > { %5630 = vmatpush1.bf16.msra.mxu0 %v8604_v7  ;;  %5958 = vmatpush1.bf16.msra.mxu1 %v8607_v8  ;;  %v8699_v7 = vld [vmem:[%s9370_s7 + $0xd68] ss:$16 sps:$4 sm:$0xff]   ;;  %v8704_v8 = vld [vmem:[%s9370_s7 + $0xd84] ss:$16 sps:$4 sm:$0xff]  }
 0x417   : > { %5631 = vmatprep.subr.bf16.mxu0 %v8612_v9  ;;  %5959 = vmatprep.subr.bf16.mxu1 %v8615_v10  ;;  %v8707_v9 = vld [vmem:[%s9370_s7 + $0xd8c] ss:$16 sps:$4 sm:$0xff]   ;;  %v8702_v10 = vld [vmem:[%s9370_s7 + $0xd80] ss:$16 sps:$4 sm:$0xff]  }
 0x41a   : > { %5632 = vmatpush1.bf16.msra.mxu0 %v8610_v12  ;;  %5960 = vmatpush1.bf16.msra.mxu1 %v8613_v13  ;;  %v8705_v12 = vld [vmem:[%s9370_s7 + $0xd88] ss:$16 sps:$4 sm:$0xff]   ;;  %v8710_v13 = vld [vmem:[%s9370_s7 + $0xda4] ss:$16 sps:$4 sm:$0xff]  }
 0x41b   : > { %5633 = vmatprep.subr.bf16.mxu0 %v8618_v14  ;;  %5961 = vmatprep.subr.bf16.mxu1 %v8621_v15  ;;  %v8713_v14 = vld [vmem:[%s9370_s7 + $0xdac] ss:$16 sps:$4 sm:$0xff]   ;;  %v8708_v15 = vld [vmem:[%s9370_s7 + $0xda0] ss:$16 sps:$4 sm:$0xff]  }
 0x41e   : > { %5634 = vmatpush1.bf16.msra.mxu0 %v8616_v17  ;;  %5962 = vmatpush1.bf16.msra.mxu1 %v8619_v18  ;;  %v8711_v17 = vld [vmem:[%s9370_s7 + $0xda8] ss:$16 sps:$4 sm:$0xff]   ;;  %v8716_v18 = vld [vmem:[%s9370_s7 + $0xdc4] ss:$16 sps:$4 sm:$0xff]  }
 0x41f   : > { %5635 = vmatprep.subr.bf16.mxu0 %v8624_v20  ;;  %5963 = vmatprep.subr.bf16.mxu1 %v8627_v21  ;;  %v8719_v20 = vld [vmem:[%s9370_s7 + $0xdcc] ss:$16 sps:$4 sm:$0xff]   ;;  %v8714_v21 = vld [vmem:[%s9370_s7 + $0xdc0] ss:$16 sps:$4 sm:$0xff]  }
 0x422   : > { %5636 = vmatpush1.bf16.msra.mxu0 %v8622_v16  ;;  %5964 = vmatpush1.bf16.msra.mxu1 %v8625_v25  ;;  %v8717_v16 = vld [vmem:[%s9370_s7 + $0xdc8] ss:$16 sps:$4 sm:$0xff]   ;;  %v8722_v25 = vld [vmem:[%s9370_s7 + $0xde4] ss:$16 sps:$4 sm:$0xff]  }
 0x423   : > { %5646 = vmatprep.subr.bf16.mxu0 %v8632_v26  ;;  %5974 = vmatprep.subr.bf16.mxu1 %v8635_v19  ;;  %v8725_v26 = vld [vmem:[%s9370_s7 + $0xdec] ss:$16 sps:$4 sm:$0xff]   ;;  %v8720_v19 = vld [vmem:[%s9370_s7 + $0xde0] ss:$16 sps:$4 sm:$0xff]  }
 0x425   : > { %5638 = vmatmul.mubr.bf16.vlgmr.msra.gmra.mrb[0].mxu0 %v6701_v27  ;;  %5966 = vmatmul.mubr.bf16.vlgmr.msra.gmra.mrb[0].mxu1 %v6701_v27  ;;  %v8723_v27 = vld [vmem:[%s9370_s7 + $0xde8] ss:$16 sps:$4 sm:$0xff]  }
 0x426   : > { %5647 = vmatpush1.bf16.msra.mxu0 %v8630_v1  ;;  %5975 = vmatpush1.bf16.msra.mxu1 %v8633_v22  ;;  %v8730_v1 = vld [vmem:[%s9370_s7 + $0xe04] ss:$16 sps:$4 sm:$0xff]   ;;  %v8733_v22 = vld [vmem:[%s9370_s7 + $0xe0c] ss:$16 sps:$4 sm:$0xff]  }
 0x427   : > { %5648 = vmatprep.subr.bf16.mxu0 %v8638_v29  ;;  %5976 = vmatprep.subr.bf16.mxu1 %v8641_v30  ;;  %v6703_v29 = vcombine.low %v10031_v28, %v10031_v28  ;;  %v10101_v30 = vld [vmem:[#allocation2 + $0x38] sm:$0xff] }
 0x428   : > { %5678 = vmatprep.mubr.bf16.mxu0 %v6704_v31  ;;  %6006 = vmatprep.mubr.bf16.mxu1 %v6704_v31  ;;  %v8728_v31 = vld [vmem:[%s9370_s7 + $0xe00] ss:$16 sps:$4 sm:$0xff]  }
 0x429   : > { %v8734_v28 = vld [vmem:[%s9370_s7 + $0xe20] ss:$16 sps:$4 sm:$0xff]  }
 0x42a   : > { %5649 = vmatpush1.bf16.msra.mxu0 %v8636_v23  ;;  %5977 = vmatpush1.bf16.msra.mxu1 %v8639_v32  ;;  %v8731_v23 = vld [vmem:[%s9370_s7 + $0xe08] ss:$16 sps:$4 sm:$0xff]   ;;  %v8736_v32 = vld [vmem:[%s9370_s7 + $0xe24] ss:$16 sps:$4 sm:$0xff]  }
 0x42b   : > { %5650 = vmatprep.subr.bf16.mxu0 %v8644_v33  ;;  %5978 = vmatprep.subr.bf16.mxu1 %v8647_v34  ;;  %v8739_v33 = vld [vmem:[%s9370_s7 + $0xe2c] ss:$16 sps:$4 sm:$0xff]   ;;  %v6706_v34 = vcombine.high %v10101_v30, %v10101_v30 }
 0x42e   : > { %5651 = vmatpush1.bf16.msra.mxu0 %v8642_v35  ;;  %5979 = vmatpush1.bf16.msra.mxu1 %v8645_v36  ;;  %v8737_v35 = vld [vmem:[%s9370_s7 + $0xe28] ss:$16 sps:$4 sm:$0xff]   ;;  %v8742_v36 = vld [vmem:[%s9370_s7 + $0xe44] ss:$16 sps:$4 sm:$0xff]  }
 0x42f   : > { %5652 = vmatprep.subr.bf16.mxu0 %v8650_v37  ;;  %5980 = vmatprep.subr.bf16.mxu1 %v8653_v38  ;;  %v8745_v37 = vld [vmem:[%s9370_s7 + $0xe4c] ss:$16 sps:$4 sm:$0xff]   ;;  %v8740_v38 = vld [vmem:[%s9370_s7 + $0xe40] ss:$16 sps:$4 sm:$0xff]  }
 0x432   : > { %5653 = vmatpush1.bf16.msra.mxu0 %v8648_v24  ;;  %5981 = vmatpush1.bf16.msra.mxu1 %v8651_v39  ;;  %v8743_v24 = vld [vmem:[%s9370_s7 + $0xe48] ss:$16 sps:$4 sm:$0xff]   ;;  %v8748_v39 = vld [vmem:[%s9370_s7 + $0xe64] ss:$16 sps:$4 sm:$0xff]  }
 0x433   : > { %5654 = vmatprep.subr.bf16.mxu0 %v8656_v40  ;;  %5982 = vmatprep.subr.bf16.mxu1 %v8659_v41  ;;  %v8751_v40 = vld [vmem:[%s9370_s7 + $0xe6c] ss:$16 sps:$4 sm:$0xff]   ;;  %v8746_v41 = vld [vmem:[%s9370_s7 + $0xe60] ss:$16 sps:$4 sm:$0xff]  }
 0x436   : > { %5655 = vmatpush1.bf16.msra.mxu0 %v8654_v42  ;;  %5983 = vmatpush1.bf16.msra.mxu1 %v8657_v43  ;;  %v8749_v42 = vld [vmem:[%s9370_s7 + $0xe68] ss:$16 sps:$4 sm:$0xff]   ;;  %v8754_v43 = vld [vmem:[%s9370_s7 + $0xe84] ss:$16 sps:$4 sm:$0xff]  }
 0x437   : > { %5656 = vmatprep.subr.bf16.mxu0 %v8662_v44  ;;  %5984 = vmatprep.subr.bf16.mxu1 %v8665_v45  ;;  %v8757_v44 = vld [vmem:[%s9370_s7 + $0xe8c] ss:$16 sps:$4 sm:$0xff]   ;;  %v8752_v45 = vld [vmem:[%s9370_s7 + $0xe80] ss:$16 sps:$4 sm:$0xff]  }
 0x43a   : > { %5657 = vmatpush1.bf16.msra.mxu0 %v8660_v46  ;;  %5985 = vmatpush1.bf16.msra.mxu1 %v8663_v47  ;;  %v8755_v46 = vld [vmem:[%s9370_s7 + $0xe88] ss:$16 sps:$4 sm:$0xff]   ;;  %v8760_v47 = vld [vmem:[%s9370_s7 + $0xea4] ss:$16 sps:$4 sm:$0xff]  }
 0x43b   : > { %5658 = vmatprep.subr.bf16.mxu0 %v8668_v48  ;;  %5986 = vmatprep.subr.bf16.mxu1 %v8671_v49  ;;  %v8763_v48 = vld [vmem:[%s9370_s7 + $0xeac] ss:$16 sps:$4 sm:$0xff]   ;;  %v8758_v49 = vld [vmem:[%s9370_s7 + $0xea0] ss:$16 sps:$4 sm:$0xff]  }
 0x43e   : > { %5659 = vmatpush1.bf16.msra.mxu0 %v8666_v50  ;;  %5987 = vmatpush1.bf16.msra.mxu1 %v8669_v51  ;;  %v8761_v50 = vld [vmem:[%s9370_s7 + $0xea8] ss:$16 sps:$4 sm:$0xff]   ;;  %v8766_v51 = vld [vmem:[%s9370_s7 + $0xec4] ss:$16 sps:$4 sm:$0xff]  }
 0x43f   : > { %5660 = vmatprep.subr.bf16.mxu0 %v8674_v52  ;;  %5988 = vmatprep.subr.bf16.mxu1 %v8677_v53  ;;  %v8769_v52 = vld [vmem:[%s9370_s7 + $0xecc] ss:$16 sps:$4 sm:$0xff]   ;;  %v8764_v53 = vld [vmem:[%s9370_s7 + $0xec0] ss:$16 sps:$4 sm:$0xff]  }
 0x442   : > { %5661 = vmatpush1.bf16.msra.mxu0 %v8672_v54  ;;  %5989 = vmatpush1.bf16.msra.mxu1 %v8675_v55  ;;  %v8767_v54 = vld [vmem:[%s9370_s7 + $0xec8] ss:$16 sps:$4 sm:$0xff]   ;;  %v8772_v55 = vld [vmem:[%s9370_s7 + $0xee4] ss:$16 sps:$4 sm:$0xff]  }
 0x443   : > { %5662 = vmatprep.subr.bf16.mxu0 %v8680_v56  ;;  %5990 = vmatprep.subr.bf16.mxu1 %v8683_v57  ;;  %v8775_v56 = vld [vmem:[%s9370_s7 + $0xeec] ss:$16 sps:$4 sm:$0xff]   ;;  %v8770_v57 = vld [vmem:[%s9370_s7 + $0xee0] ss:$16 sps:$4 sm:$0xff]  }
 0x446   : > { %5663 = vmatpush1.bf16.msra.mxu0 %v8678_v58  ;;  %5991 = vmatpush1.bf16.msra.mxu1 %v8681_v59  ;;  %v8773_v58 = vld [vmem:[%s9370_s7 + $0xee8] ss:$16 sps:$4 sm:$0xff]   ;;  %v8778_v59 = vld [vmem:[%s9370_s7 + $0xf04] ss:$16 sps:$4 sm:$0xff]  }
 0x447   : > { %5664 = vmatprep.subr.bf16.mxu0 %v8686_v60  ;;  %5992 = vmatprep.subr.bf16.mxu1 %v8689_v61  ;;  %v8781_v60 = vld [vmem:[%s9370_s7 + $0xf0c] ss:$16 sps:$4 sm:$0xff]   ;;  %v8776_v61 = vld [vmem:[%s9370_s7 + $0xf00] ss:$16 sps:$4 sm:$0xff]  }
 0x44a   : > { %5665 = vmatpush1.bf16.msra.mxu0 %v8684_v62  ;;  %5993 = vmatpush1.bf16.msra.mxu1 %v8687_v63  ;;  %v8779_v62 = vld [vmem:[%s9370_s7 + $0xf08] ss:$16 sps:$4 sm:$0xff]   ;;  %v8784_v63 = vld [vmem:[%s9370_s7 + $0xf24] ss:$16 sps:$4 sm:$0xff]  }
 0x44b   : > { %5666 = vmatprep.subr.bf16.mxu0 %v8692_v0  ;;  %5994 = vmatprep.subr.bf16.mxu1 %v8695_v2  ;;  %v8787_v0 = vld [vmem:[%s9370_s7 + $0xf2c] ss:$16 sps:$4 sm:$0xff]   ;;  %v8782_v2 = vld [vmem:[%s9370_s7 + $0xf20] ss:$16 sps:$4 sm:$0xff]  }
 0x44e   : > { %5667 = vmatpush1.bf16.msra.mxu0 %v8690_v3  ;;  %5995 = vmatpush1.bf16.msra.mxu1 %v8693_v4  ;;  %v8785_v3 = vld [vmem:[%s9370_s7 + $0xf28] ss:$16 sps:$4 sm:$0xff]   ;;  %v8790_v4 = vld [vmem:[%s9370_s7 + $0xf44] ss:$16 sps:$4 sm:$0xff]  }
 0x44f   : > { %5668 = vmatprep.subr.bf16.mxu0 %v8698_v11  ;;  %5996 = vmatprep.subr.bf16.mxu1 %v8701_v5  ;;  %v8793_v11 = vld [vmem:[%s9370_s7 + $0xf4c] ss:$16 sps:$4 sm:$0xff]   ;;  %v8788_v5 = vld [vmem:[%s9370_s7 + $0xf40] ss:$16 sps:$4 sm:$0xff]  }
 0x452   : > { %5669 = vmatpush1.bf16.msra.mxu0 %v8696_v6  ;;  %5997 = vmatpush1.bf16.msra.mxu1 %v8699_v7  ;;  %v8791_v6 = vld [vmem:[%s9370_s7 + $0xf48] ss:$16 sps:$4 sm:$0xff]   ;;  %v8796_v7 = vld [vmem:[%s9370_s7 + $0xf64] ss:$16 sps:$4 sm:$0xff]  }
 0x453   : > { %5670 = vmatprep.subr.bf16.mxu0 %v8704_v8  ;;  %5998 = vmatprep.subr.bf16.mxu1 %v8707_v9  ;;  %v8799_v8 = vld [vmem:[%s9370_s7 + $0xf6c] ss:$16 sps:$4 sm:$0xff]   ;;  %v8794_v9 = vld [vmem:[%s9370_s7 + $0xf60] ss:$16 sps:$4 sm:$0xff]  }
 0x456   : > { %5671 = vmatpush1.bf16.msra.mxu0 %v8702_v10  ;;  %5999 = vmatpush1.bf16.msra.mxu1 %v8705_v12  ;;  %v8797_v10 = vld [vmem:[%s9370_s7 + $0xf68] ss:$16 sps:$4 sm:$0xff]   ;;  %v8802_v12 = vld [vmem:[%s9370_s7 + $0xf84] ss:$16 sps:$4 sm:$0xff]  }
 0x457   : > { %5672 = vmatprep.subr.bf16.mxu0 %v8710_v13  ;;  %6000 = vmatprep.subr.bf16.mxu1 %v8713_v14  ;;  %v8805_v13 = vld [vmem:[%s9370_s7 + $0xf8c] ss:$16 sps:$4 sm:$0xff]   ;;  %v8800_v14 = vld [vmem:[%s9370_s7 + $0xf80] ss:$16 sps:$4 sm:$0xff]  }
 0x45a   : > { %5673 = vmatpush1.bf16.msra.mxu0 %v8708_v15  ;;  %6001 = vmatpush1.bf16.msra.mxu1 %v8711_v17  ;;  %v8803_v15 = vld [vmem:[%s9370_s7 + $0xf88] ss:$16 sps:$4 sm:$0xff]   ;;  %v8808_v17 = vld [vmem:[%s9370_s7 + $0xfa4] ss:$16 sps:$4 sm:$0xff]  }
 0x45b   : > { %5674 = vmatprep.subr.bf16.mxu0 %v8716_v18  ;;  %6002 = vmatprep.subr.bf16.mxu1 %v8719_v20  ;;  %v8811_v18 = vld [vmem:[%s9370_s7 + $0xfac] ss:$16 sps:$4 sm:$0xff]   ;;  %v8806_v20 = vld [vmem:[%s9370_s7 + $0xfa0] ss:$16 sps:$4 sm:$0xff]  }
 0x45e   : > { %5675 = vmatpush1.bf16.msra.mxu0 %v8714_v21  ;;  %6003 = vmatpush1.bf16.msra.mxu1 %v8717_v16  ;;  %v8809_v21 = vld [vmem:[%s9370_s7 + $0xfa8] ss:$16 sps:$4 sm:$0xff]   ;;  %v8814_v16 = vld [vmem:[%s9370_s7 + $0xfc4] ss:$16 sps:$4 sm:$0xff]  }
 0x45f   : > { %5676 = vmatprep.subr.bf16.mxu0 %v8722_v25  ;;  %6004 = vmatprep.subr.bf16.mxu1 %v8725_v26  ;;  %v8817_v25 = vld [vmem:[%s9370_s7 + $0xfcc] ss:$16 sps:$4 sm:$0xff]   ;;  %v8812_v26 = vld [vmem:[%s9370_s7 + $0xfc0] ss:$16 sps:$4 sm:$0xff]  }
 0x462   : > { %5677 = vmatpush1.bf16.msra.mxu0 %v8720_v19  ;;  %6005 = vmatpush1.bf16.msra.mxu1 %v8723_v27  ;;  %v8815_v19 = vld [vmem:[%s9370_s7 + $0xfc8] ss:$16 sps:$4 sm:$0xff]   ;;  %v8820_v27 = vld [vmem:[%s9370_s7 + $0xfe4] ss:$16 sps:$4 sm:$0xff]  }
 0x463   : > { %5687 = vmatprep.subr.bf16.mxu0 %v8730_v1  ;;  %6015 = vmatprep.subr.bf16.mxu1 %v8733_v22  ;;  %v8823_v1 = vld [vmem:[%s9370_s7 + $0xfec] ss:$16 sps:$4 sm:$0xff]   ;;  %v8818_v22 = vld [vmem:[%s9370_s7 + $0xfe0] ss:$16 sps:$4 sm:$0xff]  }
 0x465   : > { %5679 = vmatmul.mubr.bf16.vlgmr.msra.gmra.mrb[0].mxu0 %v6703_v29  ;;  %6007 = vmatmul.mubr.bf16.vlgmr.msra.gmra.mrb[0].mxu1 %v6703_v29  ;;  %v8821_v29 = vld [vmem:[%s9370_s7 + $0xfe8] ss:$16 sps:$4 sm:$0xff]  }
 0x466   : > { %5688 = vmatpush1.bf16.msra.mxu0 %v8728_v31  ;;  %6016 = vmatpush1.bf16.msra.mxu1 %v8731_v23  ;;  %v8826_v31 = vld [vmem:[%s9378_s21 + $0x40] sm:$0xff]  }
 0x467   : > { %5689 = vmatprep.subr.bf16.mxu0 %v8736_v32  ;;  %6017 = vmatprep.subr.bf16.mxu1 %v8739_v33  ;;  %v8827_v23 = vld [vmem:[%s9378_s21 + $0xc0] sm:$0xff]   ;;  %v6705_v32 = vcombine.low %v10101_v30, %v10101_v30  ;;  %v8833_v30 = vld [vmem:[%s9378_s21 + $0x88] sm:$0xff]  }
 0x468   : > { %5719 = vmatprep.mubr.bf16.mxu0 %v6706_v34  ;;  %6047 = vmatprep.mubr.bf16.mxu1 %v6706_v34  ;;  %v8828_v33 = vld [vmem:[%s9378_s21] sm:$0xff]  }
 0x469   : > { %v8829_v34 = vld [vmem:[%s9378_s21 + $0x80] sm:$0xff]  }
 0x46a   : > { %5690 = vmatpush1.bf16.msra.mxu0 %v8734_v28  ;;  %6018 = vmatpush1.bf16.msra.mxu1 %v8737_v35  ;;  %v8830_v28 = vld [vmem:[%s9378_s21 + $0x48] sm:$0xff]  }
 0x46b   : > { %5691 = vmatprep.subr.bf16.mxu0 %v8742_v36  ;;  %6019 = vmatprep.subr.bf16.mxu1 %v8745_v37  ;;  %v8831_v35 = vld [vmem:[%s9378_s21 + $0xc8] sm:$0xff]   ;;  %v8834_v37 = vld [vmem:[%s9378_s21 + $0x50] sm:$0xff]  }
 0x46c   : > { %v8832_v36 = vld [vmem:[%s9378_s21 + $0x8] sm:$0xff]  }
 0x46e   : > { %5692 = vmatpush1.bf16.msra.mxu0 %v8740_v38  ;;  %6020 = vmatpush1.bf16.msra.mxu1 %v8743_v24  ;;  %v8835_v38 = vld [vmem:[%s9378_s21 + $0xd0] sm:$0xff]  }
 0x46f   : > { %5693 = vmatprep.subr.bf16.mxu0 %v8748_v39  ;;  %6021 = vmatprep.subr.bf16.mxu1 %v8751_v40  ;;  %v8836_v24 = vld [vmem:[%s9378_s21 + $0x10] sm:$0xff]   ;;  %v8838_v40 = vld [vmem:[%s9378_s21 + $0x58] sm:$0xff]  }
 0x470   : > { %v8837_v39 = vld [vmem:[%s9378_s21 + $0x90] sm:$0xff]  }
 0x472   : > { %5694 = vmatpush1.bf16.msra.mxu0 %v8746_v41  ;;  %6022 = vmatpush1.bf16.msra.mxu1 %v8749_v42  ;;  %v8839_v41 = vld [vmem:[%s9378_s21 + $0xd8] sm:$0xff]  }
 0x473   : > { %5695 = vmatprep.subr.bf16.mxu0 %v8754_v43  ;;  %6023 = vmatprep.subr.bf16.mxu1 %v8757_v44  ;;  %v8840_v42 = vld [vmem:[%s9378_s21 + $0x18] sm:$0xff]   ;;  %v8842_v44 = vld [vmem:[%s9378_s21 + $0x60] sm:$0xff]  }
 0x474   : > { %v8841_v43 = vld [vmem:[%s9378_s21 + $0x98] sm:$0xff]  }
 0x476   : > { %5696 = vmatpush1.bf16.msra.mxu0 %v8752_v45  ;;  %6024 = vmatpush1.bf16.msra.mxu1 %v8755_v46  ;;  %v8843_v45 = vld [vmem:[%s9378_s21 + $0xe0] sm:$0xff]  }
 0x477   : > { %5697 = vmatprep.subr.bf16.mxu0 %v8760_v47  ;;  %6025 = vmatprep.subr.bf16.mxu1 %v8763_v48  ;;  %v8844_v46 = vld [vmem:[%s9378_s21 + $0x20] sm:$0xff]   ;;  %v8846_v48 = vld [vmem:[%s9378_s21 + $0x68] sm:$0xff]  }
 0x478   : > { %v8845_v47 = vld [vmem:[%s9378_s21 + $0xa0] sm:$0xff]  }
 0x47a   : > { %5698 = vmatpush1.bf16.msra.mxu0 %v8758_v49  ;;  %6026 = vmatpush1.bf16.msra.mxu1 %v8761_v50  ;;  %v8847_v49 = vld [vmem:[%s9378_s21 + $0xe8] sm:$0xff]  }
 0x47b   : > { %5699 = vmatprep.subr.bf16.mxu0 %v8766_v51  ;;  %6027 = vmatprep.subr.bf16.mxu1 %v8769_v52  ;;  %v8848_v50 = vld [vmem:[%s9378_s21 + $0x28] sm:$0xff]   ;;  %v8850_v52 = vld [vmem:[%s9378_s21 + $0x70] sm:$0xff]  }
 0x47c   : > { %v8849_v51 = vld [vmem:[%s9378_s21 + $0xa8] sm:$0xff]  }
 0x47e   : > { %5700 = vmatpush1.bf16.msra.mxu0 %v8764_v53  ;;  %6028 = vmatpush1.bf16.msra.mxu1 %v8767_v54  ;;  %v8851_v53 = vld [vmem:[%s9378_s21 + $0xf0] sm:$0xff]  }
 0x47f   : > { %5701 = vmatprep.subr.bf16.mxu0 %v8772_v55  ;;  %6029 = vmatprep.subr.bf16.mxu1 %v8775_v56  ;;  %v8852_v54 = vld [vmem:[%s9378_s21 + $0x30] sm:$0xff]   ;;  %v8854_v56 = vld [vmem:[%s9378_s21 + $0x78] sm:$0xff]  }
 0x480   : > { %v8853_v55 = vld [vmem:[%s9378_s21 + $0xb0] sm:$0xff]  }
 0x482   : > { %5702 = vmatpush1.bf16.msra.mxu0 %v8770_v57  ;;  %6030 = vmatpush1.bf16.msra.mxu1 %v8773_v58  ;;  %v8855_v57 = vld [vmem:[%s9378_s21 + $0xf8] sm:$0xff]  }
 0x483   : > { %5703 = vmatprep.subr.bf16.mxu0 %v8778_v59  ;;  %6031 = vmatprep.subr.bf16.mxu1 %v8781_v60  ;;  %v8856_v58 = vld [vmem:[%s9378_s21 + $0x38] sm:$0xff]   ;;  %v2764_v60 = vlaneseq }
 0x484   : > { %v8857_v59 = vld [vmem:[%s9378_s21 + $0xb8] sm:$0xff]   ;;  %s10275_s21 = sld [smem:[#allocation21_spill]] (!%p7251_p2) }
 0x486   : > { %5704 = vmatpush1.bf16.msra.mxu0 %v8776_v61  ;;  %6032 = vmatpush1.bf16.msra.mxu1 %v8779_v62  ;;  %v2765_v61 = vshrl.u32 %v2764_v60, 7 }
 0x487   : > { %5705 = vmatprep.subr.bf16.mxu0 %v8784_v63  ;;  %6033 = vmatprep.subr.bf16.mxu1 %v8787_v0  ;;  %v2762_v0 = vld [vmem:[%s9376_s1] sm:$0xf] }
 0x488   : > { %v2766_v62 = vsub.s32 0, %v2765_v61  ;;  %v2774_v63 = vsub.s32 2, %v2765_v61 }
 0x48a   : > { %5706 = vmatpush1.bf16.msra.mxu0 %v8782_v2  ;;  %6034 = vmatpush1.bf16.msra.mxu1 %v8785_v3  ;;  %v2770_v2 = vsub.s32 1, %v2765_v61  ;;  %v2778_v3 = vsub.s32 3, %v2765_v61 }
 0x48b   : > { %5707 = vmatprep.subr.bf16.mxu0 %v8790_v4  ;;  %6035 = vmatprep.subr.bf16.mxu1 %v8793_v11  ;;  %v2767_v4 = vrot.slane %v2762_v0, %v2766_v62  ;;  %v2775_v11 = vrot.slane %v2762_v0, %v2774_v63 }
 0x48e   : > { %5708 = vmatpush1.bf16.msra.mxu0 %v8788_v5  ;;  %6036 = vmatpush1.bf16.msra.mxu1 %v8791_v6  ;;  %v2771_v5 = vrot.slane %v2762_v0, %v2770_v2  ;;  %v2779_v6 = vrot.slane %v2762_v0, %v2778_v3 }
 0x48f   : > { %5709 = vmatprep.subr.bf16.mxu0 %v8796_v7  ;;  %6037 = vmatprep.subr.bf16.mxu1 %v8799_v8 }
 0x492   : > { %5710 = vmatpush1.bf16.msra.mxu0 %v8794_v9  ;;  %6038 = vmatpush1.bf16.msra.mxu1 %v8797_v10 }
 0x493   : > { %5711 = vmatprep.subr.bf16.mxu0 %v8802_v12  ;;  %6039 = vmatprep.subr.bf16.mxu1 %v8805_v13 }
 0x496   : > { %5712 = vmatpush1.bf16.msra.mxu0 %v8800_v14  ;;  %6040 = vmatpush1.bf16.msra.mxu1 %v8803_v15 }
 0x497   : > { %5713 = vmatprep.subr.bf16.mxu0 %v8808_v17  ;;  %6041 = vmatprep.subr.bf16.mxu1 %v8811_v18 }
 0x49a   : > { %5714 = vmatpush1.bf16.msra.mxu0 %v8806_v20  ;;  %6042 = vmatpush1.bf16.msra.mxu1 %v8809_v21 }
 0x49b   : > { %5715 = vmatprep.subr.bf16.mxu0 %v8814_v16  ;;  %6043 = vmatprep.subr.bf16.mxu1 %v8817_v25 }
 0x49e   : > { %5716 = vmatpush1.bf16.msra.mxu0 %v8812_v26  ;;  %6044 = vmatpush1.bf16.msra.mxu1 %v8815_v19 }
 0x49f   : > { %5717 = vmatprep.subr.bf16.mxu0 %v8820_v27  ;;  %6045 = vmatprep.subr.bf16.mxu1 %v8823_v1 }
 0x4a2   : > { %5718 = vmatpush1.bf16.msra.mxu0 %v8818_v22  ;;  %6046 = vmatpush1.bf16.msra.mxu1 %v8821_v29 }
 0x4a3   : > { %7402 = vmatprep.subr.bf16.mxu0 %v8826_v31  ;;  %7424 = vmatprep.subr.bf16.mxu1 %v8827_v23 }
 0x4a5   : > { %5720 = vmatmul.mubr.bf16.vlgmr.msra.gmra.mrb[0].mxu0 %v6705_v32  ;;  %6048 = vmatmul.mubr.bf16.vlgmr.msra.gmra.mrb[0].mxu1 %v6705_v32 }
 0x4a6   : > { %7403 = vmatpush3.bf16.msra.mxu0 %v8828_v33  ;;  %7425 = vmatpush3.bf16.msra.mxu1 %v8829_v34 }
 0x4a7   : > { %7404 = vmatprep.subr.bf16.mxu0 %v8830_v28  ;;  %7426 = vmatprep.subr.bf16.mxu1 %v8831_v35 }
 0x4aa   : > { %7405 = vmatpush3.bf16.msra.mxu0 %v8832_v36  ;;  %7427 = vmatpush3.bf16.msra.mxu1 %v8833_v30  ;;  %v6064_v30 = vld [vmem:[#allocation3] sm:$0xff] }
 0x4ab   : > { %7406 = vmatprep.subr.bf16.mxu0 %v8834_v37  ;;  %7428 = vmatprep.subr.bf16.mxu1 %v8835_v38 }
 0x4ae   : > { %7407 = vmatpush3.bf16.msra.mxu0 %v8836_v24  ;;  %7429 = vmatpush3.bf16.msra.mxu1 %v8837_v39 }
 0x4af   : > { %7408 = vmatprep.subr.bf16.mxu0 %v8838_v40  ;;  %7430 = vmatprep.subr.bf16.mxu1 %v8839_v41  ;;  %v7252_v41 = vld [vmem:[#allocation11] ss:$0 sm:$0xff] (!%p7251_p2) }
 0x4b2   : > { %7409 = vmatpush3.bf16.msra.mxu0 %v8840_v42  ;;  %7431 = vmatpush3.bf16.msra.mxu1 %v8841_v43 }
 0x4b3   : > { %7410 = vmatprep.subr.bf16.mxu0 %v8842_v44  ;;  %7432 = vmatprep.subr.bf16.mxu1 %v8843_v45 }
 0x4b6   : > { %7411 = vmatpush3.bf16.msra.mxu0 %v8844_v46  ;;  %7433 = vmatpush3.bf16.msra.mxu1 %v8845_v47 }
 0x4b7   : > { %7412 = vmatprep.subr.bf16.mxu0 %v8846_v48  ;;  %7434 = vmatprep.subr.bf16.mxu1 %v8847_v49 }
 0x4ba   : > { %7413 = vmatpush3.bf16.msra.mxu0 %v8848_v50  ;;  %7435 = vmatpush3.bf16.msra.mxu1 %v8849_v51 }
 0x4bb   : > { %7414 = vmatprep.subr.bf16.mxu0 %v8850_v52  ;;  %7436 = vmatprep.subr.bf16.mxu1 %v8851_v53 }
 0x4be   : > { %7415 = vmatpush3.bf16.msra.mxu0 %v8852_v54  ;;  %7437 = vmatpush3.bf16.msra.mxu1 %v8853_v55 }
 0x4bf   : > { %7416 = vmatprep.subr.bf16.mxu0 %v8854_v56  ;;  %7438 = vmatprep.subr.bf16.mxu1 %v8855_v57 }
 0x4c2   : > { %7417 = vmatpush3.bf16.msra.mxu0 %v8856_v58  ;;  %7439 = vmatpush3.bf16.msra.mxu1 %v8857_v59 }
 0x578   : > { %v5721_v7 = vpop.f32.mrb[0].mxu0  ;;  %v6049_v8 = vpop.f32.mrb[0].mxu1 }
 0x579   : > { %v7766_v9 = vadd.f32 %v5721_v7, %v2767_v4  ;;  %v7768_v10 = vadd.f32 %v6049_v8, %v2775_v11  ;;  %v5723_v12 = vpop.f32.mrb[1].mxu0  ;;  %v6051_v13 = vpop.f32.mrb[1].mxu1 }
 0x57a   : > { %v7767_v14 = vadd.f32 %v5723_v12, %v2771_v5  ;;  %v7769_v15 = vadd.f32 %v6051_v13, %v2779_v6  ;;  %v5725_v17 = vpop.f32.mrb[2].mxu0  ;;  %v6053_v18 = vpop.f32.mrb[2].mxu1 }
 0x57b   : > { %v6056_v20 = vmax.f32 %v7766_v9, 0.0  ;;  %v6058_v21 = vmax.f32 %v7768_v10, 0.0  ;;  %v5726_v16 = vpop.f32.mrb[3].mxu0  ;;  %v6054_v25 = vpop.f32.mrb[3].mxu1 }
 0x57c   : > { %v6057_v26 = vmax.f32 %v7767_v14, 0.0  ;;  %v6059_v19 = vmax.f32 %v7769_v15, 0.0 }
 0x57d   : > { %v6060_v22 = vpack.c.bf16 %v6056_v20, %v6056_v20  ;;  %v6062_v29 = vpack.c.bf16 %v6058_v21, %v6058_v21 }
 0x57e   : > { %v6061_v27 = vpack.c.bf16 %v6057_v26, %v6057_v26  ;;  %v6063_v1 = vpack.c.bf16 %v6059_v19, %v6059_v19 }
 0x580   : > { %6353 = vmatprep.mubr.bf16.mxu0 %v6061_v27  ;;  %6393 = vmatprep.mubr.bf16.mxu1 %v6063_v1 }
 0x581   : > { %6354 = vmatmul.mubr.bf16.vlgmr.msra.gmra.mrb[4].mxu0 %v6060_v22  ;;  %6394 = vmatmul.mubr.bf16.vlgmr.msra.gmra.mrb[4].mxu1 %v6062_v29 }
 0x654   : > { %v7418_v31 = vpop.f32.mrb[4].mxu0  ;;  %v7440_v23 = vpop.f32.mrb[4].mxu1 }
 0x655   : > { %v7419_v32 = vpop.f32.mrb[5].mxu0  ;;  %v7441_v33 = vpop.f32.mrb[5].mxu1 }
 0x656   : > { %v7420_v34 = vadd.f32 %v7419_v32, %v7418_v31  ;;  %v7442_v28 = vadd.f32 %v7441_v33, %v7440_v23  ;;  %v7421_v35 = vpop.f32.mrb[6].mxu0  ;;  %v7443_v36 = vpop.f32.mrb[6].mxu1  ;;  %6406 = sbr.rel (%p7251_p2) target bundleno = 1639 (0x667), region = 80 }
 0x657   : > { %v7422_v37 = vpop.f32.mrb[7].mxu0  ;;  %v7444_v38 = vpop.f32.mrb[7].mxu1 }
 0x658   : > { %v6396_v24 = vadd.f32 %v7442_v28, %v7420_v34 }
 0x65a   : > { %v6401_v39 = vadd.f32 %v6396_v24, %v6064_v30 }
 0x65c   : > { %6402 = vst [vmem:[#allocation3] sm:$0xff] %v6401_v39 }
 0x663   : > { %v6407_v40 = vld [vmem:[#allocation3] sm:$0xff] }
 0x664   : > { %v6415_v42 = vadd.f32 %v7252_v41, %v6407_v40 }
 0x666   : > { %6416 = vst [vmem:[%s10275_s21] sm:$0xff] %v6415_v42 }
 0x667 PF: > { %s10276_s27 = sld [smem:[#allocation17_spill]]  ;;  %s10277_s23 = sld [smem:[#allocation16_spill]] }
 0x668   : > { %s10278_s26 = sld [smem:[#allocation18_spill]]  ;;  %s10279_s24 = smov %s9070_s25 }
 0x66d   : > { %p16_p7 = scmp.ge.s32.totalorder %s10276_s27, 4   ;;  %s10280_s25 = smov %s10277_s23 }
 0x66f   :  { %18 = sbr.rel (!%p16_p7) target bundleno = 7 (0x7), region = 125 }
 0x676   :  { %6428 = vsyncpa [#allocation5], 1 }
 0x677   :  { %6430 = vsyncpa [#allocation5 + $0x1], 1 }
 0x678   :  { %6431 = vsyncpa [#allocation7], 1 }

</bundles_post_ra>
